<compile_context>
chip_gen: v7x
topology: tpu7x:2x2x1
jax: 0.10.0
libtpu: 0.0.40
codegen_flags: <defaults>
</compile_context>

<pallas_src>
import jax
import jax.numpy as jnp
from jax.experimental import pallas as pl
from jax.experimental.pallas import tpu as pltpu

N_ACTIONS = 9
N_PROPS = 9                             # number of board propositions (chunks)
N_CHUNK_FEATS = 3                       # features per proposition
N_FEATURES = N_PROPS * N_CHUNK_FEATS    # 27
HID = 9                                 # hidden width of h1 / h2 / g1

# Packed parameter slab layout: (64, 16) f32. Each layer gets a 16-row
# (8-aligned) region; weights stay in torch (out, in) orientation at
# cols [0:in), bias lives in column 9.
SLAB_ROWS, SLAB_COLS = 64, 16
ROW_H1, ROW_H2, ROW_G1, ROW_G2 = 0, 16, 32, 48
BIAS_COL = 9


def _mac_linear(w, b_col, x):
    """VPU linear: w (out,kin) @ x (kin,TB) + b (out,1) -> (out,TB).

    Unrolled broadcast-multiply-accumulate over the tiny contraction dim
    (K = 3 or 9); the MXU is never touched."""
    _, kin = w.shape
    acc = w[:, 0:1] * x[0:1, :] + b_col
    for k in range(1, kin):
        acc = acc + w[:, k:k + 1] * x[k:k + 1, :]
    return acc


def policy_kernel(x_ref, p_ref, out_ref):
    # x_ref  : (27, TB)  -- TB boards in columns (batch on the lane axis)
    # p_ref  : (64, 16)  -- packed parameter slab (resident across grid steps)
    # out_ref: (N_ACTIONS, TB)
    tb = x_ref.shape[1]

    x = x_ref[...]          # single full-tile load; slice in-register below
    p = p_ref[...]          # single slab load per grid step

    w1 = p[ROW_H1:ROW_H1 + HID, 0:N_CHUNK_FEATS]            # (9, 3)
    b1 = p[ROW_H1:ROW_H1 + HID, BIAS_COL:BIAS_COL + 1]      # (9, 1)
    w2 = p[ROW_H2:ROW_H2 + HID, 0:HID]
    b2 = p[ROW_H2:ROW_H2 + HID, BIAS_COL:BIAS_COL + 1]
    g1 = p[ROW_G1:ROW_G1 + HID, 0:HID]
    bg1 = p[ROW_G1:ROW_G1 + HID, BIAS_COL:BIAS_COL + 1]
    g2 = p[ROW_G2:ROW_G2 + N_ACTIONS, 0:HID]
    bg2 = p[ROW_G2:ROW_G2 + N_ACTIONS, BIAS_COL:BIAS_COL + 1]

    # 9 per-proposition branches share h1/h2; sum their outputs.
    z_sum = jnp.zeros((HID, tb), jnp.float32)
    for c in range(N_PROPS):
        xc = x[c * N_CHUNK_FEATS:(c + 1) * N_CHUNK_FEATS, :]    # (3, TB)
        y = jnp.tanh(_mac_linear(w1, b1, xc))                   # (9, TB)
        z_sum = z_sum + jnp.tanh(_mac_linear(w2, b2, y))        # (9, TB)

    z1 = jnp.tanh(_mac_linear(g1, bg1, z_sum))                  # (9, TB)
    logits = _mac_linear(g2, bg2, z1)                           # (n_act, TB)

    # Softmax over the action axis (sublanes); batch stays lane-dense.
    m = jnp.max(logits, axis=0, keepdims=True)                  # (1, TB)
    e = jnp.exp(logits - m)
    s = jnp.sum(e, axis=0, keepdims=True)                       # (1, TB)
    inv = pl.reciprocal(s, approx=True)      # EUP
    inv = inv * (2.0 - s * inv)              # one Newton step -> ~f32 exact
    out_ref[...] = e * inv


def init_params(key, n_actions=N_ACTIONS):
    """PyTorch-style Linear init: U(-1/sqrt(fan_in), 1/sqrt(fan_in))."""
    def linear(key, fan_in, fan_out):
        kw, kb = jax.random.split(key)
        bound = 1.0 / jnp.sqrt(fan_in)
        w = jax.random.uniform(kw, (fan_out, fan_in), jnp.float32, -bound, bound)
        b = jax.random.uniform(kb, (fan_out,), jnp.float32, -bound, bound)
        return w, b

    k1, k2, k3, k4 = jax.random.split(key, 4)
    w1, b1 = linear(k1, N_CHUNK_FEATS, HID)      # h1
    w2, b2 = linear(k2, HID, HID)                # h2
    g1, bg1 = linear(k3, HID, HID)               # g1
    g2, bg2 = linear(k4, HID, n_actions)         # g2
    return dict(w1=w1, b1=b1, w2=w2, b2=b2, g1=g1, bg1=bg1, g2=g2, bg2=bg2)


def pack_params(params):
    """Pack all weights/biases into one (64, 16) f32 slab. Done ONCE on the
    host and reused across rollout steps; the kernel slices it with static
    offsets, so per-call transposes and many tiny DMAs disappear."""
    slab = jnp.zeros((SLAB_ROWS, SLAB_COLS), jnp.float32)
    slab = slab.at[ROW_H1:ROW_H1 + HID, 0:N_CHUNK_FEATS].set(params["w1"])
    slab = slab.at[ROW_H1:ROW_H1 + HID, BIAS_COL].set(params["b1"])
    slab = slab.at[ROW_H2:ROW_H2 + HID, 0:HID].set(params["w2"])
    slab = slab.at[ROW_H2:ROW_H2 + HID, BIAS_COL].set(params["b2"])
    slab = slab.at[ROW_G1:ROW_G1 + HID, 0:HID].set(params["g1"])
    slab = slab.at[ROW_G1:ROW_G1 + HID, BIAS_COL].set(params["bg1"])
    slab = slab.at[ROW_G2:ROW_G2 + N_ACTIONS, 0:HID].set(params["g2"])
    slab = slab.at[ROW_G2:ROW_G2 + N_ACTIONS, BIAS_COL].set(params["bg2"])
    return slab


def policy_forward_batch(x_batch, slab, *, tb=128):
    """x_batch: (B, 27) float32 -> probs: (B, n_actions) float32."""
    B = x_batch.shape[0]
    pad = (-B) % tb
    if pad:
        x_batch = jnp.concatenate(
            [x_batch, jnp.zeros((pad, x_batch.shape[1]), x_batch.dtype)], axis=0)
    bp = x_batch.shape[0]
    xT = x_batch.astype(jnp.float32).T                     # (27, Bp): batch on lanes

    out = pl.pallas_call(
        policy_kernel,
        out_shape=jax.ShapeDtypeStruct((N_ACTIONS, bp), jnp.float32),
        grid=(bp // tb,),
        in_specs=[
            pl.BlockSpec((N_FEATURES, tb), lambda i: (0, i)),
            pl.BlockSpec((SLAB_ROWS, SLAB_COLS), lambda i: (0, 0)),  # resident weights
        ],
        out_specs=pl.BlockSpec((N_ACTIONS, tb), lambda i: (0, i)),   # lane-dense store
        compiler_params=pltpu.CompilerParams(
            dimension_semantics=("parallel",)),
    )(xT, slab)

    probs = out.T                                          # (Bp, n_actions)
    return probs[:B] if pad else probs


def policy_forward_ref(x, params):
    """Pure-JAX single-board reference (matches the PyTorch forward)."""
    X = x.reshape(N_PROPS, N_CHUNK_FEATS).astype(jnp.float32)
    Y = jnp.tanh(X @ params["w1"].T + params["b1"])
    Z = jnp.tanh(Y @ params["w2"].T + params["b2"])
    z = jnp.sum(Z, axis=0)
    z1 = jnp.tanh(z @ params["g1"].T + params["bg1"])
    logits = z1 @ params["g2"].T + params["bg2"]
    return jax.nn.softmax(logits, axis=0)


if __name__ == "__main__":
    key = jax.random.PRNGKey(0)
    k_params, k_x = jax.random.split(key)

    params = init_params(k_params, N_ACTIONS)
    slab = pack_params(params)                 # packed once, reused every call

    B = 8                                      # small batch of boards per call
    x_batch = jax.random.uniform(k_x, (B, N_FEATURES), jnp.float32, -1.0, 1.0)

    probs = jax.block_until_ready(policy_forward_batch(x_batch, slab, tb=128))
    probs_ref = jax.block_until_ready(
        jax.vmap(lambda xb: policy_forward_ref(xb, params))(x_batch))

    assert probs.shape == (B, N_ACTIONS)
    # Tolerances account for the EUP approximate reciprocal (+1 Newton step).
    assert jnp.max(jnp.abs(jnp.sum(probs, axis=-1) - 1.0)) < 1e-4
    assert jnp.allclose(probs, probs_ref, atol=1e-4, rtol=1e-4)
    print("KERNEL_OK")
</pallas_src>

<mosaic_0001>
module attributes {stable_mosaic.version = 11 : i64} {
  func.func @policy_kernel(%arg0: i32, %arg1: memref<27x128xf32, #tpu.memory_space<vmem>>, %arg2: memref<64x16xf32, #tpu.memory_space<vmem>>, %arg3: memref<9x128xf32, #tpu.memory_space<vmem>>) attributes {dimension_semantics = [#tpu.dimension_semantics<parallel>], iteration_bounds = array<i64: 1>, scalar_prefetch = 0 : i64, scratch_operands = 0 : i64, tpu.core_type = #tpu.core_type<tc>, window_params = [{transform_indices = @transform_0, window_bounds = array<i64: 27, 128>}, {pipeline_mode = #tpu.pipeline_mode<synchronous>, transform_indices = @transform_1, window_bounds = array<i64: 64, 16>}, {transform_indices = @transform_2, window_bounds = array<i64: 9, 128>}]} {
    %c0 = arith.constant 0 : index
    %c0_0 = arith.constant 0 : index
    %0 = vector.load %arg1[%c0, %c0_0] : memref<27x128xf32, #tpu.memory_space<vmem>>, vector<27x128xf32>
    %c0_1 = arith.constant 0 : index
    %c0_2 = arith.constant 0 : index
    %1 = vector.load %arg2[%c0_1, %c0_2] : memref<64x16xf32, #tpu.memory_space<vmem>>, vector<64x16xf32>
    %2 = vector.extract_strided_slice %1 {offsets = [0, 0], sizes = [9, 3], strides = [1, 1]} : vector<64x16xf32> to vector<9x3xf32>
    %3 = vector.extract_strided_slice %1 {offsets = [0, 9], sizes = [9, 1], strides = [1, 1]} : vector<64x16xf32> to vector<9x1xf32>
    %4 = vector.extract_strided_slice %1 {offsets = [16, 0], sizes = [9, 9], strides = [1, 1]} : vector<64x16xf32> to vector<9x9xf32>
    %5 = vector.extract_strided_slice %1 {offsets = [16, 9], sizes = [9, 1], strides = [1, 1]} : vector<64x16xf32> to vector<9x1xf32>
    %6 = vector.extract_strided_slice %1 {offsets = [32, 0], sizes = [9, 9], strides = [1, 1]} : vector<64x16xf32> to vector<9x9xf32>
    %7 = vector.extract_strided_slice %1 {offsets = [32, 9], sizes = [9, 1], strides = [1, 1]} : vector<64x16xf32> to vector<9x1xf32>
    %8 = vector.extract_strided_slice %1 {offsets = [48, 0], sizes = [9, 9], strides = [1, 1]} : vector<64x16xf32> to vector<9x9xf32>
    %9 = vector.extract_strided_slice %1 {offsets = [48, 9], sizes = [9, 1], strides = [1, 1]} : vector<64x16xf32> to vector<9x1xf32>
    %cst = arith.constant 0.000000e+00 : f32
    %10 = vector.broadcast %cst : f32 to vector<9x128xf32>
    %11 = vector.extract_strided_slice %0 {offsets = [0, 0], sizes = [3, 128], strides = [1, 1]} : vector<27x128xf32> to vector<3x128xf32>
    %12 = vector.extract_strided_slice %2 {offsets = [0, 0], sizes = [9, 1], strides = [1, 1]} : vector<9x3xf32> to vector<9x1xf32>
    %13 = vector.extract_strided_slice %11 {offsets = [0, 0], sizes = [1, 128], strides = [1, 1]} : vector<3x128xf32> to vector<1x128xf32>
    %14 = vector.broadcast %12 : vector<9x1xf32> to vector<9x128xf32>
    %15 = vector.broadcast %13 : vector<1x128xf32> to vector<9x128xf32>
    %16 = arith.mulf %14, %15 : vector<9x128xf32>
    %17 = vector.broadcast %3 : vector<9x1xf32> to vector<9x128xf32>
    %18 = arith.addf %16, %17 : vector<9x128xf32>
    %19 = vector.extract_strided_slice %2 {offsets = [0, 1], sizes = [9, 1], strides = [1, 1]} : vector<9x3xf32> to vector<9x1xf32>
    %20 = vector.extract_strided_slice %11 {offsets = [1, 0], sizes = [1, 128], strides = [1, 1]} : vector<3x128xf32> to vector<1x128xf32>
    %21 = vector.broadcast %19 : vector<9x1xf32> to vector<9x128xf32>
    %22 = vector.broadcast %20 : vector<1x128xf32> to vector<9x128xf32>
    %23 = arith.mulf %21, %22 : vector<9x128xf32>
    %24 = arith.addf %18, %23 : vector<9x128xf32>
    %25 = vector.extract_strided_slice %2 {offsets = [0, 2], sizes = [9, 1], strides = [1, 1]} : vector<9x3xf32> to vector<9x1xf32>
    %26 = vector.extract_strided_slice %11 {offsets = [2, 0], sizes = [1, 128], strides = [1, 1]} : vector<3x128xf32> to vector<1x128xf32>
    %27 = vector.broadcast %25 : vector<9x1xf32> to vector<9x128xf32>
    %28 = vector.broadcast %26 : vector<1x128xf32> to vector<9x128xf32>
    %29 = arith.mulf %27, %28 : vector<9x128xf32>
    %30 = arith.addf %24, %29 : vector<9x128xf32>
    %31 = math.tanh %30 : vector<9x128xf32>
    %32 = vector.extract_strided_slice %4 {offsets = [0, 0], sizes = [9, 1], strides = [1, 1]} : vector<9x9xf32> to vector<9x1xf32>
    %33 = vector.extract_strided_slice %31 {offsets = [0, 0], sizes = [1, 128], strides = [1, 1]} : vector<9x128xf32> to vector<1x128xf32>
    %34 = vector.broadcast %32 : vector<9x1xf32> to vector<9x128xf32>
    %35 = vector.broadcast %33 : vector<1x128xf32> to vector<9x128xf32>
    %36 = arith.mulf %34, %35 : vector<9x128xf32>
    %37 = vector.broadcast %5 : vector<9x1xf32> to vector<9x128xf32>
    %38 = arith.addf %36, %37 : vector<9x128xf32>
    %39 = vector.extract_strided_slice %4 {offsets = [0, 1], sizes = [9, 1], strides = [1, 1]} : vector<9x9xf32> to vector<9x1xf32>
    %40 = vector.extract_strided_slice %31 {offsets = [1, 0], sizes = [1, 128], strides = [1, 1]} : vector<9x128xf32> to vector<1x128xf32>
    %41 = vector.broadcast %39 : vector<9x1xf32> to vector<9x128xf32>
    %42 = vector.broadcast %40 : vector<1x128xf32> to vector<9x128xf32>
    %43 = arith.mulf %41, %42 : vector<9x128xf32>
    %44 = arith.addf %38, %43 : vector<9x128xf32>
    %45 = vector.extract_strided_slice %4 {offsets = [0, 2], sizes = [9, 1], strides = [1, 1]} : vector<9x9xf32> to vector<9x1xf32>
    %46 = vector.extract_strided_slice %31 {offsets = [2, 0], sizes = [1, 128], strides = [1, 1]} : vector<9x128xf32> to vector<1x128xf32>
    %47 = vector.broadcast %45 : vector<9x1xf32> to vector<9x128xf32>
    %48 = vector.broadcast %46 : vector<1x128xf32> to vector<9x128xf32>
    %49 = arith.mulf %47, %48 : vector<9x128xf32>
    %50 = arith.addf %44, %49 : vector<9x128xf32>
    %51 = vector.extract_strided_slice %4 {offsets = [0, 3], sizes = [9, 1], strides = [1, 1]} : vector<9x9xf32> to vector<9x1xf32>
    %52 = vector.extract_strided_slice %31 {offsets = [3, 0], sizes = [1, 128], strides = [1, 1]} : vector<9x128xf32> to vector<1x128xf32>
    %53 = vector.broadcast %51 : vector<9x1xf32> to vector<9x128xf32>
    %54 = vector.broadcast %52 : vector<1x128xf32> to vector<9x128xf32>
    %55 = arith.mulf %53, %54 : vector<9x128xf32>
    %56 = arith.addf %50, %55 : vector<9x128xf32>
    %57 = vector.extract_strided_slice %4 {offsets = [0, 4], sizes = [9, 1], strides = [1, 1]} : vector<9x9xf32> to vector<9x1xf32>
    %58 = vector.extract_strided_slice %31 {offsets = [4, 0], sizes = [1, 128], strides = [1, 1]} : vector<9x128xf32> to vector<1x128xf32>
    %59 = vector.broadcast %57 : vector<9x1xf32> to vector<9x128xf32>
    %60 = vector.broadcast %58 : vector<1x128xf32> to vector<9x128xf32>
    %61 = arith.mulf %59, %60 : vector<9x128xf32>
    %62 = arith.addf %56, %61 : vector<9x128xf32>
    %63 = vector.extract_strided_slice %4 {offsets = [0, 5], sizes = [9, 1], strides = [1, 1]} : vector<9x9xf32> to vector<9x1xf32>
    %64 = vector.extract_strided_slice %31 {offsets = [5, 0], sizes = [1, 128], strides = [1, 1]} : vector<9x128xf32> to vector<1x128xf32>
    %65 = vector.broadcast %63 : vector<9x1xf32> to vector<9x128xf32>
    %66 = vector.broadcast %64 : vector<1x128xf32> to vector<9x128xf32>
    %67 = arith.mulf %65, %66 : vector<9x128xf32>
    %68 = arith.addf %62, %67 : vector<9x128xf32>
    %69 = vector.extract_strided_slice %4 {offsets = [0, 6], sizes = [9, 1], strides = [1, 1]} : vector<9x9xf32> to vector<9x1xf32>
    %70 = vector.extract_strided_slice %31 {offsets = [6, 0], sizes = [1, 128], strides = [1, 1]} : vector<9x128xf32> to vector<1x128xf32>
    %71 = vector.broadcast %69 : vector<9x1xf32> to vector<9x128xf32>
    %72 = vector.broadcast %70 : vector<1x128xf32> to vector<9x128xf32>
    %73 = arith.mulf %71, %72 : vector<9x128xf32>
    %74 = arith.addf %68, %73 : vector<9x128xf32>
    %75 = vector.extract_strided_slice %4 {offsets = [0, 7], sizes = [9, 1], strides = [1, 1]} : vector<9x9xf32> to vector<9x1xf32>
    %76 = vector.extract_strided_slice %31 {offsets = [7, 0], sizes = [1, 128], strides = [1, 1]} : vector<9x128xf32> to vector<1x128xf32>
    %77 = vector.broadcast %75 : vector<9x1xf32> to vector<9x128xf32>
    %78 = vector.broadcast %76 : vector<1x128xf32> to vector<9x128xf32>
    %79 = arith.mulf %77, %78 : vector<9x128xf32>
    %80 = arith.addf %74, %79 : vector<9x128xf32>
    %81 = vector.extract_strided_slice %4 {offsets = [0, 8], sizes = [9, 1], strides = [1, 1]} : vector<9x9xf32> to vector<9x1xf32>
    %82 = vector.extract_strided_slice %31 {offsets = [8, 0], sizes = [1, 128], strides = [1, 1]} : vector<9x128xf32> to vector<1x128xf32>
    %83 = vector.broadcast %81 : vector<9x1xf32> to vector<9x128xf32>
    %84 = vector.broadcast %82 : vector<1x128xf32> to vector<9x128xf32>
    %85 = arith.mulf %83, %84 : vector<9x128xf32>
    %86 = arith.addf %80, %85 : vector<9x128xf32>
    %87 = math.tanh %86 : vector<9x128xf32>
    %88 = arith.addf %10, %87 : vector<9x128xf32>
    %89 = vector.extract_strided_slice %0 {offsets = [3, 0], sizes = [3, 128], strides = [1, 1]} : vector<27x128xf32> to vector<3x128xf32>
    %90 = vector.extract_strided_slice %2 {offsets = [0, 0], sizes = [9, 1], strides = [1, 1]} : vector<9x3xf32> to vector<9x1xf32>
    %91 = vector.extract_strided_slice %89 {offsets = [0, 0], sizes = [1, 128], strides = [1, 1]} : vector<3x128xf32> to vector<1x128xf32>
    %92 = vector.broadcast %90 : vector<9x1xf32> to vector<9x128xf32>
    %93 = vector.broadcast %91 : vector<1x128xf32> to vector<9x128xf32>
    %94 = arith.mulf %92, %93 : vector<9x128xf32>
    %95 = vector.broadcast %3 : vector<9x1xf32> to vector<9x128xf32>
    %96 = arith.addf %94, %95 : vector<9x128xf32>
    %97 = vector.extract_strided_slice %2 {offsets = [0, 1], sizes = [9, 1], strides = [1, 1]} : vector<9x3xf32> to vector<9x1xf32>
    %98 = vector.extract_strided_slice %89 {offsets = [1, 0], sizes = [1, 128], strides = [1, 1]} : vector<3x128xf32> to vector<1x128xf32>
    %99 = vector.broadcast %97 : vector<9x1xf32> to vector<9x128xf32>
    %100 = vector.broadcast %98 : vector<1x128xf32> to vector<9x128xf32>
    %101 = arith.mulf %99, %100 : vector<9x128xf32>
    %102 = arith.addf %96, %101 : vector<9x128xf32>
    %103 = vector.extract_strided_slice %2 {offsets = [0, 2], sizes = [9, 1], strides = [1, 1]} : vector<9x3xf32> to vector<9x1xf32>
    %104 = vector.extract_strided_slice %89 {offsets = [2, 0], sizes = [1, 128], strides = [1, 1]} : vector<3x128xf32> to vector<1x128xf32>
    %105 = vector.broadcast %103 : vector<9x1xf32> to vector<9x128xf32>
    %106 = vector.broadcast %104 : vector<1x128xf32> to vector<9x128xf32>
    %107 = arith.mulf %105, %106 : vector<9x128xf32>
    %108 = arith.addf %102, %107 : vector<9x128xf32>
    %109 = math.tanh %108 : vector<9x128xf32>
    %110 = vector.extract_strided_slice %4 {offsets = [0, 0], sizes = [9, 1], strides = [1, 1]} : vector<9x9xf32> to vector<9x1xf32>
    %111 = vector.extract_strided_slice %109 {offsets = [0, 0], sizes = [1, 128], strides = [1, 1]} : vector<9x128xf32> to vector<1x128xf32>
    %112 = vector.broadcast %110 : vector<9x1xf32> to vector<9x128xf32>
    %113 = vector.broadcast %111 : vector<1x128xf32> to vector<9x128xf32>
    %114 = arith.mulf %112, %113 : vector<9x128xf32>
    %115 = vector.broadcast %5 : vector<9x1xf32> to vector<9x128xf32>
    %116 = arith.addf %114, %115 : vector<9x128xf32>
    %117 = vector.extract_strided_slice %4 {offsets = [0, 1], sizes = [9, 1], strides = [1, 1]} : vector<9x9xf32> to vector<9x1xf32>
    %118 = vector.extract_strided_slice %109 {offsets = [1, 0], sizes = [1, 128], strides = [1, 1]} : vector<9x128xf32> to vector<1x128xf32>
    %119 = vector.broadcast %117 : vector<9x1xf32> to vector<9x128xf32>
    %120 = vector.broadcast %118 : vector<1x128xf32> to vector<9x128xf32>
    %121 = arith.mulf %119, %120 : vector<9x128xf32>
    %122 = arith.addf %116, %121 : vector<9x128xf32>
    %123 = vector.extract_strided_slice %4 {offsets = [0, 2], sizes = [9, 1], strides = [1, 1]} : vector<9x9xf32> to vector<9x1xf32>
    %124 = vector.extract_strided_slice %109 {offsets = [2, 0], sizes = [1, 128], strides = [1, 1]} : vector<9x128xf32> to vector<1x128xf32>
    %125 = vector.broadcast %123 : vector<9x1xf32> to vector<9x128xf32>
    %126 = vector.broadcast %124 : vector<1x128xf32> to vector<9x128xf32>
    %127 = arith.mulf %125, %126 : vector<9x128xf32>
    %128 = arith.addf %122, %127 : vector<9x128xf32>
    %129 = vector.extract_strided_slice %4 {offsets = [0, 3], sizes = [9, 1], strides = [1, 1]} : vector<9x9xf32> to vector<9x1xf32>
    %130 = vector.extract_strided_slice %109 {offsets = [3, 0], sizes = [1, 128], strides = [1, 1]} : vector<9x128xf32> to vector<1x128xf32>
    %131 = vector.broadcast %129 : vector<9x1xf32> to vector<9x128xf32>
    %132 = vector.broadcast %130 : vector<1x128xf32> to vector<9x128xf32>
    %133 = arith.mulf %131, %132 : vector<9x128xf32>
    %134 = arith.addf %128, %133 : vector<9x128xf32>
    %135 = vector.extract_strided_slice %4 {offsets = [0, 4], sizes = [9, 1], strides = [1, 1]} : vector<9x9xf32> to vector<9x1xf32>
    %136 = vector.extract_strided_slice %109 {offsets = [4, 0], sizes = [1, 128], strides = [1, 1]} : vector<9x128xf32> to vector<1x128xf32>
    %137 = vector.broadcast %135 : vector<9x1xf32> to vector<9x128xf32>
    %138 = vector.broadcast %136 : vector<1x128xf32> to vector<9x128xf32>
    %139 = arith.mulf %137, %138 : vector<9x128xf32>
    %140 = arith.addf %134, %139 : vector<9x128xf32>
    %141 = vector.extract_strided_slice %4 {offsets = [0, 5], sizes = [9, 1], strides = [1, 1]} : vector<9x9xf32> to vector<9x1xf32>
    %142 = vector.extract_strided_slice %109 {offsets = [5, 0], sizes = [1, 128], strides = [1, 1]} : vector<9x128xf32> to vector<1x128xf32>
    %143 = vector.broadcast %141 : vector<9x1xf32> to vector<9x128xf32>
    %144 = vector.broadcast %142 : vector<1x128xf32> to vector<9x128xf32>
    %145 = arith.mulf %143, %144 : vector<9x128xf32>
    %146 = arith.addf %140, %145 : vector<9x128xf32>
    %147 = vector.extract_strided_slice %4 {offsets = [0, 6], sizes = [9, 1], strides = [1, 1]} : vector<9x9xf32> to vector<9x1xf32>
    %148 = vector.extract_strided_slice %109 {offsets = [6, 0], sizes = [1, 128], strides = [1, 1]} : vector<9x128xf32> to vector<1x128xf32>
    %149 = vector.broadcast %147 : vector<9x1xf32> to vector<9x128xf32>
    %150 = vector.broadcast %148 : vector<1x128xf32> to vector<9x128xf32>
    %151 = arith.mulf %149, %150 : vector<9x128xf32>
    %152 = arith.addf %146, %151 : vector<9x128xf32>
    %153 = vector.extract_strided_slice %4 {offsets = [0, 7], sizes = [9, 1], strides = [1, 1]} : vector<9x9xf32> to vector<9x1xf32>
    %154 = vector.extract_strided_slice %109 {offsets = [7, 0], sizes = [1, 128], strides = [1, 1]} : vector<9x128xf32> to vector<1x128xf32>
    %155 = vector.broadcast %153 : vector<9x1xf32> to vector<9x128xf32>
    %156 = vector.broadcast %154 : vector<1x128xf32> to vector<9x128xf32>
    %157 = arith.mulf %155, %156 : vector<9x128xf32>
    %158 = arith.addf %152, %157 : vector<9x128xf32>
    %159 = vector.extract_strided_slice %4 {offsets = [0, 8], sizes = [9, 1], strides = [1, 1]} : vector<9x9xf32> to vector<9x1xf32>
    %160 = vector.extract_strided_slice %109 {offsets = [8, 0], sizes = [1, 128], strides = [1, 1]} : vector<9x128xf32> to vector<1x128xf32>
    %161 = vector.broadcast %159 : vector<9x1xf32> to vector<9x128xf32>
    %162 = vector.broadcast %160 : vector<1x128xf32> to vector<9x128xf32>
    %163 = arith.mulf %161, %162 : vector<9x128xf32>
    %164 = arith.addf %158, %163 : vector<9x128xf32>
    %165 = math.tanh %164 : vector<9x128xf32>
    %166 = arith.addf %88, %165 : vector<9x128xf32>
    %167 = vector.extract_strided_slice %0 {offsets = [6, 0], sizes = [3, 128], strides = [1, 1]} : vector<27x128xf32> to vector<3x128xf32>
    %168 = vector.extract_strided_slice %2 {offsets = [0, 0], sizes = [9, 1], strides = [1, 1]} : vector<9x3xf32> to vector<9x1xf32>
    %169 = vector.extract_strided_slice %167 {offsets = [0, 0], sizes = [1, 128], strides = [1, 1]} : vector<3x128xf32> to vector<1x128xf32>
    %170 = vector.broadcast %168 : vector<9x1xf32> to vector<9x128xf32>
    %171 = vector.broadcast %169 : vector<1x128xf32> to vector<9x128xf32>
    %172 = arith.mulf %170, %171 : vector<9x128xf32>
    %173 = vector.broadcast %3 : vector<9x1xf32> to vector<9x128xf32>
    %174 = arith.addf %172, %173 : vector<9x128xf32>
    %175 = vector.extract_strided_slice %2 {offsets = [0, 1], sizes = [9, 1], strides = [1, 1]} : vector<9x3xf32> to vector<9x1xf32>
    %176 = vector.extract_strided_slice %167 {offsets = [1, 0], sizes = [1, 128], strides = [1, 1]} : vector<3x128xf32> to vector<1x128xf32>
    %177 = vector.broadcast %175 : vector<9x1xf32> to vector<9x128xf32>
    %178 = vector.broadcast %176 : vector<1x128xf32> to vector<9x128xf32>
    %179 = arith.mulf %177, %178 : vector<9x128xf32>
    %180 = arith.addf %174, %179 : vector<9x128xf32>
    %181 = vector.extract_strided_slice %2 {offsets = [0, 2], sizes = [9, 1], strides = [1, 1]} : vector<9x3xf32> to vector<9x1xf32>
    %182 = vector.extract_strided_slice %167 {offsets = [2, 0], sizes = [1, 128], strides = [1, 1]} : vector<3x128xf32> to vector<1x128xf32>
    %183 = vector.broadcast %181 : vector<9x1xf32> to vector<9x128xf32>
    %184 = vector.broadcast %182 : vector<1x128xf32> to vector<9x128xf32>
    %185 = arith.mulf %183, %184 : vector<9x128xf32>
    %186 = arith.addf %180, %185 : vector<9x128xf32>
    %187 = math.tanh %186 : vector<9x128xf32>
    %188 = vector.extract_strided_slice %4 {offsets = [0, 0], sizes = [9, 1], strides = [1, 1]} : vector<9x9xf32> to vector<9x1xf32>
    %189 = vector.extract_strided_slice %187 {offsets = [0, 0], sizes = [1, 128], strides = [1, 1]} : vector<9x128xf32> to vector<1x128xf32>
    %190 = vector.broadcast %188 : vector<9x1xf32> to vector<9x128xf32>
    %191 = vector.broadcast %189 : vector<1x128xf32> to vector<9x128xf32>
    %192 = arith.mulf %190, %191 : vector<9x128xf32>
    %193 = vector.broadcast %5 : vector<9x1xf32> to vector<9x128xf32>
    %194 = arith.addf %192, %193 : vector<9x128xf32>
    %195 = vector.extract_strided_slice %4 {offsets = [0, 1], sizes = [9, 1], strides = [1, 1]} : vector<9x9xf32> to vector<9x1xf32>
    %196 = vector.extract_strided_slice %187 {offsets = [1, 0], sizes = [1, 128], strides = [1, 1]} : vector<9x128xf32> to vector<1x128xf32>
    %197 = vector.broadcast %195 : vector<9x1xf32> to vector<9x128xf32>
    %198 = vector.broadcast %196 : vector<1x128xf32> to vector<9x128xf32>
    %199 = arith.mulf %197, %198 : vector<9x128xf32>
    %200 = arith.addf %194, %199 : vector<9x128xf32>
    %201 = vector.extract_strided_slice %4 {offsets = [0, 2], sizes = [9, 1], strides = [1, 1]} : vector<9x9xf32> to vector<9x1xf32>
    %202 = vector.extract_strided_slice %187 {offsets = [2, 0], sizes = [1, 128], strides = [1, 1]} : vector<9x128xf32> to vector<1x128xf32>
    %203 = vector.broadcast %201 : vector<9x1xf32> to vector<9x128xf32>
    %204 = vector.broadcast %202 : vector<1x128xf32> to vector<9x128xf32>
    %205 = arith.mulf %203, %204 : vector<9x128xf32>
    %206 = arith.addf %200, %205 : vector<9x128xf32>
    %207 = vector.extract_strided_slice %4 {offsets = [0, 3], sizes = [9, 1], strides = [1, 1]} : vector<9x9xf32> to vector<9x1xf32>
    %208 = vector.extract_strided_slice %187 {offsets = [3, 0], sizes = [1, 128], strides = [1, 1]} : vector<9x128xf32> to vector<1x128xf32>
    %209 = vector.broadcast %207 : vector<9x1xf32> to vector<9x128xf32>
    %210 = vector.broadcast %208 : vector<1x128xf32> to vector<9x128xf32>
    %211 = arith.mulf %209, %210 : vector<9x128xf32>
    %212 = arith.addf %206, %211 : vector<9x128xf32>
    %213 = vector.extract_strided_slice %4 {offsets = [0, 4], sizes = [9, 1], strides = [1, 1]} : vector<9x9xf32> to vector<9x1xf32>
    %214 = vector.extract_strided_slice %187 {offsets = [4, 0], sizes = [1, 128], strides = [1, 1]} : vector<9x128xf32> to vector<1x128xf32>
    %215 = vector.broadcast %213 : vector<9x1xf32> to vector<9x128xf32>
    %216 = vector.broadcast %214 : vector<1x128xf32> to vector<9x128xf32>
    %217 = arith.mulf %215, %216 : vector<9x128xf32>
    %218 = arith.addf %212, %217 : vector<9x128xf32>
    %219 = vector.extract_strided_slice %4 {offsets = [0, 5], sizes = [9, 1], strides = [1, 1]} : vector<9x9xf32> to vector<9x1xf32>
    %220 = vector.extract_strided_slice %187 {offsets = [5, 0], sizes = [1, 128], strides = [1, 1]} : vector<9x128xf32> to vector<1x128xf32>
    %221 = vector.broadcast %219 : vector<9x1xf32> to vector<9x128xf32>
    %222 = vector.broadcast %220 : vector<1x128xf32> to vector<9x128xf32>
    %223 = arith.mulf %221, %222 : vector<9x128xf32>
    %224 = arith.addf %218, %223 : vector<9x128xf32>
    %225 = vector.extract_strided_slice %4 {offsets = [0, 6], sizes = [9, 1], strides = [1, 1]} : vector<9x9xf32> to vector<9x1xf32>
    %226 = vector.extract_strided_slice %187 {offsets = [6, 0], sizes = [1, 128], strides = [1, 1]} : vector<9x128xf32> to vector<1x128xf32>
    %227 = vector.broadcast %225 : vector<9x1xf32> to vector<9x128xf32>
    %228 = vector.broadcast %226 : vector<1x128xf32> to vector<9x128xf32>
    %229 = arith.mulf %227, %228 : vector<9x128xf32>
    %230 = arith.addf %224, %229 : vector<9x128xf32>
    %231 = vector.extract_strided_slice %4 {offsets = [0, 7], sizes = [9, 1], strides = [1, 1]} : vector<9x9xf32> to vector<9x1xf32>
    %232 = vector.extract_strided_slice %187 {offsets = [7, 0], sizes = [1, 128], strides = [1, 1]} : vector<9x128xf32> to vector<1x128xf32>
    %233 = vector.broadcast %231 : vector<9x1xf32> to vector<9x128xf32>
    %234 = vector.broadcast %232 : vector<1x128xf32> to vector<9x128xf32>
    %235 = arith.mulf %233, %234 : vector<9x128xf32>
    %236 = arith.addf %230, %235 : vector<9x128xf32>
    %237 = vector.extract_strided_slice %4 {offsets = [0, 8], sizes = [9, 1], strides = [1, 1]} : vector<9x9xf32> to vector<9x1xf32>
    %238 = vector.extract_strided_slice %187 {offsets = [8, 0], sizes = [1, 128], strides = [1, 1]} : vector<9x128xf32> to vector<1x128xf32>
    %239 = vector.broadcast %237 : vector<9x1xf32> to vector<9x128xf32>
    %240 = vector.broadcast %238 : vector<1x128xf32> to vector<9x128xf32>
    %241 = arith.mulf %239, %240 : vector<9x128xf32>
    %242 = arith.addf %236, %241 : vector<9x128xf32>
    %243 = math.tanh %242 : vector<9x128xf32>
    %244 = arith.addf %166, %243 : vector<9x128xf32>
    %245 = vector.extract_strided_slice %0 {offsets = [9, 0], sizes = [3, 128], strides = [1, 1]} : vector<27x128xf32> to vector<3x128xf32>
    %246 = vector.extract_strided_slice %2 {offsets = [0, 0], sizes = [9, 1], strides = [1, 1]} : vector<9x3xf32> to vector<9x1xf32>
    %247 = vector.extract_strided_slice %245 {offsets = [0, 0], sizes = [1, 128], strides = [1, 1]} : vector<3x128xf32> to vector<1x128xf32>
    %248 = vector.broadcast %246 : vector<9x1xf32> to vector<9x128xf32>
    %249 = vector.broadcast %247 : vector<1x128xf32> to vector<9x128xf32>
    %250 = arith.mulf %248, %249 : vector<9x128xf32>
    %251 = vector.broadcast %3 : vector<9x1xf32> to vector<9x128xf32>
    %252 = arith.addf %250, %251 : vector<9x128xf32>
    %253 = vector.extract_strided_slice %2 {offsets = [0, 1], sizes = [9, 1], strides = [1, 1]} : vector<9x3xf32> to vector<9x1xf32>
    %254 = vector.extract_strided_slice %245 {offsets = [1, 0], sizes = [1, 128], strides = [1, 1]} : vector<3x128xf32> to vector<1x128xf32>
    %255 = vector.broadcast %253 : vector<9x1xf32> to vector<9x128xf32>
    %256 = vector.broadcast %254 : vector<1x128xf32> to vector<9x128xf32>
    %257 = arith.mulf %255, %256 : vector<9x128xf32>
    %258 = arith.addf %252, %257 : vector<9x128xf32>
    %259 = vector.extract_strided_slice %2 {offsets = [0, 2], sizes = [9, 1], strides = [1, 1]} : vector<9x3xf32> to vector<9x1xf32>
    %260 = vector.extract_strided_slice %245 {offsets = [2, 0], sizes = [1, 128], strides = [1, 1]} : vector<3x128xf32> to vector<1x128xf32>
    %261 = vector.broadcast %259 : vector<9x1xf32> to vector<9x128xf32>
    %262 = vector.broadcast %260 : vector<1x128xf32> to vector<9x128xf32>
    %263 = arith.mulf %261, %262 : vector<9x128xf32>
    %264 = arith.addf %258, %263 : vector<9x128xf32>
    %265 = math.tanh %264 : vector<9x128xf32>
    %266 = vector.extract_strided_slice %4 {offsets = [0, 0], sizes = [9, 1], strides = [1, 1]} : vector<9x9xf32> to vector<9x1xf32>
    %267 = vector.extract_strided_slice %265 {offsets = [0, 0], sizes = [1, 128], strides = [1, 1]} : vector<9x128xf32> to vector<1x128xf32>
    %268 = vector.broadcast %266 : vector<9x1xf32> to vector<9x128xf32>
    %269 = vector.broadcast %267 : vector<1x128xf32> to vector<9x128xf32>
    %270 = arith.mulf %268, %269 : vector<9x128xf32>
    %271 = vector.broadcast %5 : vector<9x1xf32> to vector<9x128xf32>
    %272 = arith.addf %270, %271 : vector<9x128xf32>
    %273 = vector.extract_strided_slice %4 {offsets = [0, 1], sizes = [9, 1], strides = [1, 1]} : vector<9x9xf32> to vector<9x1xf32>
    %274 = vector.extract_strided_slice %265 {offsets = [1, 0], sizes = [1, 128], strides = [1, 1]} : vector<9x128xf32> to vector<1x128xf32>
    %275 = vector.broadcast %273 : vector<9x1xf32> to vector<9x128xf32>
    %276 = vector.broadcast %274 : vector<1x128xf32> to vector<9x128xf32>
    %277 = arith.mulf %275, %276 : vector<9x128xf32>
    %278 = arith.addf %272, %277 : vector<9x128xf32>
    %279 = vector.extract_strided_slice %4 {offsets = [0, 2], sizes = [9, 1], strides = [1, 1]} : vector<9x9xf32> to vector<9x1xf32>
    %280 = vector.extract_strided_slice %265 {offsets = [2, 0], sizes = [1, 128], strides = [1, 1]} : vector<9x128xf32> to vector<1x128xf32>
    %281 = vector.broadcast %279 : vector<9x1xf32> to vector<9x128xf32>
    %282 = vector.broadcast %280 : vector<1x128xf32> to vector<9x128xf32>
    %283 = arith.mulf %281, %282 : vector<9x128xf32>
    %284 = arith.addf %278, %283 : vector<9x128xf32>
    %285 = vector.extract_strided_slice %4 {offsets = [0, 3], sizes = [9, 1], strides = [1, 1]} : vector<9x9xf32> to vector<9x1xf32>
    %286 = vector.extract_strided_slice %265 {offsets = [3, 0], sizes = [1, 128], strides = [1, 1]} : vector<9x128xf32> to vector<1x128xf32>
    %287 = vector.broadcast %285 : vector<9x1xf32> to vector<9x128xf32>
    %288 = vector.broadcast %286 : vector<1x128xf32> to vector<9x128xf32>
    %289 = arith.mulf %287, %288 : vector<9x128xf32>
    %290 = arith.addf %284, %289 : vector<9x128xf32>
    %291 = vector.extract_strided_slice %4 {offsets = [0, 4], sizes = [9, 1], strides = [1, 1]} : vector<9x9xf32> to vector<9x1xf32>
    %292 = vector.extract_strided_slice %265 {offsets = [4, 0], sizes = [1, 128], strides = [1, 1]} : vector<9x128xf32> to vector<1x128xf32>
    %293 = vector.broadcast %291 : vector<9x1xf32> to vector<9x128xf32>
    %294 = vector.broadcast %292 : vector<1x128xf32> to vector<9x128xf32>
    %295 = arith.mulf %293, %294 : vector<9x128xf32>
    %296 = arith.addf %290, %295 : vector<9x128xf32>
    %297 = vector.extract_strided_slice %4 {offsets = [0, 5], sizes = [9, 1], strides = [1, 1]} : vector<9x9xf32> to vector<9x1xf32>
    %298 = vector.extract_strided_slice %265 {offsets = [5, 0], sizes = [1, 128], strides = [1, 1]} : vector<9x128xf32> to vector<1x128xf32>
    %299 = vector.broadcast %297 : vector<9x1xf32> to vector<9x128xf32>
    %300 = vector.broadcast %298 : vector<1x128xf32> to vector<9x128xf32>
    %301 = arith.mulf %299, %300 : vector<9x128xf32>
    %302 = arith.addf %296, %301 : vector<9x128xf32>
    %303 = vector.extract_strided_slice %4 {offsets = [0, 6], sizes = [9, 1], strides = [1, 1]} : vector<9x9xf32> to vector<9x1xf32>
    %304 = vector.extract_strided_slice %265 {offsets = [6, 0], sizes = [1, 128], strides = [1, 1]} : vector<9x128xf32> to vector<1x128xf32>
    %305 = vector.broadcast %303 : vector<9x1xf32> to vector<9x128xf32>
    %306 = vector.broadcast %304 : vector<1x128xf32> to vector<9x128xf32>
    %307 = arith.mulf %305, %306 : vector<9x128xf32>
    %308 = arith.addf %302, %307 : vector<9x128xf32>
    %309 = vector.extract_strided_slice %4 {offsets = [0, 7], sizes = [9, 1], strides = [1, 1]} : vector<9x9xf32> to vector<9x1xf32>
    %310 = vector.extract_strided_slice %265 {offsets = [7, 0], sizes = [1, 128], strides = [1, 1]} : vector<9x128xf32> to vector<1x128xf32>
    %311 = vector.broadcast %309 : vector<9x1xf32> to vector<9x128xf32>
    %312 = vector.broadcast %310 : vector<1x128xf32> to vector<9x128xf32>
    %313 = arith.mulf %311, %312 : vector<9x128xf32>
    %314 = arith.addf %308, %313 : vector<9x128xf32>
    %315 = vector.extract_strided_slice %4 {offsets = [0, 8], sizes = [9, 1], strides = [1, 1]} : vector<9x9xf32> to vector<9x1xf32>
    %316 = vector.extract_strided_slice %265 {offsets = [8, 0], sizes = [1, 128], strides = [1, 1]} : vector<9x128xf32> to vector<1x128xf32>
    %317 = vector.broadcast %315 : vector<9x1xf32> to vector<9x128xf32>
    %318 = vector.broadcast %316 : vector<1x128xf32> to vector<9x128xf32>
    %319 = arith.mulf %317, %318 : vector<9x128xf32>
    %320 = arith.addf %314, %319 : vector<9x128xf32>
    %321 = math.tanh %320 : vector<9x128xf32>
    %322 = arith.addf %244, %321 : vector<9x128xf32>
    %323 = vector.extract_strided_slice %0 {offsets = [12, 0], sizes = [3, 128], strides = [1, 1]} : vector<27x128xf32> to vector<3x128xf32>
    %324 = vector.extract_strided_slice %2 {offsets = [0, 0], sizes = [9, 1], strides = [1, 1]} : vector<9x3xf32> to vector<9x1xf32>
    %325 = vector.extract_strided_slice %323 {offsets = [0, 0], sizes = [1, 128], strides = [1, 1]} : vector<3x128xf32> to vector<1x128xf32>
    %326 = vector.broadcast %324 : vector<9x1xf32> to vector<9x128xf32>
    %327 = vector.broadcast %325 : vector<1x128xf32> to vector<9x128xf32>
    %328 = arith.mulf %326, %327 : vector<9x128xf32>
    %329 = vector.broadcast %3 : vector<9x1xf32> to vector<9x128xf32>
    %330 = arith.addf %328, %329 : vector<9x128xf32>
    %331 = vector.extract_strided_slice %2 {offsets = [0, 1], sizes = [9, 1], strides = [1, 1]} : vector<9x3xf32> to vector<9x1xf32>
    %332 = vector.extract_strided_slice %323 {offsets = [1, 0], sizes = [1, 128], strides = [1, 1]} : vector<3x128xf32> to vector<1x128xf32>
    %333 = vector.broadcast %331 : vector<9x1xf32> to vector<9x128xf32>
    %334 = vector.broadcast %332 : vector<1x128xf32> to vector<9x128xf32>
    %335 = arith.mulf %333, %334 : vector<9x128xf32>
    %336 = arith.addf %330, %335 : vector<9x128xf32>
    %337 = vector.extract_strided_slice %2 {offsets = [0, 2], sizes = [9, 1], strides = [1, 1]} : vector<9x3xf32> to vector<9x1xf32>
    %338 = vector.extract_strided_slice %323 {offsets = [2, 0], sizes = [1, 128], strides = [1, 1]} : vector<3x128xf32> to vector<1x128xf32>
    %339 = vector.broadcast %337 : vector<9x1xf32> to vector<9x128xf32>
    %340 = vector.broadcast %338 : vector<1x128xf32> to vector<9x128xf32>
    %341 = arith.mulf %339, %340 : vector<9x128xf32>
    %342 = arith.addf %336, %341 : vector<9x128xf32>
    %343 = math.tanh %342 : vector<9x128xf32>
    %344 = vector.extract_strided_slice %4 {offsets = [0, 0], sizes = [9, 1], strides = [1, 1]} : vector<9x9xf32> to vector<9x1xf32>
    %345 = vector.extract_strided_slice %343 {offsets = [0, 0], sizes = [1, 128], strides = [1, 1]} : vector<9x128xf32> to vector<1x128xf32>
    %346 = vector.broadcast %344 : vector<9x1xf32> to vector<9x128xf32>
    %347 = vector.broadcast %345 : vector<1x128xf32> to vector<9x128xf32>
    %348 = arith.mulf %346, %347 : vector<9x128xf32>
    %349 = vector.broadcast %5 : vector<9x1xf32> to vector<9x128xf32>
    %350 = arith.addf %348, %349 : vector<9x128xf32>
    %351 = vector.extract_strided_slice %4 {offsets = [0, 1], sizes = [9, 1], strides = [1, 1]} : vector<9x9xf32> to vector<9x1xf32>
    %352 = vector.extract_strided_slice %343 {offsets = [1, 0], sizes = [1, 128], strides = [1, 1]} : vector<9x128xf32> to vector<1x128xf32>
    %353 = vector.broadcast %351 : vector<9x1xf32> to vector<9x128xf32>
    %354 = vector.broadcast %352 : vector<1x128xf32> to vector<9x128xf32>
    %355 = arith.mulf %353, %354 : vector<9x128xf32>
    %356 = arith.addf %350, %355 : vector<9x128xf32>
    %357 = vector.extract_strided_slice %4 {offsets = [0, 2], sizes = [9, 1], strides = [1, 1]} : vector<9x9xf32> to vector<9x1xf32>
    %358 = vector.extract_strided_slice %343 {offsets = [2, 0], sizes = [1, 128], strides = [1, 1]} : vector<9x128xf32> to vector<1x128xf32>
    %359 = vector.broadcast %357 : vector<9x1xf32> to vector<9x128xf32>
    %360 = vector.broadcast %358 : vector<1x128xf32> to vector<9x128xf32>
    %361 = arith.mulf %359, %360 : vector<9x128xf32>
    %362 = arith.addf %356, %361 : vector<9x128xf32>
    %363 = vector.extract_strided_slice %4 {offsets = [0, 3], sizes = [9, 1], strides = [1, 1]} : vector<9x9xf32> to vector<9x1xf32>
    %364 = vector.extract_strided_slice %343 {offsets = [3, 0], sizes = [1, 128], strides = [1, 1]} : vector<9x128xf32> to vector<1x128xf32>
    %365 = vector.broadcast %363 : vector<9x1xf32> to vector<9x128xf32>
    %366 = vector.broadcast %364 : vector<1x128xf32> to vector<9x128xf32>
    %367 = arith.mulf %365, %366 : vector<9x128xf32>
    %368 = arith.addf %362, %367 : vector<9x128xf32>
    %369 = vector.extract_strided_slice %4 {offsets = [0, 4], sizes = [9, 1], strides = [1, 1]} : vector<9x9xf32> to vector<9x1xf32>
    %370 = vector.extract_strided_slice %343 {offsets = [4, 0], sizes = [1, 128], strides = [1, 1]} : vector<9x128xf32> to vector<1x128xf32>
    %371 = vector.broadcast %369 : vector<9x1xf32> to vector<9x128xf32>
    %372 = vector.broadcast %370 : vector<1x128xf32> to vector<9x128xf32>
    %373 = arith.mulf %371, %372 : vector<9x128xf32>
    %374 = arith.addf %368, %373 : vector<9x128xf32>
    %375 = vector.extract_strided_slice %4 {offsets = [0, 5], sizes = [9, 1], strides = [1, 1]} : vector<9x9xf32> to vector<9x1xf32>
    %376 = vector.extract_strided_slice %343 {offsets = [5, 0], sizes = [1, 128], strides = [1, 1]} : vector<9x128xf32> to vector<1x128xf32>
    %377 = vector.broadcast %375 : vector<9x1xf32> to vector<9x128xf32>
    %378 = vector.broadcast %376 : vector<1x128xf32> to vector<9x128xf32>
    %379 = arith.mulf %377, %378 : vector<9x128xf32>
    %380 = arith.addf %374, %379 : vector<9x128xf32>
    %381 = vector.extract_strided_slice %4 {offsets = [0, 6], sizes = [9, 1], strides = [1, 1]} : vector<9x9xf32> to vector<9x1xf32>
    %382 = vector.extract_strided_slice %343 {offsets = [6, 0], sizes = [1, 128], strides = [1, 1]} : vector<9x128xf32> to vector<1x128xf32>
    %383 = vector.broadcast %381 : vector<9x1xf32> to vector<9x128xf32>
    %384 = vector.broadcast %382 : vector<1x128xf32> to vector<9x128xf32>
    %385 = arith.mulf %383, %384 : vector<9x128xf32>
    %386 = arith.addf %380, %385 : vector<9x128xf32>
    %387 = vector.extract_strided_slice %4 {offsets = [0, 7], sizes = [9, 1], strides = [1, 1]} : vector<9x9xf32> to vector<9x1xf32>
    %388 = vector.extract_strided_slice %343 {offsets = [7, 0], sizes = [1, 128], strides = [1, 1]} : vector<9x128xf32> to vector<1x128xf32>
    %389 = vector.broadcast %387 : vector<9x1xf32> to vector<9x128xf32>
    %390 = vector.broadcast %388 : vector<1x128xf32> to vector<9x128xf32>
    %391 = arith.mulf %389, %390 : vector<9x128xf32>
    %392 = arith.addf %386, %391 : vector<9x128xf32>
    %393 = vector.extract_strided_slice %4 {offsets = [0, 8], sizes = [9, 1], strides = [1, 1]} : vector<9x9xf32> to vector<9x1xf32>
    %394 = vector.extract_strided_slice %343 {offsets = [8, 0], sizes = [1, 128], strides = [1, 1]} : vector<9x128xf32> to vector<1x128xf32>
    %395 = vector.broadcast %393 : vector<9x1xf32> to vector<9x128xf32>
    %396 = vector.broadcast %394 : vector<1x128xf32> to vector<9x128xf32>
    %397 = arith.mulf %395, %396 : vector<9x128xf32>
    %398 = arith.addf %392, %397 : vector<9x128xf32>
    %399 = math.tanh %398 : vector<9x128xf32>
    %400 = arith.addf %322, %399 : vector<9x128xf32>
    %401 = vector.extract_strided_slice %0 {offsets = [15, 0], sizes = [3, 128], strides = [1, 1]} : vector<27x128xf32> to vector<3x128xf32>
    %402 = vector.extract_strided_slice %2 {offsets = [0, 0], sizes = [9, 1], strides = [1, 1]} : vector<9x3xf32> to vector<9x1xf32>
    %403 = vector.extract_strided_slice %401 {offsets = [0, 0], sizes = [1, 128], strides = [1, 1]} : vector<3x128xf32> to vector<1x128xf32>
    %404 = vector.broadcast %402 : vector<9x1xf32> to vector<9x128xf32>
    %405 = vector.broadcast %403 : vector<1x128xf32> to vector<9x128xf32>
    %406 = arith.mulf %404, %405 : vector<9x128xf32>
    %407 = vector.broadcast %3 : vector<9x1xf32> to vector<9x128xf32>
    %408 = arith.addf %406, %407 : vector<9x128xf32>
    %409 = vector.extract_strided_slice %2 {offsets = [0, 1], sizes = [9, 1], strides = [1, 1]} : vector<9x3xf32> to vector<9x1xf32>
    %410 = vector.extract_strided_slice %401 {offsets = [1, 0], sizes = [1, 128], strides = [1, 1]} : vector<3x128xf32> to vector<1x128xf32>
    %411 = vector.broadcast %409 : vector<9x1xf32> to vector<9x128xf32>
    %412 = vector.broadcast %410 : vector<1x128xf32> to vector<9x128xf32>
    %413 = arith.mulf %411, %412 : vector<9x128xf32>
    %414 = arith.addf %408, %413 : vector<9x128xf32>
    %415 = vector.extract_strided_slice %2 {offsets = [0, 2], sizes = [9, 1], strides = [1, 1]} : vector<9x3xf32> to vector<9x1xf32>
    %416 = vector.extract_strided_slice %401 {offsets = [2, 0], sizes = [1, 128], strides = [1, 1]} : vector<3x128xf32> to vector<1x128xf32>
    %417 = vector.broadcast %415 : vector<9x1xf32> to vector<9x128xf32>
    %418 = vector.broadcast %416 : vector<1x128xf32> to vector<9x128xf32>
    %419 = arith.mulf %417, %418 : vector<9x128xf32>
    %420 = arith.addf %414, %419 : vector<9x128xf32>
    %421 = math.tanh %420 : vector<9x128xf32>
    %422 = vector.extract_strided_slice %4 {offsets = [0, 0], sizes = [9, 1], strides = [1, 1]} : vector<9x9xf32> to vector<9x1xf32>
    %423 = vector.extract_strided_slice %421 {offsets = [0, 0], sizes = [1, 128], strides = [1, 1]} : vector<9x128xf32> to vector<1x128xf32>
    %424 = vector.broadcast %422 : vector<9x1xf32> to vector<9x128xf32>
    %425 = vector.broadcast %423 : vector<1x128xf32> to vector<9x128xf32>
    %426 = arith.mulf %424, %425 : vector<9x128xf32>
    %427 = vector.broadcast %5 : vector<9x1xf32> to vector<9x128xf32>
    %428 = arith.addf %426, %427 : vector<9x128xf32>
    %429 = vector.extract_strided_slice %4 {offsets = [0, 1], sizes = [9, 1], strides = [1, 1]} : vector<9x9xf32> to vector<9x1xf32>
    %430 = vector.extract_strided_slice %421 {offsets = [1, 0], sizes = [1, 128], strides = [1, 1]} : vector<9x128xf32> to vector<1x128xf32>
    %431 = vector.broadcast %429 : vector<9x1xf32> to vector<9x128xf32>
    %432 = vector.broadcast %430 : vector<1x128xf32> to vector<9x128xf32>
    %433 = arith.mulf %431, %432 : vector<9x128xf32>
    %434 = arith.addf %428, %433 : vector<9x128xf32>
    %435 = vector.extract_strided_slice %4 {offsets = [0, 2], sizes = [9, 1], strides = [1, 1]} : vector<9x9xf32> to vector<9x1xf32>
    %436 = vector.extract_strided_slice %421 {offsets = [2, 0], sizes = [1, 128], strides = [1, 1]} : vector<9x128xf32> to vector<1x128xf32>
    %437 = vector.broadcast %435 : vector<9x1xf32> to vector<9x128xf32>
    %438 = vector.broadcast %436 : vector<1x128xf32> to vector<9x128xf32>
    %439 = arith.mulf %437, %438 : vector<9x128xf32>
    %440 = arith.addf %434, %439 : vector<9x128xf32>
    %441 = vector.extract_strided_slice %4 {offsets = [0, 3], sizes = [9, 1], strides = [1, 1]} : vector<9x9xf32> to vector<9x1xf32>
    %442 = vector.extract_strided_slice %421 {offsets = [3, 0], sizes = [1, 128], strides = [1, 1]} : vector<9x128xf32> to vector<1x128xf32>
    %443 = vector.broadcast %441 : vector<9x1xf32> to vector<9x128xf32>
    %444 = vector.broadcast %442 : vector<1x128xf32> to vector<9x128xf32>
    %445 = arith.mulf %443, %444 : vector<9x128xf32>
    %446 = arith.addf %440, %445 : vector<9x128xf32>
    %447 = vector.extract_strided_slice %4 {offsets = [0, 4], sizes = [9, 1], strides = [1, 1]} : vector<9x9xf32> to vector<9x1xf32>
    %448 = vector.extract_strided_slice %421 {offsets = [4, 0], sizes = [1, 128], strides = [1, 1]} : vector<9x128xf32> to vector<1x128xf32>
    %449 = vector.broadcast %447 : vector<9x1xf32> to vector<9x128xf32>
    %450 = vector.broadcast %448 : vector<1x128xf32> to vector<9x128xf32>
    %451 = arith.mulf %449, %450 : vector<9x128xf32>
    %452 = arith.addf %446, %451 : vector<9x128xf32>
    %453 = vector.extract_strided_slice %4 {offsets = [0, 5], sizes = [9, 1], strides = [1, 1]} : vector<9x9xf32> to vector<9x1xf32>
    %454 = vector.extract_strided_slice %421 {offsets = [5, 0], sizes = [1, 128], strides = [1, 1]} : vector<9x128xf32> to vector<1x128xf32>
    %455 = vector.broadcast %453 : vector<9x1xf32> to vector<9x128xf32>
    %456 = vector.broadcast %454 : vector<1x128xf32> to vector<9x128xf32>
    %457 = arith.mulf %455, %456 : vector<9x128xf32>
    %458 = arith.addf %452, %457 : vector<9x128xf32>
    %459 = vector.extract_strided_slice %4 {offsets = [0, 6], sizes = [9, 1], strides = [1, 1]} : vector<9x9xf32> to vector<9x1xf32>
    %460 = vector.extract_strided_slice %421 {offsets = [6, 0], sizes = [1, 128], strides = [1, 1]} : vector<9x128xf32> to vector<1x128xf32>
    %461 = vector.broadcast %459 : vector<9x1xf32> to vector<9x128xf32>
    %462 = vector.broadcast %460 : vector<1x128xf32> to vector<9x128xf32>
    %463 = arith.mulf %461, %462 : vector<9x128xf32>
    %464 = arith.addf %458, %463 : vector<9x128xf32>
    %465 = vector.extract_strided_slice %4 {offsets = [0, 7], sizes = [9, 1], strides = [1, 1]} : vector<9x9xf32> to vector<9x1xf32>
    %466 = vector.extract_strided_slice %421 {offsets = [7, 0], sizes = [1, 128], strides = [1, 1]} : vector<9x128xf32> to vector<1x128xf32>
    %467 = vector.broadcast %465 : vector<9x1xf32> to vector<9x128xf32>
    %468 = vector.broadcast %466 : vector<1x128xf32> to vector<9x128xf32>
    %469 = arith.mulf %467, %468 : vector<9x128xf32>
    %470 = arith.addf %464, %469 : vector<9x128xf32>
    %471 = vector.extract_strided_slice %4 {offsets = [0, 8], sizes = [9, 1], strides = [1, 1]} : vector<9x9xf32> to vector<9x1xf32>
    %472 = vector.extract_strided_slice %421 {offsets = [8, 0], sizes = [1, 128], strides = [1, 1]} : vector<9x128xf32> to vector<1x128xf32>
    %473 = vector.broadcast %471 : vector<9x1xf32> to vector<9x128xf32>
    %474 = vector.broadcast %472 : vector<1x128xf32> to vector<9x128xf32>
    %475 = arith.mulf %473, %474 : vector<9x128xf32>
    %476 = arith.addf %470, %475 : vector<9x128xf32>
    %477 = math.tanh %476 : vector<9x128xf32>
    %478 = arith.addf %400, %477 : vector<9x128xf32>
    %479 = vector.extract_strided_slice %0 {offsets = [18, 0], sizes = [3, 128], strides = [1, 1]} : vector<27x128xf32> to vector<3x128xf32>
    %480 = vector.extract_strided_slice %2 {offsets = [0, 0], sizes = [9, 1], strides = [1, 1]} : vector<9x3xf32> to vector<9x1xf32>
    %481 = vector.extract_strided_slice %479 {offsets = [0, 0], sizes = [1, 128], strides = [1, 1]} : vector<3x128xf32> to vector<1x128xf32>
    %482 = vector.broadcast %480 : vector<9x1xf32> to vector<9x128xf32>
    %483 = vector.broadcast %481 : vector<1x128xf32> to vector<9x128xf32>
    %484 = arith.mulf %482, %483 : vector<9x128xf32>
    %485 = vector.broadcast %3 : vector<9x1xf32> to vector<9x128xf32>
    %486 = arith.addf %484, %485 : vector<9x128xf32>
    %487 = vector.extract_strided_slice %2 {offsets = [0, 1], sizes = [9, 1], strides = [1, 1]} : vector<9x3xf32> to vector<9x1xf32>
    %488 = vector.extract_strided_slice %479 {offsets = [1, 0], sizes = [1, 128], strides = [1, 1]} : vector<3x128xf32> to vector<1x128xf32>
    %489 = vector.broadcast %487 : vector<9x1xf32> to vector<9x128xf32>
    %490 = vector.broadcast %488 : vector<1x128xf32> to vector<9x128xf32>
    %491 = arith.mulf %489, %490 : vector<9x128xf32>
    %492 = arith.addf %486, %491 : vector<9x128xf32>
    %493 = vector.extract_strided_slice %2 {offsets = [0, 2], sizes = [9, 1], strides = [1, 1]} : vector<9x3xf32> to vector<9x1xf32>
    %494 = vector.extract_strided_slice %479 {offsets = [2, 0], sizes = [1, 128], strides = [1, 1]} : vector<3x128xf32> to vector<1x128xf32>
    %495 = vector.broadcast %493 : vector<9x1xf32> to vector<9x128xf32>
    %496 = vector.broadcast %494 : vector<1x128xf32> to vector<9x128xf32>
    %497 = arith.mulf %495, %496 : vector<9x128xf32>
    %498 = arith.addf %492, %497 : vector<9x128xf32>
    %499 = math.tanh %498 : vector<9x128xf32>
    %500 = vector.extract_strided_slice %4 {offsets = [0, 0], sizes = [9, 1], strides = [1, 1]} : vector<9x9xf32> to vector<9x1xf32>
    %501 = vector.extract_strided_slice %499 {offsets = [0, 0], sizes = [1, 128], strides = [1, 1]} : vector<9x128xf32> to vector<1x128xf32>
    %502 = vector.broadcast %500 : vector<9x1xf32> to vector<9x128xf32>
    %503 = vector.broadcast %501 : vector<1x128xf32> to vector<9x128xf32>
    %504 = arith.mulf %502, %503 : vector<9x128xf32>
    %505 = vector.broadcast %5 : vector<9x1xf32> to vector<9x128xf32>
    %506 = arith.addf %504, %505 : vector<9x128xf32>
    %507 = vector.extract_strided_slice %4 {offsets = [0, 1], sizes = [9, 1], strides = [1, 1]} : vector<9x9xf32> to vector<9x1xf32>
    %508 = vector.extract_strided_slice %499 {offsets = [1, 0], sizes = [1, 128], strides = [1, 1]} : vector<9x128xf32> to vector<1x128xf32>
    %509 = vector.broadcast %507 : vector<9x1xf32> to vector<9x128xf32>
    %510 = vector.broadcast %508 : vector<1x128xf32> to vector<9x128xf32>
    %511 = arith.mulf %509, %510 : vector<9x128xf32>
    %512 = arith.addf %506, %511 : vector<9x128xf32>
    %513 = vector.extract_strided_slice %4 {offsets = [0, 2], sizes = [9, 1], strides = [1, 1]} : vector<9x9xf32> to vector<9x1xf32>
    %514 = vector.extract_strided_slice %499 {offsets = [2, 0], sizes = [1, 128], strides = [1, 1]} : vector<9x128xf32> to vector<1x128xf32>
    %515 = vector.broadcast %513 : vector<9x1xf32> to vector<9x128xf32>
    %516 = vector.broadcast %514 : vector<1x128xf32> to vector<9x128xf32>
    %517 = arith.mulf %515, %516 : vector<9x128xf32>
    %518 = arith.addf %512, %517 : vector<9x128xf32>
    %519 = vector.extract_strided_slice %4 {offsets = [0, 3], sizes = [9, 1], strides = [1, 1]} : vector<9x9xf32> to vector<9x1xf32>
    %520 = vector.extract_strided_slice %499 {offsets = [3, 0], sizes = [1, 128], strides = [1, 1]} : vector<9x128xf32> to vector<1x128xf32>
    %521 = vector.broadcast %519 : vector<9x1xf32> to vector<9x128xf32>
    %522 = vector.broadcast %520 : vector<1x128xf32> to vector<9x128xf32>
    %523 = arith.mulf %521, %522 : vector<9x128xf32>
    %524 = arith.addf %518, %523 : vector<9x128xf32>
    %525 = vector.extract_strided_slice %4 {offsets = [0, 4], sizes = [9, 1], strides = [1, 1]} : vector<9x9xf32> to vector<9x1xf32>
    %526 = vector.extract_strided_slice %499 {offsets = [4, 0], sizes = [1, 128], strides = [1, 1]} : vector<9x128xf32> to vector<1x128xf32>
    %527 = vector.broadcast %525 : vector<9x1xf32> to vector<9x128xf32>
    %528 = vector.broadcast %526 : vector<1x128xf32> to vector<9x128xf32>
    %529 = arith.mulf %527, %528 : vector<9x128xf32>
    %530 = arith.addf %524, %529 : vector<9x128xf32>
    %531 = vector.extract_strided_slice %4 {offsets = [0, 5], sizes = [9, 1], strides = [1, 1]} : vector<9x9xf32> to vector<9x1xf32>
    %532 = vector.extract_strided_slice %499 {offsets = [5, 0], sizes = [1, 128], strides = [1, 1]} : vector<9x128xf32> to vector<1x128xf32>
    %533 = vector.broadcast %531 : vector<9x1xf32> to vector<9x128xf32>
    %534 = vector.broadcast %532 : vector<1x128xf32> to vector<9x128xf32>
    %535 = arith.mulf %533, %534 : vector<9x128xf32>
    %536 = arith.addf %530, %535 : vector<9x128xf32>
    %537 = vector.extract_strided_slice %4 {offsets = [0, 6], sizes = [9, 1], strides = [1, 1]} : vector<9x9xf32> to vector<9x1xf32>
    %538 = vector.extract_strided_slice %499 {offsets = [6, 0], sizes = [1, 128], strides = [1, 1]} : vector<9x128xf32> to vector<1x128xf32>
    %539 = vector.broadcast %537 : vector<9x1xf32> to vector<9x128xf32>
    %540 = vector.broadcast %538 : vector<1x128xf32> to vector<9x128xf32>
    %541 = arith.mulf %539, %540 : vector<9x128xf32>
    %542 = arith.addf %536, %541 : vector<9x128xf32>
    %543 = vector.extract_strided_slice %4 {offsets = [0, 7], sizes = [9, 1], strides = [1, 1]} : vector<9x9xf32> to vector<9x1xf32>
    %544 = vector.extract_strided_slice %499 {offsets = [7, 0], sizes = [1, 128], strides = [1, 1]} : vector<9x128xf32> to vector<1x128xf32>
    %545 = vector.broadcast %543 : vector<9x1xf32> to vector<9x128xf32>
    %546 = vector.broadcast %544 : vector<1x128xf32> to vector<9x128xf32>
    %547 = arith.mulf %545, %546 : vector<9x128xf32>
    %548 = arith.addf %542, %547 : vector<9x128xf32>
    %549 = vector.extract_strided_slice %4 {offsets = [0, 8], sizes = [9, 1], strides = [1, 1]} : vector<9x9xf32> to vector<9x1xf32>
    %550 = vector.extract_strided_slice %499 {offsets = [8, 0], sizes = [1, 128], strides = [1, 1]} : vector<9x128xf32> to vector<1x128xf32>
    %551 = vector.broadcast %549 : vector<9x1xf32> to vector<9x128xf32>
    %552 = vector.broadcast %550 : vector<1x128xf32> to vector<9x128xf32>
    %553 = arith.mulf %551, %552 : vector<9x128xf32>
    %554 = arith.addf %548, %553 : vector<9x128xf32>
    %555 = math.tanh %554 : vector<9x128xf32>
    %556 = arith.addf %478, %555 : vector<9x128xf32>
    %557 = vector.extract_strided_slice %0 {offsets = [21, 0], sizes = [3, 128], strides = [1, 1]} : vector<27x128xf32> to vector<3x128xf32>
    %558 = vector.extract_strided_slice %2 {offsets = [0, 0], sizes = [9, 1], strides = [1, 1]} : vector<9x3xf32> to vector<9x1xf32>
    %559 = vector.extract_strided_slice %557 {offsets = [0, 0], sizes = [1, 128], strides = [1, 1]} : vector<3x128xf32> to vector<1x128xf32>
    %560 = vector.broadcast %558 : vector<9x1xf32> to vector<9x128xf32>
    %561 = vector.broadcast %559 : vector<1x128xf32> to vector<9x128xf32>
    %562 = arith.mulf %560, %561 : vector<9x128xf32>
    %563 = vector.broadcast %3 : vector<9x1xf32> to vector<9x128xf32>
    %564 = arith.addf %562, %563 : vector<9x128xf32>
    %565 = vector.extract_strided_slice %2 {offsets = [0, 1], sizes = [9, 1], strides = [1, 1]} : vector<9x3xf32> to vector<9x1xf32>
    %566 = vector.extract_strided_slice %557 {offsets = [1, 0], sizes = [1, 128], strides = [1, 1]} : vector<3x128xf32> to vector<1x128xf32>
    %567 = vector.broadcast %565 : vector<9x1xf32> to vector<9x128xf32>
    %568 = vector.broadcast %566 : vector<1x128xf32> to vector<9x128xf32>
    %569 = arith.mulf %567, %568 : vector<9x128xf32>
    %570 = arith.addf %564, %569 : vector<9x128xf32>
    %571 = vector.extract_strided_slice %2 {offsets = [0, 2], sizes = [9, 1], strides = [1, 1]} : vector<9x3xf32> to vector<9x1xf32>
    %572 = vector.extract_strided_slice %557 {offsets = [2, 0], sizes = [1, 128], strides = [1, 1]} : vector<3x128xf32> to vector<1x128xf32>
    %573 = vector.broadcast %571 : vector<9x1xf32> to vector<9x128xf32>
    %574 = vector.broadcast %572 : vector<1x128xf32> to vector<9x128xf32>
    %575 = arith.mulf %573, %574 : vector<9x128xf32>
    %576 = arith.addf %570, %575 : vector<9x128xf32>
    %577 = math.tanh %576 : vector<9x128xf32>
    %578 = vector.extract_strided_slice %4 {offsets = [0, 0], sizes = [9, 1], strides = [1, 1]} : vector<9x9xf32> to vector<9x1xf32>
    %579 = vector.extract_strided_slice %577 {offsets = [0, 0], sizes = [1, 128], strides = [1, 1]} : vector<9x128xf32> to vector<1x128xf32>
    %580 = vector.broadcast %578 : vector<9x1xf32> to vector<9x128xf32>
    %581 = vector.broadcast %579 : vector<1x128xf32> to vector<9x128xf32>
    %582 = arith.mulf %580, %581 : vector<9x128xf32>
    %583 = vector.broadcast %5 : vector<9x1xf32> to vector<9x128xf32>
    %584 = arith.addf %582, %583 : vector<9x128xf32>
    %585 = vector.extract_strided_slice %4 {offsets = [0, 1], sizes = [9, 1], strides = [1, 1]} : vector<9x9xf32> to vector<9x1xf32>
    %586 = vector.extract_strided_slice %577 {offsets = [1, 0], sizes = [1, 128], strides = [1, 1]} : vector<9x128xf32> to vector<1x128xf32>
    %587 = vector.broadcast %585 : vector<9x1xf32> to vector<9x128xf32>
    %588 = vector.broadcast %586 : vector<1x128xf32> to vector<9x128xf32>
    %589 = arith.mulf %587, %588 : vector<9x128xf32>
    %590 = arith.addf %584, %589 : vector<9x128xf32>
    %591 = vector.extract_strided_slice %4 {offsets = [0, 2], sizes = [9, 1], strides = [1, 1]} : vector<9x9xf32> to vector<9x1xf32>
    %592 = vector.extract_strided_slice %577 {offsets = [2, 0], sizes = [1, 128], strides = [1, 1]} : vector<9x128xf32> to vector<1x128xf32>
    %593 = vector.broadcast %591 : vector<9x1xf32> to vector<9x128xf32>
    %594 = vector.broadcast %592 : vector<1x128xf32> to vector<9x128xf32>
    %595 = arith.mulf %593, %594 : vector<9x128xf32>
    %596 = arith.addf %590, %595 : vector<9x128xf32>
    %597 = vector.extract_strided_slice %4 {offsets = [0, 3], sizes = [9, 1], strides = [1, 1]} : vector<9x9xf32> to vector<9x1xf32>
    %598 = vector.extract_strided_slice %577 {offsets = [3, 0], sizes = [1, 128], strides = [1, 1]} : vector<9x128xf32> to vector<1x128xf32>
    %599 = vector.broadcast %597 : vector<9x1xf32> to vector<9x128xf32>
    %600 = vector.broadcast %598 : vector<1x128xf32> to vector<9x128xf32>
    %601 = arith.mulf %599, %600 : vector<9x128xf32>
    %602 = arith.addf %596, %601 : vector<9x128xf32>
    %603 = vector.extract_strided_slice %4 {offsets = [0, 4], sizes = [9, 1], strides = [1, 1]} : vector<9x9xf32> to vector<9x1xf32>
    %604 = vector.extract_strided_slice %577 {offsets = [4, 0], sizes = [1, 128], strides = [1, 1]} : vector<9x128xf32> to vector<1x128xf32>
    %605 = vector.broadcast %603 : vector<9x1xf32> to vector<9x128xf32>
    %606 = vector.broadcast %604 : vector<1x128xf32> to vector<9x128xf32>
    %607 = arith.mulf %605, %606 : vector<9x128xf32>
    %608 = arith.addf %602, %607 : vector<9x128xf32>
    %609 = vector.extract_strided_slice %4 {offsets = [0, 5], sizes = [9, 1], strides = [1, 1]} : vector<9x9xf32> to vector<9x1xf32>
    %610 = vector.extract_strided_slice %577 {offsets = [5, 0], sizes = [1, 128], strides = [1, 1]} : vector<9x128xf32> to vector<1x128xf32>
    %611 = vector.broadcast %609 : vector<9x1xf32> to vector<9x128xf32>
    %612 = vector.broadcast %610 : vector<1x128xf32> to vector<9x128xf32>
    %613 = arith.mulf %611, %612 : vector<9x128xf32>
    %614 = arith.addf %608, %613 : vector<9x128xf32>
    %615 = vector.extract_strided_slice %4 {offsets = [0, 6], sizes = [9, 1], strides = [1, 1]} : vector<9x9xf32> to vector<9x1xf32>
    %616 = vector.extract_strided_slice %577 {offsets = [6, 0], sizes = [1, 128], strides = [1, 1]} : vector<9x128xf32> to vector<1x128xf32>
    %617 = vector.broadcast %615 : vector<9x1xf32> to vector<9x128xf32>
    %618 = vector.broadcast %616 : vector<1x128xf32> to vector<9x128xf32>
    %619 = arith.mulf %617, %618 : vector<9x128xf32>
    %620 = arith.addf %614, %619 : vector<9x128xf32>
    %621 = vector.extract_strided_slice %4 {offsets = [0, 7], sizes = [9, 1], strides = [1, 1]} : vector<9x9xf32> to vector<9x1xf32>
    %622 = vector.extract_strided_slice %577 {offsets = [7, 0], sizes = [1, 128], strides = [1, 1]} : vector<9x128xf32> to vector<1x128xf32>
    %623 = vector.broadcast %621 : vector<9x1xf32> to vector<9x128xf32>
    %624 = vector.broadcast %622 : vector<1x128xf32> to vector<9x128xf32>
    %625 = arith.mulf %623, %624 : vector<9x128xf32>
    %626 = arith.addf %620, %625 : vector<9x128xf32>
    %627 = vector.extract_strided_slice %4 {offsets = [0, 8], sizes = [9, 1], strides = [1, 1]} : vector<9x9xf32> to vector<9x1xf32>
    %628 = vector.extract_strided_slice %577 {offsets = [8, 0], sizes = [1, 128], strides = [1, 1]} : vector<9x128xf32> to vector<1x128xf32>
    %629 = vector.broadcast %627 : vector<9x1xf32> to vector<9x128xf32>
    %630 = vector.broadcast %628 : vector<1x128xf32> to vector<9x128xf32>
    %631 = arith.mulf %629, %630 : vector<9x128xf32>
    %632 = arith.addf %626, %631 : vector<9x128xf32>
    %633 = math.tanh %632 : vector<9x128xf32>
    %634 = arith.addf %556, %633 : vector<9x128xf32>
    %635 = vector.extract_strided_slice %0 {offsets = [24, 0], sizes = [3, 128], strides = [1, 1]} : vector<27x128xf32> to vector<3x128xf32>
    %636 = vector.extract_strided_slice %2 {offsets = [0, 0], sizes = [9, 1], strides = [1, 1]} : vector<9x3xf32> to vector<9x1xf32>
    %637 = vector.extract_strided_slice %635 {offsets = [0, 0], sizes = [1, 128], strides = [1, 1]} : vector<3x128xf32> to vector<1x128xf32>
    %638 = vector.broadcast %636 : vector<9x1xf32> to vector<9x128xf32>
    %639 = vector.broadcast %637 : vector<1x128xf32> to vector<9x128xf32>
    %640 = arith.mulf %638, %639 : vector<9x128xf32>
    %641 = vector.broadcast %3 : vector<9x1xf32> to vector<9x128xf32>
    %642 = arith.addf %640, %641 : vector<9x128xf32>
    %643 = vector.extract_strided_slice %2 {offsets = [0, 1], sizes = [9, 1], strides = [1, 1]} : vector<9x3xf32> to vector<9x1xf32>
    %644 = vector.extract_strided_slice %635 {offsets = [1, 0], sizes = [1, 128], strides = [1, 1]} : vector<3x128xf32> to vector<1x128xf32>
    %645 = vector.broadcast %643 : vector<9x1xf32> to vector<9x128xf32>
    %646 = vector.broadcast %644 : vector<1x128xf32> to vector<9x128xf32>
    %647 = arith.mulf %645, %646 : vector<9x128xf32>
    %648 = arith.addf %642, %647 : vector<9x128xf32>
    %649 = vector.extract_strided_slice %2 {offsets = [0, 2], sizes = [9, 1], strides = [1, 1]} : vector<9x3xf32> to vector<9x1xf32>
    %650 = vector.extract_strided_slice %635 {offsets = [2, 0], sizes = [1, 128], strides = [1, 1]} : vector<3x128xf32> to vector<1x128xf32>
    %651 = vector.broadcast %649 : vector<9x1xf32> to vector<9x128xf32>
    %652 = vector.broadcast %650 : vector<1x128xf32> to vector<9x128xf32>
    %653 = arith.mulf %651, %652 : vector<9x128xf32>
    %654 = arith.addf %648, %653 : vector<9x128xf32>
    %655 = math.tanh %654 : vector<9x128xf32>
    %656 = vector.extract_strided_slice %4 {offsets = [0, 0], sizes = [9, 1], strides = [1, 1]} : vector<9x9xf32> to vector<9x1xf32>
    %657 = vector.extract_strided_slice %655 {offsets = [0, 0], sizes = [1, 128], strides = [1, 1]} : vector<9x128xf32> to vector<1x128xf32>
    %658 = vector.broadcast %656 : vector<9x1xf32> to vector<9x128xf32>
    %659 = vector.broadcast %657 : vector<1x128xf32> to vector<9x128xf32>
    %660 = arith.mulf %658, %659 : vector<9x128xf32>
    %661 = vector.broadcast %5 : vector<9x1xf32> to vector<9x128xf32>
    %662 = arith.addf %660, %661 : vector<9x128xf32>
    %663 = vector.extract_strided_slice %4 {offsets = [0, 1], sizes = [9, 1], strides = [1, 1]} : vector<9x9xf32> to vector<9x1xf32>
    %664 = vector.extract_strided_slice %655 {offsets = [1, 0], sizes = [1, 128], strides = [1, 1]} : vector<9x128xf32> to vector<1x128xf32>
    %665 = vector.broadcast %663 : vector<9x1xf32> to vector<9x128xf32>
    %666 = vector.broadcast %664 : vector<1x128xf32> to vector<9x128xf32>
    %667 = arith.mulf %665, %666 : vector<9x128xf32>
    %668 = arith.addf %662, %667 : vector<9x128xf32>
    %669 = vector.extract_strided_slice %4 {offsets = [0, 2], sizes = [9, 1], strides = [1, 1]} : vector<9x9xf32> to vector<9x1xf32>
    %670 = vector.extract_strided_slice %655 {offsets = [2, 0], sizes = [1, 128], strides = [1, 1]} : vector<9x128xf32> to vector<1x128xf32>
    %671 = vector.broadcast %669 : vector<9x1xf32> to vector<9x128xf32>
    %672 = vector.broadcast %670 : vector<1x128xf32> to vector<9x128xf32>
    %673 = arith.mulf %671, %672 : vector<9x128xf32>
    %674 = arith.addf %668, %673 : vector<9x128xf32>
    %675 = vector.extract_strided_slice %4 {offsets = [0, 3], sizes = [9, 1], strides = [1, 1]} : vector<9x9xf32> to vector<9x1xf32>
    %676 = vector.extract_strided_slice %655 {offsets = [3, 0], sizes = [1, 128], strides = [1, 1]} : vector<9x128xf32> to vector<1x128xf32>
    %677 = vector.broadcast %675 : vector<9x1xf32> to vector<9x128xf32>
    %678 = vector.broadcast %676 : vector<1x128xf32> to vector<9x128xf32>
    %679 = arith.mulf %677, %678 : vector<9x128xf32>
    %680 = arith.addf %674, %679 : vector<9x128xf32>
    %681 = vector.extract_strided_slice %4 {offsets = [0, 4], sizes = [9, 1], strides = [1, 1]} : vector<9x9xf32> to vector<9x1xf32>
    %682 = vector.extract_strided_slice %655 {offsets = [4, 0], sizes = [1, 128], strides = [1, 1]} : vector<9x128xf32> to vector<1x128xf32>
    %683 = vector.broadcast %681 : vector<9x1xf32> to vector<9x128xf32>
    %684 = vector.broadcast %682 : vector<1x128xf32> to vector<9x128xf32>
    %685 = arith.mulf %683, %684 : vector<9x128xf32>
    %686 = arith.addf %680, %685 : vector<9x128xf32>
    %687 = vector.extract_strided_slice %4 {offsets = [0, 5], sizes = [9, 1], strides = [1, 1]} : vector<9x9xf32> to vector<9x1xf32>
    %688 = vector.extract_strided_slice %655 {offsets = [5, 0], sizes = [1, 128], strides = [1, 1]} : vector<9x128xf32> to vector<1x128xf32>
    %689 = vector.broadcast %687 : vector<9x1xf32> to vector<9x128xf32>
    %690 = vector.broadcast %688 : vector<1x128xf32> to vector<9x128xf32>
    %691 = arith.mulf %689, %690 : vector<9x128xf32>
    %692 = arith.addf %686, %691 : vector<9x128xf32>
    %693 = vector.extract_strided_slice %4 {offsets = [0, 6], sizes = [9, 1], strides = [1, 1]} : vector<9x9xf32> to vector<9x1xf32>
    %694 = vector.extract_strided_slice %655 {offsets = [6, 0], sizes = [1, 128], strides = [1, 1]} : vector<9x128xf32> to vector<1x128xf32>
    %695 = vector.broadcast %693 : vector<9x1xf32> to vector<9x128xf32>
    %696 = vector.broadcast %694 : vector<1x128xf32> to vector<9x128xf32>
    %697 = arith.mulf %695, %696 : vector<9x128xf32>
    %698 = arith.addf %692, %697 : vector<9x128xf32>
    %699 = vector.extract_strided_slice %4 {offsets = [0, 7], sizes = [9, 1], strides = [1, 1]} : vector<9x9xf32> to vector<9x1xf32>
    %700 = vector.extract_strided_slice %655 {offsets = [7, 0], sizes = [1, 128], strides = [1, 1]} : vector<9x128xf32> to vector<1x128xf32>
    %701 = vector.broadcast %699 : vector<9x1xf32> to vector<9x128xf32>
    %702 = vector.broadcast %700 : vector<1x128xf32> to vector<9x128xf32>
    %703 = arith.mulf %701, %702 : vector<9x128xf32>
    %704 = arith.addf %698, %703 : vector<9x128xf32>
    %705 = vector.extract_strided_slice %4 {offsets = [0, 8], sizes = [9, 1], strides = [1, 1]} : vector<9x9xf32> to vector<9x1xf32>
    %706 = vector.extract_strided_slice %655 {offsets = [8, 0], sizes = [1, 128], strides = [1, 1]} : vector<9x128xf32> to vector<1x128xf32>
    %707 = vector.broadcast %705 : vector<9x1xf32> to vector<9x128xf32>
    %708 = vector.broadcast %706 : vector<1x128xf32> to vector<9x128xf32>
    %709 = arith.mulf %707, %708 : vector<9x128xf32>
    %710 = arith.addf %704, %709 : vector<9x128xf32>
    %711 = math.tanh %710 : vector<9x128xf32>
    %712 = arith.addf %634, %711 : vector<9x128xf32>
    %713 = vector.extract_strided_slice %6 {offsets = [0, 0], sizes = [9, 1], strides = [1, 1]} : vector<9x9xf32> to vector<9x1xf32>
    %714 = vector.extract_strided_slice %712 {offsets = [0, 0], sizes = [1, 128], strides = [1, 1]} : vector<9x128xf32> to vector<1x128xf32>
    %715 = vector.broadcast %713 : vector<9x1xf32> to vector<9x128xf32>
    %716 = vector.broadcast %714 : vector<1x128xf32> to vector<9x128xf32>
    %717 = arith.mulf %715, %716 : vector<9x128xf32>
    %718 = vector.broadcast %7 : vector<9x1xf32> to vector<9x128xf32>
    %719 = arith.addf %717, %718 : vector<9x128xf32>
    %720 = vector.extract_strided_slice %6 {offsets = [0, 1], sizes = [9, 1], strides = [1, 1]} : vector<9x9xf32> to vector<9x1xf32>
    %721 = vector.extract_strided_slice %712 {offsets = [1, 0], sizes = [1, 128], strides = [1, 1]} : vector<9x128xf32> to vector<1x128xf32>
    %722 = vector.broadcast %720 : vector<9x1xf32> to vector<9x128xf32>
    %723 = vector.broadcast %721 : vector<1x128xf32> to vector<9x128xf32>
    %724 = arith.mulf %722, %723 : vector<9x128xf32>
    %725 = arith.addf %719, %724 : vector<9x128xf32>
    %726 = vector.extract_strided_slice %6 {offsets = [0, 2], sizes = [9, 1], strides = [1, 1]} : vector<9x9xf32> to vector<9x1xf32>
    %727 = vector.extract_strided_slice %712 {offsets = [2, 0], sizes = [1, 128], strides = [1, 1]} : vector<9x128xf32> to vector<1x128xf32>
    %728 = vector.broadcast %726 : vector<9x1xf32> to vector<9x128xf32>
    %729 = vector.broadcast %727 : vector<1x128xf32> to vector<9x128xf32>
    %730 = arith.mulf %728, %729 : vector<9x128xf32>
    %731 = arith.addf %725, %730 : vector<9x128xf32>
    %732 = vector.extract_strided_slice %6 {offsets = [0, 3], sizes = [9, 1], strides = [1, 1]} : vector<9x9xf32> to vector<9x1xf32>
    %733 = vector.extract_strided_slice %712 {offsets = [3, 0], sizes = [1, 128], strides = [1, 1]} : vector<9x128xf32> to vector<1x128xf32>
    %734 = vector.broadcast %732 : vector<9x1xf32> to vector<9x128xf32>
    %735 = vector.broadcast %733 : vector<1x128xf32> to vector<9x128xf32>
    %736 = arith.mulf %734, %735 : vector<9x128xf32>
    %737 = arith.addf %731, %736 : vector<9x128xf32>
    %738 = vector.extract_strided_slice %6 {offsets = [0, 4], sizes = [9, 1], strides = [1, 1]} : vector<9x9xf32> to vector<9x1xf32>
    %739 = vector.extract_strided_slice %712 {offsets = [4, 0], sizes = [1, 128], strides = [1, 1]} : vector<9x128xf32> to vector<1x128xf32>
    %740 = vector.broadcast %738 : vector<9x1xf32> to vector<9x128xf32>
    %741 = vector.broadcast %739 : vector<1x128xf32> to vector<9x128xf32>
    %742 = arith.mulf %740, %741 : vector<9x128xf32>
    %743 = arith.addf %737, %742 : vector<9x128xf32>
    %744 = vector.extract_strided_slice %6 {offsets = [0, 5], sizes = [9, 1], strides = [1, 1]} : vector<9x9xf32> to vector<9x1xf32>
    %745 = vector.extract_strided_slice %712 {offsets = [5, 0], sizes = [1, 128], strides = [1, 1]} : vector<9x128xf32> to vector<1x128xf32>
    %746 = vector.broadcast %744 : vector<9x1xf32> to vector<9x128xf32>
    %747 = vector.broadcast %745 : vector<1x128xf32> to vector<9x128xf32>
    %748 = arith.mulf %746, %747 : vector<9x128xf32>
    %749 = arith.addf %743, %748 : vector<9x128xf32>
    %750 = vector.extract_strided_slice %6 {offsets = [0, 6], sizes = [9, 1], strides = [1, 1]} : vector<9x9xf32> to vector<9x1xf32>
    %751 = vector.extract_strided_slice %712 {offsets = [6, 0], sizes = [1, 128], strides = [1, 1]} : vector<9x128xf32> to vector<1x128xf32>
    %752 = vector.broadcast %750 : vector<9x1xf32> to vector<9x128xf32>
    %753 = vector.broadcast %751 : vector<1x128xf32> to vector<9x128xf32>
    %754 = arith.mulf %752, %753 : vector<9x128xf32>
    %755 = arith.addf %749, %754 : vector<9x128xf32>
    %756 = vector.extract_strided_slice %6 {offsets = [0, 7], sizes = [9, 1], strides = [1, 1]} : vector<9x9xf32> to vector<9x1xf32>
    %757 = vector.extract_strided_slice %712 {offsets = [7, 0], sizes = [1, 128], strides = [1, 1]} : vector<9x128xf32> to vector<1x128xf32>
    %758 = vector.broadcast %756 : vector<9x1xf32> to vector<9x128xf32>
    %759 = vector.broadcast %757 : vector<1x128xf32> to vector<9x128xf32>
    %760 = arith.mulf %758, %759 : vector<9x128xf32>
    %761 = arith.addf %755, %760 : vector<9x128xf32>
    %762 = vector.extract_strided_slice %6 {offsets = [0, 8], sizes = [9, 1], strides = [1, 1]} : vector<9x9xf32> to vector<9x1xf32>
    %763 = vector.extract_strided_slice %712 {offsets = [8, 0], sizes = [1, 128], strides = [1, 1]} : vector<9x128xf32> to vector<1x128xf32>
    %764 = vector.broadcast %762 : vector<9x1xf32> to vector<9x128xf32>
    %765 = vector.broadcast %763 : vector<1x128xf32> to vector<9x128xf32>
    %766 = arith.mulf %764, %765 : vector<9x128xf32>
    %767 = arith.addf %761, %766 : vector<9x128xf32>
    %768 = math.tanh %767 : vector<9x128xf32>
    %769 = vector.extract_strided_slice %8 {offsets = [0, 0], sizes = [9, 1], strides = [1, 1]} : vector<9x9xf32> to vector<9x1xf32>
    %770 = vector.extract_strided_slice %768 {offsets = [0, 0], sizes = [1, 128], strides = [1, 1]} : vector<9x128xf32> to vector<1x128xf32>
    %771 = vector.broadcast %769 : vector<9x1xf32> to vector<9x128xf32>
    %772 = vector.broadcast %770 : vector<1x128xf32> to vector<9x128xf32>
    %773 = arith.mulf %771, %772 : vector<9x128xf32>
    %774 = vector.broadcast %9 : vector<9x1xf32> to vector<9x128xf32>
    %775 = arith.addf %773, %774 : vector<9x128xf32>
    %776 = vector.extract_strided_slice %8 {offsets = [0, 1], sizes = [9, 1], strides = [1, 1]} : vector<9x9xf32> to vector<9x1xf32>
    %777 = vector.extract_strided_slice %768 {offsets = [1, 0], sizes = [1, 128], strides = [1, 1]} : vector<9x128xf32> to vector<1x128xf32>
    %778 = vector.broadcast %776 : vector<9x1xf32> to vector<9x128xf32>
    %779 = vector.broadcast %777 : vector<1x128xf32> to vector<9x128xf32>
    %780 = arith.mulf %778, %779 : vector<9x128xf32>
    %781 = arith.addf %775, %780 : vector<9x128xf32>
    %782 = vector.extract_strided_slice %8 {offsets = [0, 2], sizes = [9, 1], strides = [1, 1]} : vector<9x9xf32> to vector<9x1xf32>
    %783 = vector.extract_strided_slice %768 {offsets = [2, 0], sizes = [1, 128], strides = [1, 1]} : vector<9x128xf32> to vector<1x128xf32>
    %784 = vector.broadcast %782 : vector<9x1xf32> to vector<9x128xf32>
    %785 = vector.broadcast %783 : vector<1x128xf32> to vector<9x128xf32>
    %786 = arith.mulf %784, %785 : vector<9x128xf32>
    %787 = arith.addf %781, %786 : vector<9x128xf32>
    %788 = vector.extract_strided_slice %8 {offsets = [0, 3], sizes = [9, 1], strides = [1, 1]} : vector<9x9xf32> to vector<9x1xf32>
    %789 = vector.extract_strided_slice %768 {offsets = [3, 0], sizes = [1, 128], strides = [1, 1]} : vector<9x128xf32> to vector<1x128xf32>
    %790 = vector.broadcast %788 : vector<9x1xf32> to vector<9x128xf32>
    %791 = vector.broadcast %789 : vector<1x128xf32> to vector<9x128xf32>
    %792 = arith.mulf %790, %791 : vector<9x128xf32>
    %793 = arith.addf %787, %792 : vector<9x128xf32>
    %794 = vector.extract_strided_slice %8 {offsets = [0, 4], sizes = [9, 1], strides = [1, 1]} : vector<9x9xf32> to vector<9x1xf32>
    %795 = vector.extract_strided_slice %768 {offsets = [4, 0], sizes = [1, 128], strides = [1, 1]} : vector<9x128xf32> to vector<1x128xf32>
    %796 = vector.broadcast %794 : vector<9x1xf32> to vector<9x128xf32>
    %797 = vector.broadcast %795 : vector<1x128xf32> to vector<9x128xf32>
    %798 = arith.mulf %796, %797 : vector<9x128xf32>
    %799 = arith.addf %793, %798 : vector<9x128xf32>
    %800 = vector.extract_strided_slice %8 {offsets = [0, 5], sizes = [9, 1], strides = [1, 1]} : vector<9x9xf32> to vector<9x1xf32>
    %801 = vector.extract_strided_slice %768 {offsets = [5, 0], sizes = [1, 128], strides = [1, 1]} : vector<9x128xf32> to vector<1x128xf32>
    %802 = vector.broadcast %800 : vector<9x1xf32> to vector<9x128xf32>
    %803 = vector.broadcast %801 : vector<1x128xf32> to vector<9x128xf32>
    %804 = arith.mulf %802, %803 : vector<9x128xf32>
    %805 = arith.addf %799, %804 : vector<9x128xf32>
    %806 = vector.extract_strided_slice %8 {offsets = [0, 6], sizes = [9, 1], strides = [1, 1]} : vector<9x9xf32> to vector<9x1xf32>
    %807 = vector.extract_strided_slice %768 {offsets = [6, 0], sizes = [1, 128], strides = [1, 1]} : vector<9x128xf32> to vector<1x128xf32>
    %808 = vector.broadcast %806 : vector<9x1xf32> to vector<9x128xf32>
    %809 = vector.broadcast %807 : vector<1x128xf32> to vector<9x128xf32>
    %810 = arith.mulf %808, %809 : vector<9x128xf32>
    %811 = arith.addf %805, %810 : vector<9x128xf32>
    %812 = vector.extract_strided_slice %8 {offsets = [0, 7], sizes = [9, 1], strides = [1, 1]} : vector<9x9xf32> to vector<9x1xf32>
    %813 = vector.extract_strided_slice %768 {offsets = [7, 0], sizes = [1, 128], strides = [1, 1]} : vector<9x128xf32> to vector<1x128xf32>
    %814 = vector.broadcast %812 : vector<9x1xf32> to vector<9x128xf32>
    %815 = vector.broadcast %813 : vector<1x128xf32> to vector<9x128xf32>
    %816 = arith.mulf %814, %815 : vector<9x128xf32>
    %817 = arith.addf %811, %816 : vector<9x128xf32>
    %818 = vector.extract_strided_slice %8 {offsets = [0, 8], sizes = [9, 1], strides = [1, 1]} : vector<9x9xf32> to vector<9x1xf32>
    %819 = vector.extract_strided_slice %768 {offsets = [8, 0], sizes = [1, 128], strides = [1, 1]} : vector<9x128xf32> to vector<1x128xf32>
    %820 = vector.broadcast %818 : vector<9x1xf32> to vector<9x128xf32>
    %821 = vector.broadcast %819 : vector<1x128xf32> to vector<9x128xf32>
    %822 = arith.mulf %820, %821 : vector<9x128xf32>
    %823 = arith.addf %817, %822 : vector<9x128xf32>
    %cst_3 = arith.constant dense<0xFF800000> : vector<128xf32>
    %824 = vector.multi_reduction <maximumf>, %823, %cst_3 [0] : vector<9x128xf32> to vector<128xf32>
    %825 = vector.shape_cast %824 : vector<128xf32> to vector<1x128xf32>
    %826 = vector.broadcast %825 : vector<1x128xf32> to vector<9x128xf32>
    %827 = arith.subf %823, %826 : vector<9x128xf32>
    %828 = math.exp %827 : vector<9x128xf32>
    %cst_4 = arith.constant dense<0.000000e+00> : vector<128xf32>
    %829 = vector.multi_reduction <add>, %828, %cst_4 [0] : vector<9x128xf32> to vector<128xf32>
    %830 = vector.shape_cast %829 : vector<128xf32> to vector<1x128xf32>
    %831 = tpu.reciprocal %830 {approx = true} : vector<1x128xf32> -> vector<1x128xf32>
    %832 = arith.mulf %830, %831 : vector<1x128xf32>
    %cst_5 = arith.constant 2.000000e+00 : f32
    %833 = vector.broadcast %cst_5 : f32 to vector<1x128xf32>
    %834 = arith.subf %833, %832 : vector<1x128xf32>
    %835 = arith.mulf %831, %834 : vector<1x128xf32>
    %836 = vector.broadcast %835 : vector<1x128xf32> to vector<9x128xf32>
    %837 = arith.mulf %828, %836 : vector<9x128xf32>
    %c0_6 = arith.constant 0 : index
    %c0_7 = arith.constant 0 : index
    %838 = vector.load %arg3[%c0_6, %c0_7] : memref<9x128xf32, #tpu.memory_space<vmem>>, vector<9x128xf32>
    tpu.vector_store %arg3[%c0_6, %c0_7], %837 {strides = array<i32>} : memref<9x128xf32, #tpu.memory_space<vmem>>, vector<9x128xf32>,
    return
  }
  func.func @transform_0(%arg0: i32) -> (i32, i32) {
    %c0_i32 = arith.constant 0 : i32
    %c0_i32_0 = arith.constant 0 : i32
    return %c0_i32, %arg0 : i32, i32
  }
  func.func @transform_1(%arg0: i32) -> (i32, i32) {
    %c0_i32 = arith.constant 0 : i32
    %c0_i32_0 = arith.constant 0 : i32
    %c0_i32_1 = arith.constant 0 : i32
    return %c0_i32, %c0_i32_0 : i32, i32
  }
  func.func @transform_2(%arg0: i32) -> (i32, i32) {
    %c0_i32 = arith.constant 0 : i32
    %c0_i32_0 = arith.constant 0 : i32
    return %c0_i32, %arg0 : i32, i32
  }
}

</mosaic_0001>

<bundles_post_ra>
// kernel: tpu_custom_call.1
= control target key start
LH: loop header
LB: loop body
LE: loop exit
PB: predicated region body
PF: predicated region fallthrough
CT: control target
= control target key end

     0   :  { %v2818_v1 = vmov 9   ;;  %v2819_v2 = vmov 0   ;;  %s2810_s0 = inlined_call_operand.vmem [shape: f32[27,128], index: 0, kind: input, shape index: {}]   ;;  %s2811_s1 = inlined_call_operand.vmem [shape: f32[64,16], index: 1, kind: input, shape index: {}]   ;;  %s2812_s2 = inlined_call_operand.hbm [shape: f32[9,128], index: 2, kind: output, shape index: {}]  }
   0x1   :  { %v16_v0 = vld [vmem:[%s2811_s1] sm:$0xff]  ;;  %1429 = vset.pattern.permute.xlu1 %v2818_v1  ;;  %1428 = vset.pattern.permute.xlu0 %v2819_v2  ;;  %v17_v3 = vld [vmem:[%s2811_s1 + $0x8] sm:$0xff] }
   0x2   :  { %41 = vperm.xlu1 %1429, %v16_v0   ;;  %26 = vperm.xlu0 %1428, %v16_v0  }
   0x3   :  { %7 = vsyncpa [#allocation3], 0  ;;  %v2817_v4 = vmov 1   ;;  %v2816_v5 = vmov 2   ;;  %v18_v6 = vld [vmem:[%s2811_s1 + $0x10] sm:$0xff]  ;;  %v19_v7 = vld [vmem:[%s2811_s1 + $0x18] sm:$0xff]  ;;  %v34_v18 = vlaneseq }
   0x4   :  { %v2815_v8 = vmov 3   ;;  %v2823_v9 = vmov 6   ;;  %v2814_v10 = vmov 4   ;;  %v2820_v11 = vmov 5   ;;  %v20_v12 = vld [vmem:[%s2811_s1 + $0x20] sm:$0xff]  ;;  %v1654_v15 = vld [vmem:[%s2811_s1 + $0x28] sm:$0xff] }
   0x5   :  { %v2813_v13 = vmov 7   ;;  %v2821_v14 = vmov 8   ;;  %v1668_v16 = vld [vmem:[%s2811_s1 + $0x30] sm:$0xff]  ;;  %v1684_v17 = vld [vmem:[%s2811_s1 + $0x38] sm:$0xff]  ;;  %v35_v19 = vshrl.u32 %v34_v18, 7  ;;  %v12_v27 = vld [vmem:[%s2810_s0] sm:$0xff] }
   0x6   :  { %45 = vperm.xlu1 %1429, %v17_v3   ;;  %31 = vperm.xlu0 %1428, %v17_v3   ;;  %v13_v28 = vld [vmem:[%s2810_s0 + $0x8] sm:$0xff]  ;;  %v14_v30 = vld [vmem:[%s2810_s0 + $0x10] sm:$0xff]  ;;  %v15_v31 = vld [vmem:[%s2810_s0 + $0x18] sm:$0x7]  ;;  %vm1368_vm0 = vcmask 1040384   ;;  %s1600_s0 = smov [#allocation2]  }
   0x7   :  { %v1699_v20 = vsub.s32 0, %v35_v19  ;;  %v1701_v21 = vsub.s32 1, %v35_v19  ;;  %v1703_v22 = vsub.s32 3, %v35_v19  ;;  %v1705_v23 = vsub.s32 2, %v35_v19  ;;  %s1404_s4 = sshll.u32 %s1600_s0, 4  ;;  %s1405_s4 = int_to_ptr.vmem [resolvable:$true] %s1404_s4 }
   0x8   :  { %v1707_v24 = vsub.s32 4, %v35_v19  ;;  %v1709_v25 = vsub.s32 6, %v35_v19  ;;  %v1711_v26 = vsub.s32 7, %v35_v19  ;;  %v1720_v29 = vsub.s32 5, %v35_v19  ;;  %s1566_s5 = scalar_lea.vmem %s1405_s4, 256  ;;  %p1571_p1 = scmp.lt.s32.totalorder %s1405_s4, %s1405_s4 }
   0x9   :  { %2902 = vst [vmem:[#allocation5_spill] sm:$0xff] %v1701_v21  ;;  %2903 = vst [vmem:[#allocation6_spill] sm:$0xff] %v1703_v22  ;;  %v1730_v32 = vrot.slane %v12_v27, %v1699_v20  ;;  %v1733_v33 = vrot.slane %v12_v27, %v1703_v22  ;;  %v449_v34 = vrot.slane %v13_v28, %v1701_v21  ;;  %p1567_p0 = scmp.ne.s32.totalorder %s1405_s4, %s1566_s5  ;;  %p1572_p2 = scmp.lt.s32.totalorder %s1566_s5, %s1566_s5 }
   0xa   :  { %1431 = vset.pattern.permute.xlu1 %v2817_v4  ;;  %1430 = vset.pattern.permute.xlu0 %v2817_v4  ;;  %2904 = vst [vmem:[#allocation7_spill] sm:$0xff] %v1705_v23  ;;  %2905 = vst [vmem:[#allocation8_spill] sm:$0xff] %v1707_v24  ;;  %v347_v35 = vrot.slane %v12_v27, %v1709_v25  ;;  %v551_v36 = vrot.slane %v13_v28, %v1707_v24 }
   0xb   :  { %55 = vperm.xlu1 %1431, %v17_v3   ;;  %51 = vperm.xlu0 %1430, %v16_v0   ;;  %2906 = vst [vmem:[#allocation9_spill] sm:$0xff] %v1709_v25  ;;  %2907 = vst [vmem:[#allocation10_spill] sm:$0xff] %v1711_v26  ;;  %v653_v37 = vrot.slane %v13_v28, %v1711_v26  ;;  %v755_v38 = vrot.slane %v14_v30, %v1705_v23  ;;  %p1573_p3 = por %p1572_p2, %p1571_p1 }
   0xc   :  { %2908 = vst [vmem:[#allocation11_spill] sm:$0xff] %v1720_v29  ;;  %v857_v39 = vrot.slane %v14_v30, %v1720_v29  ;;  %v959_v40 = vrot.slane %v15_v31, %v1699_v20  ;;  %v1743_v41 = vrot.slane %v12_v27, %v1701_v21  ;;  %v1746_v42 = vrot.slane %v12_v27, %v1707_v24 }
   0xd   :  { %v1752_v45 = vrot.slane %v12_v27, %v1711_v26  ;;  %v1755_v46 = vrot.slane %v13_v28, %v1705_v23  ;;  %v1758_v47 = vrot.slane %v13_v28, %v1720_v29  ;;  %v1761_v48 = vrot.slane %v14_v30, %v1699_v20  ;;  %p1574_p4 = pnand %p1573_p3, %p1567_p0 }
   0xe   :  { %v1765_v49 = vrot.slane %v14_v30, %v1703_v22  ;;  %v1768_v50 = vrot.slane %v14_v30, %v1709_v25  ;;  %v1771_v51 = vrot.slane %v15_v31, %v1701_v21  ;;  %v1774_v52 = vrot.slane %v12_v27, %v1705_v23 }
   0xf   :  { %1432 = vset.pattern.permute.xlu1 %v2816_v5  ;;  %1433 = vset.pattern.permute.xlu0 %v2816_v5  ;;  %v1778_v54 = vrot.slane %v12_v27, %v1720_v29  ;;  %v1781_v55 = vrot.slane %v13_v28, %v1699_v20  ;;  %v1784_v56 = vrot.slane %v13_v28, %v1703_v22 }
  0x10   :  { %67 = vperm.xlu1 %1432, %v16_v0   ;;  %71 = vperm.xlu0 %1433, %v17_v3   ;;  %v1788_v59 = vrot.slane %v13_v28, %v1709_v25  ;;  %v1791_v60 = vrot.slane %v14_v30, %v1701_v21  ;;  %v1803_v18 = vrot.slane %v14_v30, %v1711_v26 }
  0x11   :  { %v1806_v19 = vrot.slane %v15_v31, %v1705_v23 }
  0x14   :  { %1434 = vset.pattern.permute.xlu1 %v2819_v2  ;;  %1435 = vset.pattern.permute.xlu0 %v2818_v1 }
  0x15   :  { %86 = vperm.xlu1 %1434, %v18_v6   ;;  %101 = vperm.xlu0 %1435, %v18_v6  }
  0x19   :  { %91 = vperm.xlu1 %1434, %v19_v7   ;;  %105 = vperm.xlu0 %1435, %v19_v7  }
  0x1d   :  { %1436 = vset.pattern.permute.xlu1 %v2817_v4  ;;  %1442 = vset.pattern.permute.xlu0 %v2815_v8 }
  0x1e   :  { %111 = vperm.xlu1 %1436, %v18_v6   ;;  %143 = vperm.xlu0 %1442, %v18_v6  }
  0x22   :  { %1437 = vset.pattern.permute.xlu1 %v2816_v5  ;;  %147 = vperm.xlu0 %1442, %v19_v7  }
  0x23   :  { %127 = vperm.xlu1 %1437, %v18_v6  }
  0x26   :  { %1445 = vset.pattern.permute.xlu0 %v2823_v9 }
  0x27   :  { %1438 = vset.pattern.permute.xlu1 %v2814_v10  ;;  %191 = vperm.xlu0 %1445, %v18_v6  }
  0x28   :  { %159 = vperm.xlu1 %1438, %v18_v6  }
  0x2b   :  { %195 = vperm.xlu0 %1445, %v19_v7  }
  0x2c   :  { %1439 = vset.pattern.permute.xlu1 %v2820_v11 }
  0x2d   :  { %175 = vperm.xlu1 %1439, %v18_v6  }
  0x2f   :  { %1452 = vset.pattern.permute.xlu0 %v2816_v5 }
  0x30   :  { %1101 = vperm.xlu0 %1452, %v20_v12  }
  0x31   :  { %1440 = vset.pattern.permute.xlu1 %v2813_v13 }
  0x32   :  { %207 = vperm.xlu1 %1440, %v18_v6  }
  0x34   :  { %1455 = vset.pattern.permute.xlu0 %v2820_v11 }
  0x35   :  { %1149 = vperm.xlu0 %1455, %v20_v12  }
  0x36   :  { %1441 = vset.pattern.permute.xlu1 %v2821_v14 }
  0x37   :  { %223 = vperm.xlu1 %1441, %v18_v6  }
  0x39   :  { %1460 = vset.pattern.permute.xlu0 %v2817_v4 }
  0x3a   :  { %1089 = vperm.xlu0 %1460, %v1654_v15  }
  0x3b   :  { %1443 = vset.pattern.permute.xlu1 %v2817_v4 }
  0x3c   :  { %115 = vperm.xlu1 %1443, %v19_v7  }
  0x3e   :  { %1465 = vset.pattern.permute.xlu0 %v2813_v13 }
  0x3f   :  { %1185 = vperm.xlu0 %1465, %v1654_v15  }
  0x40   :  { %1444 = vset.pattern.permute.xlu1 %v2816_v5 }
  0x41   :  { %131 = vperm.xlu1 %1444, %v19_v7  }
  0x43   :  { %1466 = vset.pattern.permute.xlu0 %v2819_v2 }
  0x44   :  { %1060 = vperm.xlu0 %1466, %v20_v12  }
  0x45   :  { %1446 = vset.pattern.permute.xlu1 %v2814_v10 }
  0x46   :  { %163 = vperm.xlu1 %1446, %v19_v7  }
  0x48   :  { %1065 = vperm.xlu0 %1466, %v1654_v15  }
  0x4a   :  { %1447 = vset.pattern.permute.xlu1 %v2820_v11 }
  0x4b   :  { %179 = vperm.xlu1 %1447, %v19_v7  }
  0x4c   :  { %1216 = vperm.xlu0 %1466, %v1668_v16  }
  0x4f   :  { %1448 = vset.pattern.permute.xlu1 %v2813_v13 }
  0x50   :  { %211 = vperm.xlu1 %1448, %v19_v7   ;;  %1471 = vset.pattern.permute.xlu0 %v2818_v1 }
  0x51   :  { %1231 = vperm.xlu0 %1471, %v1668_v16  }
  0x54   :  { %1449 = vset.pattern.permute.xlu1 %v2821_v14 }
  0x55   :  { %227 = vperm.xlu1 %1449, %v19_v7   ;;  %1473 = vset.pattern.permute.xlu0 %v2816_v5 }
  0x56   :  { %1257 = vperm.xlu0 %1473, %v1668_v16  }
  0x59   :  { %1450 = vset.pattern.permute.xlu1 %v2818_v1 }
  0x5a   :  { %1075 = vperm.xlu1 %1450, %v20_v12   ;;  %1474 = vset.pattern.permute.xlu0 %v2814_v10 }
  0x5b   :  { %1137 = vperm.xlu0 %1474, %v1654_v15  }
  0x5e   :  { %1451 = vset.pattern.permute.xlu1 %v2817_v4 }
  0x5f   :  { %1085 = vperm.xlu1 %1451, %v20_v12   ;;  %1293 = vperm.xlu0 %1474, %v1684_v17  }
  0x63   :  { %1453 = vset.pattern.permute.xlu1 %v2815_v8  ;;  %1478 = vset.pattern.permute.xlu0 %v2820_v11 }
  0x64   :  { %1117 = vperm.xlu1 %1453, %v20_v12   ;;  %1305 = vperm.xlu0 %1478, %v1668_v16  }
  0x68   :  { %1454 = vset.pattern.permute.xlu1 %v2814_v10  ;;  %1480 = vset.pattern.permute.xlu0 %v2813_v13 }
  0x69   :  { %1133 = vperm.xlu1 %1454, %v20_v12   ;;  %1341 = vperm.xlu0 %1480, %v1684_v17  }
  0x6d   :  { %1456 = vset.pattern.permute.xlu1 %v2823_v9  ;;  %1483 = vset.pattern.permute.xlu0 %v2821_v14 }
  0x6e   :  { %1165 = vperm.xlu1 %1456, %v20_v12   ;;  %1353 = vperm.xlu0 %1483, %v1668_v16  }
  0x72   :  { %1457 = vset.pattern.permute.xlu1 %v2813_v13 }
  0x73   :  { %1181 = vperm.xlu1 %1457, %v20_v12  }
  0x77   :  { %1458 = vset.pattern.permute.xlu1 %v2821_v14 }
  0x78   :  { %1197 = vperm.xlu1 %1458, %v20_v12   ;;  %v1800_v12 = vrot.slane %v14_v30, %v1707_v24 }
  0x7c   :  { %1459 = vset.pattern.permute.xlu1 %v2818_v1 }
  0x7d   :  { %1079 = vperm.xlu1 %1459, %v1654_v15  }
  0x81   :  { %1461 = vset.pattern.permute.xlu1 %v2816_v5  ;;  %v1749_v43 = vpop.permute.xlu1 %41  ;;  %v27_v44 = vpop.permute.xlu0 %26 }
  0x82   :  { %1105 = vperm.xlu1 %1461, %v1654_v15   ;;  %v38_v53 = vmul.f32 %v1730_v32, %v27_v44  ;;  %v246_v57 = vmul.f32 %v1733_v33, %v27_v44  ;;  %v348_v58 = vmul.f32 %v347_v35, %v27_v44  ;;  %v450_v61 = vmul.f32 %v449_v34, %v27_v44 }
  0x83   :  { %v552_v62 = vmul.f32 %v551_v36, %v27_v44  ;;  %v654_v63 = vmul.f32 %v653_v37, %v27_v44  ;;  %v756_v0 = vmul.f32 %v755_v38, %v27_v44  ;;  %v858_v28 = vmul.f32 %v857_v39, %v27_v44 }
  0x84   :  { %v48_v27 = vadd.f32 %v1749_v43, %v38_v53  ;;  %v452_v31 = vadd.f32 %v450_v61, %v1749_v43  ;;  %v960_v1 = vmul.f32 %v959_v40, %v27_v44 }
  0x85   :  { %v1793_v3 = vpop.permute.xlu1 %45  ;;  %v1795_v6 = vpop.permute.xlu0 %31  ;;  %v554_v4 = vadd.f32 %v552_v62, %v1749_v43  ;;  %v656_v53 = vadd.f32 %v654_v63, %v1749_v43 }
  0x86   :  { %v349_v7 = vmul.f32 %v347_v35, %v1795_v6  ;;  %1462 = vset.pattern.permute.xlu1 %v2815_v8  ;;  %v451_v13 = vmul.f32 %v449_v34, %v1795_v6  ;;  %v553_v10 = vmul.f32 %v551_v36, %v1795_v6  ;;  %v248_v35 = vadd.f32 %v246_v57, %v1749_v43 }
  0x87   :  { %1121 = vperm.xlu1 %1462, %v1654_v15   ;;  %v350_v8 = vadd.f32 %v348_v58, %v1749_v43  ;;  %v655_v5 = vmul.f32 %v653_v37, %v1795_v6  ;;  %v757_v30 = vmul.f32 %v755_v38, %v1795_v6  ;;  %v758_v34 = vadd.f32 %v756_v0, %v1749_v43 }
  0x88   :  { %v351_v36 = vadd.f32 %v349_v7, %v1793_v3  ;;  %v859_v2 = vmul.f32 %v857_v39, %v1795_v6  ;;  %v961_v57 = vmul.f32 %v959_v40, %v1795_v6  ;;  %v453_v37 = vadd.f32 %v451_v13, %v1793_v3 }
  0x89   :  { %v555_v38 = vadd.f32 %v553_v10, %v1793_v3  ;;  %v657_v44 = vadd.f32 %v655_v5, %v1793_v3  ;;  %v759_v39 = vadd.f32 %v757_v30, %v1793_v3  ;;  %v962_v29 = vadd.f32 %v960_v1, %v1749_v43 }
  0x8a   :  { %v1823_v58 = vpop.permute.xlu1 %55  ;;  %v52_v63 = vpop.permute.xlu0 %51  ;;  %v861_v10 = vadd.f32 %v859_v2, %v1793_v3  ;;  %v963_v0 = vadd.f32 %v961_v57, %v1793_v3 }
  0x8b   :  { %v357_v61 = vmul.f32 %v1752_v45, %v1823_v58  ;;  %v459_v62 = vmul.f32 %v1755_v46, %v1823_v58  ;;  %1463 = vset.pattern.permute.xlu1 %v2820_v11  ;;  %v561_v40 = vmul.f32 %v1758_v47, %v1823_v58  ;;  %v663_v13 = vmul.f32 %v1761_v48, %v1823_v58 }
  0x8c   :  { %1153 = vperm.xlu1 %1463, %v1654_v15   ;;  %v765_v14 = vmul.f32 %v1765_v49, %v1823_v58  ;;  %v867_v9 = vmul.f32 %v1768_v50, %v1823_v58  ;;  %v969_v26 = vmul.f32 %v1771_v51, %v1823_v58  ;;  %v62_v2 = vmul.f32 %v1743_v41, %v52_v63 }
  0x8d   :  { %v1841_v7 = vadd.f32 %v357_v61, %v351_v36  ;;  %v1843_v11 = vadd.f32 %v459_v62, %v453_v37  ;;  %v1845_v5 = vadd.f32 %v561_v40, %v555_v38  ;;  %v1847_v30 = vadd.f32 %v663_v13, %v657_v44 }
  0x8e   :  { %v254_v36 = vmul.f32 %v1746_v42, %v52_v63  ;;  %v356_v57 = vmul.f32 %v1752_v45, %v52_v63  ;;  %v1858_v38 = vadd.f32 %v765_v14, %v759_v39  ;;  %v1860_v61 = vadd.f32 %v867_v9, %v861_v10 }
  0x8f   :  { %v68_v37 = vpop.permute.xlu1 %67  ;;  %v458_v62 = vmul.f32 %v1755_v46, %v52_v63  ;;  %v560_v44 = vmul.f32 %v1758_v47, %v52_v63  ;;  %v2909_v40 = vmov 6   ;;  %v860_v13 = vadd.f32 %v858_v28, %v1749_v43 }
  0x90   :  { %1464 = vset.pattern.permute.xlu1 %v2909_v40  ;;  %v1867_v24 = vadd.f32 %v969_v26, %v963_v0  ;;  %v64_v25 = vadd.f32 %v62_v2, %v48_v27  ;;  %v256_v45 = vadd.f32 %v254_v36, %v248_v35  ;;  %v358_v14 = vadd.f32 %v356_v57, %v350_v8 }
  0x91   :  { %1169 = vperm.xlu1 %1464, %v1654_v15   ;;  %v662_v9 = vmul.f32 %v1761_v48, %v52_v63  ;;  %v764_v39 = vmul.f32 %v1765_v49, %v52_v63  ;;  %v460_v46 = vadd.f32 %v458_v62, %v452_v31  ;;  %v562_v10 = vadd.f32 %v560_v44, %v554_v4 }
  0x92   :  { %v78_v47 = vmul.f32 %v1774_v52, %v68_v37  ;;  %v262_v40 = vmul.f32 %v1778_v54, %v68_v37  ;;  %v866_v28 = vmul.f32 %v1768_v50, %v52_v63  ;;  %v968_v1 = vmul.f32 %v1771_v51, %v52_v63 }
  0x93   :  { %v364_v26 = vmul.f32 %v1781_v55, %v68_v37  ;;  %v466_v43 = vmul.f32 %v1784_v56, %v68_v37  ;;  %v664_v8 = vadd.f32 %v662_v9, %v656_v53  ;;  %v766_v48 = vadd.f32 %v764_v39, %v758_v34 }
  0x94   :  { %v1878_v27 = vpop.permute.xlu1 %86  ;;  %v80_v35 = vadd.f32 %v78_v47, %v64_v25  ;;  %v264_v49 = vadd.f32 %v262_v40, %v256_v45  ;;  %v2910_v31 = vmov 8   ;;  %v568_v2 = vmul.f32 %v1788_v59, %v68_v37 }
  0x95   :  { %1467 = vset.pattern.permute.xlu1 %v2910_v31  ;;  %v366_v4 = vadd.f32 %v364_v26, %v358_v14  ;;  %v468_v0 = vadd.f32 %v466_v43, %v460_v46  ;;  %v670_v50 = vmul.f32 %v1791_v60, %v68_v37  ;;  %v772_v51 = vmul.f32 %v1800_v12, %v68_v37  ;;  %v72_v14 = vpop.permute.xlu0 %71 }
  0x96   :  { %1201 = vperm.xlu1 %1467, %v1654_v15   ;;  %1484 = vtanh.f32 %v80_v35  ;;  %v874_v63 = vmul.f32 %v1803_v18, %v68_v37  ;;  %v976_v53 = vmul.f32 %v1806_v19, %v68_v37  ;;  %v868_v34 = vadd.f32 %v866_v28, %v860_v13 }
  0x97   :  { %1486 = vtanh.f32 %v264_v49  ;;  %v570_v25 = vadd.f32 %v568_v2, %v562_v10  ;;  %v672_v36 = vadd.f32 %v670_v50, %v664_v8  ;;  %v39_v62 = vmul.f32 %v1730_v32, %v1795_v6 }
  0x98   :  { %v1887_v57 = vpop.permute.xlu1 %91  ;;  %v970_v44 = vadd.f32 %v968_v1, %v962_v29  ;;  %1488 = vtanh.f32 %v366_v4  ;;  %v774_v40 = vadd.f32 %v772_v51, %v766_v48  ;;  %v247_v15 = vmul.f32 %v1733_v33, %v1795_v6 }
  0x99   :  { %1490 = vtanh.f32 %v468_v0  ;;  %v876_v45 = vadd.f32 %v874_v63, %v868_v34  ;;  %v2911_v9 = vmov 0   ;;  %v63_v37 = vmul.f32 %v1743_v41, %v1823_v58 }
  0x9a   :  { %1468 = vset.pattern.permute.xlu1 %v2911_v9  ;;  %1492 = vtanh.f32 %v570_v25  ;;  %v978_v13 = vadd.f32 %v976_v53, %v970_v44  ;;  %v255_v29 = vmul.f32 %v1746_v42, %v1823_v58  ;;  %v49_v32 = vadd.f32 %v1793_v3, %v39_v62 }
  0x9b   :  { %1221 = vperm.xlu1 %1468, %v1684_v17   ;;  %1494 = vtanh.f32 %v672_v36  ;;  %v79_v33 = vmul.f32 %v1774_v52, %v72_v14  ;;  %v249_v39 = vadd.f32 %v247_v15, %v1793_v3  ;;  %v263_v41 = vmul.f32 %v1778_v54, %v72_v14 }
  0x9c   :  { %1496 = vtanh.f32 %v774_v40  ;;  %v65_v46 = vadd.f32 %v63_v37, %v49_v32  ;;  %v365_v10 = vmul.f32 %v1781_v55, %v72_v14  ;;  %v2912_v47 = vmov 9   ;;  %v102_v37 = vpop.permute.xlu0 %101 }
  0x9d   :  { %v1901_v6 = vpop.permute.xlu1 %111  ;;  %1498 = vtanh.f32 %v876_v45  ;;  %v257_v42 = vadd.f32 %v255_v29, %v249_v39  ;;  %v467_v58 = vmul.f32 %v1784_v56, %v72_v14  ;;  %v569_v1 = vmul.f32 %v1788_v59, %v72_v14 }
  0x9e   :  { %1500 = vtanh.f32 %v978_v13  ;;  %v81_v52 = vadd.f32 %v79_v33, %v65_v46  ;;  %v671_v54 = vmul.f32 %v1791_v60, %v72_v14  ;;  %v773_v43 = vmul.f32 %v1800_v12, %v72_v14 }
  0x9f   :  { %1469 = vset.pattern.permute.xlu1 %v2912_v47  ;;  %v265_v26 = vadd.f32 %v263_v41, %v257_v42  ;;  %v875_v55 = vmul.f32 %v1803_v18, %v72_v14  ;;  %v367_v56 = vadd.f32 %v365_v10, %v1841_v7  ;;  %v469_v49 = vadd.f32 %v467_v58, %v1843_v11 }
  0xa0   :  { %1235 = vperm.xlu1 %1469, %v1684_v17   ;;  %v1909_v28 = vpop.eup %1484  ;;  %v977_v59 = vmul.f32 %v1806_v19, %v72_v14  ;;  %v2913_v4 = vmov 1   ;;  %1502 = vtanh.f32 %v81_v52  ;;  %v571_v60 = vadd.f32 %v569_v1, %v1845_v5 }
  0xa1   :  { %v1912_v3 = vpop.eup %1486  ;;  %v97_v12 = vrot.slane %v1909_v28, %v1699_v20  ;;  %1504 = vtanh.f32 %v265_v26  ;;  %v673_v7 = vadd.f32 %v671_v54, %v1847_v30  ;;  %v775_v11 = vadd.f32 %v773_v43, %v1858_v38 }
  0xa2   :  { %v1917_v8 = vpop.permute.xlu1 %127  ;;  %v1919_v48 = vpop.eup %1488  ;;  %v877_v19 = vadd.f32 %v875_v55, %v1860_v61  ;;  %1506 = vtanh.f32 %v367_v56  ;;  %v271_v5 = vrot.slane %v1912_v3, %v1699_v20  ;;  %v979_v30 = vadd.f32 %v977_v59, %v1867_v24 }
  0xa3   :  { %v1922_v35 = vpop.eup %1490  ;;  %v373_v50 = vrot.slane %v1919_v48, %v1699_v20  ;;  %1508 = vtanh.f32 %v469_v49  ;;  %v98_v25 = vmul.f32 %v97_v12, %v1878_v27  ;;  %v1962_v62 = vrot.slane %v1909_v28, %v1701_v21 }
  0xa4   :  { %1470 = vset.pattern.permute.xlu1 %v2913_v4  ;;  %v1927_v0 = vpop.eup %1492  ;;  %v475_v51 = vrot.slane %v1922_v35, %v1699_v20  ;;  %1510 = vtanh.f32 %v571_v60  ;;  %v272_v15 = vmul.f32 %v271_v5, %v1878_v27  ;;  %v1989_v46 = vrot.slane %v1912_v3, %v1701_v21 }
  0xa5   :  { %1245 = vperm.xlu1 %1470, %v1684_v17   ;;  %v1933_v18 = vpop.eup %1494  ;;  %v577_v38 = vrot.slane %v1927_v0, %v1699_v20  ;;  %2914 = vst [vmem:[#allocation12_spill] sm:$0xff] %v1962_v62  ;;  %1512 = vtanh.f32 %v673_v7  ;;  %v374_v45 = vmul.f32 %v373_v50, %v1878_v27  ;;  %v1993_v10 = vrot.slane %v1909_v28, %v1703_v22  ;;  %v2011_v7 = vpop.permute.xlu0 %105 }
  0xa6   :  { %v1938_v2 = vpop.eup %1496  ;;  %v679_v24 = vrot.slane %v1933_v18, %v1699_v20  ;;  %v476_v14 = vmul.f32 %v475_v51, %v1878_v27  ;;  %1514 = vtanh.f32 %v775_v11  ;;  %2918 = vst [vmem:[#allocation16_spill] sm:$0xff] %v1989_v46  ;;  %v2920_v47 = vmov 2   ;;  %2922 = vst [vmem:[#allocation19_spill] sm:$0xff] %v2011_v7 }
  0xa7   :  { %v1946_v63 = vpop.permute.xlu1 %159  ;;  %v1948_v53 = vpop.eup %1498  ;;  %v781_v61 = vrot.slane %v1938_v2, %v1699_v20  ;;  %v578_v13 = vmul.f32 %v577_v38, %v1878_v27  ;;  %2919 = vst [vmem:[#allocation17_spill] sm:$0xff] %v1993_v10  ;;  %1516 = vtanh.f32 %v877_v19  ;;  %v99_v58 = vmul.f32 %v97_v12, %v1887_v57 }
  0xa8   :  { %v1955_v34 = vpop.eup %1500  ;;  %v883_v36 = vrot.slane %v1948_v53, %v1699_v20  ;;  %v680_v42 = vmul.f32 %v679_v24, %v1878_v27  ;;  %v2000_v52 = vrot.slane %v1912_v3, %v1703_v22  ;;  %1518 = vtanh.f32 %v979_v30 }
  0xa9   :  { %1241 = vperm.xlu1 %1470, %v1668_v16   ;;  %v782_v44 = vmul.f32 %v781_v61, %v1878_v27  ;;  %v985_v40 = vrot.slane %v1955_v34, %v1699_v20  ;;  %v1977_v32 = vmul.f32 %v781_v61, %v1887_v57  ;;  %v108_v26 = vadd.f32 %v102_v37, %v98_v25 }
  0xaa   :  { %v884_v9 = vmul.f32 %v883_v36, %v1878_v27  ;;  %v1980_v33 = vmul.f32 %v883_v36, %v1887_v57  ;;  %2921 = vst [vmem:[#allocation18_spill] sm:$0xff] %v2000_v52  ;;  %v2003_v1 = vpop.eup %1502  ;;  %v274_v54 = vadd.f32 %v272_v15, %v102_v37  ;;  %v273_v43 = vmul.f32 %v271_v5, %v1887_v57 }
  0xab   :  { %v986_v29 = vmul.f32 %v985_v40, %v1878_v27  ;;  %2915 = vst [vmem:[#allocation13_spill] sm:$0xff] %v1977_v32  ;;  %v1985_v41 = vmul.f32 %v985_v40, %v1887_v57  ;;  %v2006_v55 = vpop.eup %1504  ;;  %v376_v56 = vadd.f32 %v374_v45, %v102_v37  ;;  %v478_v49 = vadd.f32 %v476_v14, %v102_v37 }
  0xac   :  { %2916 = vst [vmem:[#allocation14_spill] sm:$0xff] %v1980_v33  ;;  %v1982_v39 = vpop.permute.xlu1 %175  ;;  %v580_v27 = vadd.f32 %v578_v13, %v102_v37  ;;  %v375_v59 = vmul.f32 %v373_v50, %v1887_v57  ;;  %v2009_v4 = vpop.eup %1506  ;;  %v784_v60 = vadd.f32 %v782_v44, %v102_v37  ;;  %v886_v12 = vadd.f32 %v884_v9, %v102_v37 }
  0xad   :  { %2917 = vst [vmem:[#allocation15_spill] sm:$0xff] %v1985_v41  ;;  %1472 = vset.pattern.permute.xlu1 %v2920_v47  ;;  %v2015_v11 = vrot.slane %v1938_v2, %v1701_v21  ;;  %v2019_v19 = vrot.slane %v1948_v53, %v1701_v21  ;;  %v2023_v30 = vpop.eup %1508  ;;  %v682_v61 = vadd.f32 %v680_v42, %v102_v37  ;;  %v2926_v44 = vmov 3  }
  0xae   :  { %1261 = vperm.xlu1 %1472, %v1684_v17   ;;  %v477_v50 = vmul.f32 %v475_v51, %v1887_v57  ;;  %v579_v25 = vmul.f32 %v577_v38, %v1887_v57  ;;  %v2028_v36 = vmul.f32 %v679_v24, %v1887_v57  ;;  %v2031_v40 = vpop.eup %1510  ;;  %v2035_v15 = vrot.slane %v1919_v48, %v1701_v21 }
  0xaf   :  { %2923 = vst [vmem:[#allocation20_spill] sm:$0xff] %v2015_v11  ;;  %2924 = vst [vmem:[#allocation21_spill] sm:$0xff] %v2019_v19  ;;  %v2039_v45 = vrot.slane %v1922_v35, %v1701_v21  ;;  %v790_v51 = vmul.f32 %v2015_v11, %v1901_v6  ;;  %v892_v38 = vmul.f32 %v2019_v19, %v1901_v6  ;;  %v2046_v57 = vpop.eup %1512 }
  0xb0   :  { %2925 = vst [vmem:[#allocation22_spill] sm:$0xff] %v2028_v36  ;;  %2927 = vst [vmem:[#allocation23_spill] sm:$0xff] %v2035_v15  ;;  %v988_v24 = vadd.f32 %v986_v29, %v102_v37  ;;  %v2049_v14 = vadd.f32 %v2011_v7, %v99_v58  ;;  %v2053_v9 = vrot.slane %v1927_v0, %v1701_v21 }
  0xb1   :  { %v2021_v5 = vpop.permute.xlu1 %207  ;;  %2928 = vst [vmem:[#allocation24_spill] sm:$0xff] %v2039_v45  ;;  %v2057_v13 = vrot.slane %v1955_v34, %v1701_v21  ;;  %v2060_v47 = vadd.f32 %v273_v43, %v2011_v7  ;;  %v2063_v42 = vadd.f32 %v375_v59, %v2011_v7  ;;  %v2067_v37 = vadd.f32 %v892_v38, %v886_v12  ;;  %v2083_v59 = vpop.eup %1514 }
  0xb2   :  { %1475 = vset.pattern.permute.xlu1 %v2926_v44  ;;  %2929 = vst [vmem:[#allocation25_spill] sm:$0xff] %v2049_v14  ;;  %2930 = vst [vmem:[#allocation26_spill] sm:$0xff] %v2053_v9  ;;  %v2065_v44 = vadd.f32 %v790_v51, %v784_v60  ;;  %v2070_v29 = vadd.f32 %v477_v50, %v2011_v7  ;;  %v2073_v58 = vadd.f32 %v579_v25, %v2011_v7  ;;  %v144_v51 = vpop.permute.xlu0 %143  ;;  %v2094_v38 = vpop.eup %1516 }
  0xb3   :  { %1277 = vperm.xlu1 %1475, %v1684_v17   ;;  %2931 = vst [vmem:[#allocation27_spill] sm:$0xff] %v2057_v13  ;;  %2932 = vst [vmem:[#allocation28_spill] sm:$0xff] %v2060_v47  ;;  %v2077_v14 = vrot.slane %v1933_v18, %v1701_v21  ;;  %v994_v43 = vmul.f32 %v2057_v13, %v1901_v6  ;;  %v122_v60 = vmul.f32 %v1962_v62, %v1901_v6  ;;  %v2108_v13 = vpop.eup %1518 }
  0xb4   :  { %2933 = vst [vmem:[#allocation29_spill] sm:$0xff] %v2063_v42  ;;  %2934 = vst [vmem:[#allocation30_spill] sm:$0xff] %v2070_v29  ;;  %v280_v12 = vmul.f32 %v1989_v46, %v1901_v6  ;;  %v382_v50 = vmul.f32 %v2035_v15, %v1901_v6  ;;  %v484_v25 = vmul.f32 %v2039_v45, %v1901_v6 }
  0xb5   :  { %2935 = vst [vmem:[#allocation31_spill] sm:$0xff] %v2073_v58  ;;  %2936 = vst [vmem:[#allocation32_spill] sm:$0xff] %v2077_v14  ;;  %v586_v21 = vmul.f32 %v2053_v9, %v1901_v6  ;;  %v2098_v58 = vadd.f32 %v994_v43, %v988_v24  ;;  %v2102_v29 = vrot.slane %v1919_v48, %v1703_v22 }
  0xb6   :  { %v2081_v47 = vpop.permute.xlu1 %223  ;;  %2937 = vst [vmem:[#allocation33_spill] sm:$0xff] %v2094_v38  ;;  %v2106_v42 = vrot.slane %v1922_v35, %v1703_v22  ;;  %2940 = vst [vmem:[#allocation36_spill] sm:$0xff] %v2108_v13  ;;  %v2112_v19 = vrot.slane %v1927_v0, %v1703_v22  ;;  %v2116_v11 = vrot.slane %v1933_v18, %v1703_v22  ;;  %v2946_v13 = vmov 4  }
  0xb7   :  { %1273 = vperm.xlu1 %1475, %v1668_v16   ;;  %2938 = vst [vmem:[#allocation34_spill] sm:$0xff] %v2102_v29  ;;  %v2120_v24 = vrot.slane %v1938_v2, %v1703_v22  ;;  %v2124_v43 = vrot.slane %v1948_v53, %v1703_v22  ;;  %v124_v9 = vadd.f32 %v122_v60, %v108_v26 }
  0xb8   :  { %2939 = vst [vmem:[#allocation35_spill] sm:$0xff] %v2106_v42  ;;  %2941 = vst [vmem:[#allocation37_spill] sm:$0xff] %v2112_v19  ;;  %v282_v45 = vadd.f32 %v280_v12, %v274_v54  ;;  %v688_v15 = vmul.f32 %v2077_v14, %v1901_v6  ;;  %v2130_v41 = vrot.slane %v1955_v34, %v1703_v22 }
  0xb9   :  { %2942 = vst [vmem:[#allocation38_spill] sm:$0xff] %v2116_v11  ;;  %2943 = vst [vmem:[#allocation39_spill] sm:$0xff] %v2120_v24  ;;  %v384_v46 = vadd.f32 %v382_v50, %v376_v56  ;;  %v486_v62 = vadd.f32 %v484_v25, %v478_v49  ;;  %v588_v33 = vadd.f32 %v586_v21, %v580_v27  ;;  %v2152_v27 = vpop.permute.xlu0 %147 }
  0xba   :  { %2944 = vst [vmem:[#allocation40_spill] sm:$0xff] %v2124_v43  ;;  %2945 = vst [vmem:[#allocation41_spill] sm:$0xff] %v2130_v41  ;;  %v154_v32 = vmul.f32 %v1993_v10, %v144_v51  ;;  %v690_v7 = vadd.f32 %v688_v15, %v682_v61  ;;  %v296_v26 = vmul.f32 %v2000_v52, %v144_v51 }
  0xbb   :  { %1476 = vset.pattern.permute.xlu1 %v2946_v13  ;;  %v2134_v36 = vpop.permute.xlu1 %115  ;;  %v398_v54 = vmul.f32 %v2102_v29, %v144_v51  ;;  %v500_v6 = vmul.f32 %v2106_v42, %v144_v51  ;;  %v2141_v60 = vmul.f32 %v2112_v19, %v144_v51  ;;  %v2144_v21 = vmul.f32 %v2116_v11, %v144_v51 }
  0xbc   :  { %2947 = vst [vmem:[#allocation42_spill] sm:$0xff] %v2134_v36  ;;  %1289 = vperm.xlu1 %1476, %v1668_v16   ;;  %v2147_v56 = vmul.f32 %v2120_v24, %v144_v51  ;;  %v2150_v49 = vmul.f32 %v2124_v43, %v144_v51  ;;  %2948 = vst [vmem:[#allocation43_spill] sm:$0xff] %v2152_v27  ;;  %v2155_v61 = vmul.f32 %v2130_v41, %v144_v51  ;;  %v2957_v24 = vmov 5  }
  0xbd   :  { %v2159_v15 = vrot.slane %v1909_v28, %v1705_v23  ;;  %v2163_v13 = vrot.slane %v1938_v2, %v1705_v23  ;;  %v2167_v12 = vrot.slane %v1948_v53, %v1705_v23  ;;  %v2171_v50 = vrot.slane %v1912_v3, %v1705_v23  ;;  %v2215_v27 = vpop.permute.xlu0 %191 }
  0xbe   :  { %v2175_v25 = vrot.slane %v1919_v48, %v1705_v23  ;;  %v2179_v51 = vrot.slane %v1922_v35, %v1705_v23  ;;  %v2183_v22 = vrot.slane %v1927_v0, %v1705_v23  ;;  %v2189_v43 = vrot.slane %v1933_v18, %v1705_v23 }
  0xbf   :  { %2949 = vst [vmem:[#allocation44_spill] sm:$0xff] %v2159_v15  ;;  %2950 = vst [vmem:[#allocation45_spill] sm:$0xff] %v2163_v13  ;;  %v138_v41 = vmul.f32 %v2159_v15, %v1917_v8  ;;  %v798_v11 = vmul.f32 %v2163_v13, %v1917_v8  ;;  %v900_v19 = vmul.f32 %v2167_v12, %v1917_v8 }
  0xc0   :  { %2951 = vst [vmem:[#allocation46_spill] sm:$0xff] %v2167_v12  ;;  %2952 = vst [vmem:[#allocation47_spill] sm:$0xff] %v2171_v50  ;;  %1477 = vset.pattern.permute.xlu1 %v2957_v24  ;;  %v2196_v42 = vpop.permute.xlu1 %131  ;;  %v288_v14 = vmul.f32 %v2171_v50, %v1917_v8  ;;  %v390_v15 = vmul.f32 %v2175_v25, %v1917_v8  ;;  %v492_v29 = vmul.f32 %v2179_v51, %v1917_v8 }
  0xc1   :  { %2953 = vst [vmem:[#allocation48_spill] sm:$0xff] %v2175_v25  ;;  %2954 = vst [vmem:[#allocation49_spill] sm:$0xff] %v2179_v51  ;;  %v594_v52 = vmul.f32 %v2183_v22, %v1917_v8  ;;  %1309 = vperm.xlu1 %1477, %v1684_v17   ;;  %v696_v12 = vmul.f32 %v2189_v43, %v1917_v8  ;;  %v800_v24 = vadd.f32 %v798_v11, %v2065_v44 }
  0xc2   :  { %2955 = vst [vmem:[#allocation50_spill] sm:$0xff] %v2183_v22  ;;  %2956 = vst [vmem:[#allocation51_spill] sm:$0xff] %v2189_v43  ;;  %v902_v13 = vadd.f32 %v900_v19, %v2067_v37  ;;  %v2213_v50 = vrot.slane %v1955_v34, %v1705_v23  ;;  %v140_v25 = vadd.f32 %v138_v41, %v124_v9  ;;  %v2960_v43 = vld [vmem:[#allocation9_spill] sm:$0xff] }
  0xc3   :  { %2958 = vst [vmem:[#allocation52_spill] sm:$0xff] %v2196_v42  ;;  %v290_v42 = vadd.f32 %v288_v14, %v282_v45  ;;  %v392_v10 = vadd.f32 %v390_v15, %v384_v46  ;;  %v494_v51 = vadd.f32 %v492_v29, %v486_v62  ;;  %v596_v22 = vadd.f32 %v594_v52, %v588_v33  ;;  %v2971_v15 = vld [vmem:[#allocation8_spill] sm:$0xff] }
  0xc4   :  { %2959 = vst [vmem:[#allocation53_spill] sm:$0xff] %v2213_v50  ;;  %v698_v36 = vadd.f32 %v696_v12, %v690_v7  ;;  %v1002_v38 = vmul.f32 %v2213_v50, %v1917_v8  ;;  %v2221_v11 = vrot.slane %v1909_v28, %v2960_v43  ;;  %v2225_v19 = vrot.slane %v1912_v3, %v2960_v43 }
  0xc5   :  { %v2229_v41 = vrot.slane %v1919_v48, %v2960_v43  ;;  %v2233_v62 = vrot.slane %v1922_v35, %v2960_v43  ;;  %v2237_v33 = vrot.slane %v1927_v0, %v2960_v43  ;;  %v2966_v8 = vmov 6   ;;  %v2240_v46 = vpop.permute.xlu1 %163 }
  0xc6   :  { %2961 = vst [vmem:[#allocation54_spill] sm:$0xff] %v2221_v11  ;;  %2962 = vst [vmem:[#allocation55_spill] sm:$0xff] %v2225_v19  ;;  %1479 = vset.pattern.permute.xlu1 %v2966_v8  ;;  %v1004_v52 = vadd.f32 %v1002_v38, %v2098_v58  ;;  %v2245_v7 = vmul.f32 %v2221_v11, %v2215_v27  ;;  %v2249_v45 = vrot.slane %v1933_v18, %v2960_v43 }
  0xc7   :  { %2963 = vst [vmem:[#allocation56_spill] sm:$0xff] %v2229_v41  ;;  %2964 = vst [vmem:[#allocation57_spill] sm:$0xff] %v2233_v62  ;;  %v2253_v14 = vrot.slane %v1938_v2, %v2960_v43  ;;  %1325 = vperm.xlu1 %1479, %v1684_v17   ;;  %v2258_v9 = vmul.f32 %v2225_v19, %v2215_v27  ;;  %v2262_v44 = vmul.f32 %v2229_v41, %v2215_v27 }
  0xc8   :  { %2965 = vst [vmem:[#allocation58_spill] sm:$0xff] %v2237_v33  ;;  %2967 = vst [vmem:[#allocation59_spill] sm:$0xff] %v2240_v46  ;;  %v2266_v37 = vmul.f32 %v2233_v62, %v2215_v27  ;;  %v2270_v29 = vmul.f32 %v2237_v33, %v2215_v27  ;;  %v2274_v58 = vrot.slane %v1948_v53, %v2960_v43  ;;  %v2983_v43 = vld [vmem:[#allocation11_spill] sm:$0xff] }
  0xc9   :  { %2968 = vst [vmem:[#allocation60_spill] sm:$0xff] %v2249_v45  ;;  %2969 = vst [vmem:[#allocation61_spill] sm:$0xff] %v2253_v14  ;;  %v156_v38 = vadd.f32 %v154_v32, %v140_v25  ;;  %v2278_v12 = vrot.slane %v1909_v28, %v2971_v15  ;;  %v2282_v8 = vrot.slane %v1912_v3, %v2971_v15 }
  0xca   :  { %2970 = vst [vmem:[#allocation62_spill] sm:$0xff] %v2274_v58  ;;  %v298_v23 = vadd.f32 %v296_v26, %v290_v42  ;;  %v400_v62 = vadd.f32 %v398_v54, %v392_v10  ;;  %v2286_v41 = vrot.slane %v1919_v48, %v2971_v15  ;;  %v502_v33 = vadd.f32 %v500_v6, %v494_v51  ;;  %v2301_v10 = vpop.permute.xlu1 %179 }
  0xcb   :  { %2972 = vst [vmem:[#allocation63_spill] sm:$0xff] %v2278_v12  ;;  %2973 = vst [vmem:[#allocation64_spill] sm:$0xff] %v2282_v8  ;;  %v170_v19 = vmul.f32 %v2278_v12, %v1946_v63  ;;  %v304_v32 = vmul.f32 %v2282_v8, %v1946_v63  ;;  %v2294_v25 = vrot.slane %v1922_v35, %v2971_v15  ;;  %1321 = vperm.xlu1 %1479, %v1668_v16  }
  0xcc   :  { %2974 = vst [vmem:[#allocation65_spill] sm:$0xff] %v2286_v41  ;;  %v2298_v11 = vrot.slane %v1927_v0, %v2971_v15  ;;  %2977 = vst [vmem:[#allocation68_spill] sm:$0xff] %v2301_v10  ;;  %v406_v42 = vmul.f32 %v2286_v41, %v1946_v63  ;;  %v604_v26 = vadd.f32 %v2141_v60, %v596_v22 }
  0xcd   :  { %2975 = vst [vmem:[#allocation66_spill] sm:$0xff] %v2294_v25  ;;  %v2308_v54 = vrot.slane %v1933_v18, %v2971_v15  ;;  %v808_v6 = vadd.f32 %v2147_v56, %v800_v24  ;;  %v508_v51 = vmul.f32 %v2294_v25, %v1946_v63  ;;  %v706_v12 = vadd.f32 %v2144_v21, %v698_v36 }
  0xce   :  { %2976 = vst [vmem:[#allocation67_spill] sm:$0xff] %v2298_v11  ;;  %v610_v8 = vmul.f32 %v2298_v11, %v1946_v63  ;;  %v2318_v10 = vrot.slane %v1938_v2, %v2971_v15  ;;  %v910_v60 = vadd.f32 %v2150_v49, %v902_v13  ;;  %v2325_v56 = vrot.slane %v1948_v53, %v2971_v15 }
  0xcf   :  { %2978 = vst [vmem:[#allocation69_spill] sm:$0xff] %v2308_v54  ;;  %v712_v22 = vmul.f32 %v2308_v54, %v1946_v63  ;;  %v1012_v24 = vadd.f32 %v2155_v61, %v1004_v52  ;;  %v2330_v11 = vmul.f32 %v2249_v45, %v2215_v27  ;;  %v2334_v36 = vmul.f32 %v2253_v14, %v2215_v27  ;;  %v2348_v14 = vpop.permute.xlu1 %211 }
  0xd0   :  { %2979 = vst [vmem:[#allocation70_spill] sm:$0xff] %v2318_v10  ;;  %2980 = vst [vmem:[#allocation71_spill] sm:$0xff] %v2325_v56  ;;  %v814_v21 = vmul.f32 %v2318_v10, %v1946_v63  ;;  %v2340_v49 = vrot.slane %v1955_v34, %v2971_v15  ;;  %v2982_v13 = vmov 7   ;;  %v932_v61 = vmul.f32 %v2274_v58, %v2215_v27 }
  0xd1   :  { %1481 = vset.pattern.permute.xlu1 %v2982_v13  ;;  %v172_v52 = vadd.f32 %v170_v19, %v156_v38  ;;  %v306_v54 = vadd.f32 %v304_v32, %v298_v23  ;;  %v916_v45 = vmul.f32 %v2325_v56, %v1946_v63  ;;  %v408_v25 = vadd.f32 %v406_v42, %v400_v62 }
  0xd2   :  { %2981 = vst [vmem:[#allocation72_spill] sm:$0xff] %v2340_v49  ;;  %1337 = vperm.xlu1 %1481, %v1668_v16   ;;  %v510_v10 = vadd.f32 %v508_v51, %v502_v33  ;;  %v816_v41 = vadd.f32 %v814_v21, %v808_v6  ;;  %v1018_v15 = vmul.f32 %v2340_v49, %v1946_v63 }
  0xd3   :  { %v612_v46 = vadd.f32 %v610_v8, %v604_v26  ;;  %v714_v13 = vadd.f32 %v712_v22, %v706_v12  ;;  %v918_v50 = vadd.f32 %v916_v45, %v910_v60  ;;  %v2354_v19 = vrot.slane %v1909_v28, %v2983_v43 }
  0xd4   :  { %v1020_v23 = vadd.f32 %v1018_v15, %v1012_v24  ;;  %v2358_v38 = vrot.slane %v1912_v3, %v2983_v43  ;;  %v2362_v16 = vrot.slane %v1919_v48, %v2983_v43  ;;  %v2366_v62 = vrot.slane %v1922_v35, %v2983_v43  ;;  %v2394_v26 = vpop.permute.xlu1 %227 }
  0xd5   :  { %v186_v63 = vmul.f32 %v2354_v19, %v1982_v39  ;;  %v2372_v33 = vrot.slane %v1927_v0, %v2983_v43  ;;  %v2376_v45 = vrot.slane %v1933_v18, %v2983_v43  ;;  %v2380_v15 = vrot.slane %v1938_v2, %v2983_v43  ;;  %2986 = vst [vmem:[#allocation75_spill] sm:$0xff] %v2394_v26 }
  0xd6   :  { %1482 = vset.pattern.permute.xlu1 %v2910_v31  ;;  %v312_v12 = vmul.f32 %v2358_v38, %v1982_v39  ;;  %v414_v8 = vmul.f32 %v2362_v16, %v1982_v39  ;;  %v516_v32 = vmul.f32 %v2366_v62, %v1982_v39  ;;  %v2391_v42 = vrot.slane %v1948_v53, %v2983_v43 }
  0xd7   :  { %2984 = vst [vmem:[#allocation73_spill] sm:$0xff] %v2372_v33  ;;  %2985 = vst [vmem:[#allocation74_spill] sm:$0xff] %v2376_v45  ;;  %1357 = vperm.xlu1 %1482, %v1684_v17   ;;  %v188_v6 = vadd.f32 %v186_v63, %v172_v52  ;;  %v618_v31 = vmul.f32 %v2372_v33, %v1982_v39  ;;  %v720_v51 = vmul.f32 %v2376_v45, %v1982_v39  ;;  %v2987_v45 = vld [vmem:[#allocation10_spill] sm:$0xff] }
  0xd8   :  { %v822_v22 = vmul.f32 %v2380_v15, %v1982_v39  ;;  %v314_v60 = vadd.f32 %v312_v12, %v306_v54  ;;  %v416_v24 = vadd.f32 %v414_v8, %v408_v25  ;;  %v518_v21 = vadd.f32 %v516_v32, %v510_v10 }
  0xd9   :  { %v924_v58 = vmul.f32 %v2391_v42, %v1982_v39  ;;  %v620_v49 = vadd.f32 %v618_v31, %v612_v46  ;;  %v722_v17 = vadd.f32 %v720_v51, %v714_v13  ;;  %v2406_v52 = vrot.slane %v1955_v34, %v2983_v43 }
  0xda   :  { %v824_v56 = vadd.f32 %v822_v22, %v816_v41  ;;  %v204_v26 = vadd.f32 %v2245_v7, %v188_v6  ;;  %v2411_v33 = vrot.slane %v1909_v28, %v2987_v45  ;;  %v322_v25 = vadd.f32 %v2258_v9, %v314_v60  ;;  %v2425_v7 = vpop.permute.xlu1 %1075 }
  0xdb   :  { %v926_v63 = vadd.f32 %v924_v58, %v918_v50  ;;  %v1026_v10 = vmul.f32 %v2406_v52, %v1982_v39  ;;  %v2418_v46 = vrot.slane %v1912_v3, %v2987_v45  ;;  %v424_v41 = vadd.f32 %v2262_v44, %v416_v24  ;;  %2988 = vst [vmem:[#allocation76_spill] sm:$0xff] %v2425_v7 }
  0xdc   :  { %v2423_v50 = vrot.slane %v1919_v48, %v2987_v45  ;;  %v218_v28 = vmul.f32 %v2411_v33, %v2021_v5  ;;  %v526_v9 = vadd.f32 %v2266_v37, %v518_v21  ;;  %v2432_v39 = vrot.slane %v1922_v35, %v2987_v45 }
  0xdd   :  { %v934_v58 = vadd.f32 %v932_v61, %v926_v63  ;;  %v2434_v3 = vadd.f32 %v1026_v10, %v1020_v23  ;;  %v328_v44 = vmul.f32 %v2418_v46, %v2021_v5  ;;  %v628_v54 = vadd.f32 %v2270_v29, %v620_v49 }
  0xde   :  { %v430_v48 = vmul.f32 %v2423_v50, %v2021_v5  ;;  %v220_v61 = vadd.f32 %v218_v28, %v204_v26  ;;  %v532_v13 = vmul.f32 %v2432_v39, %v2021_v5  ;;  %v2445_v37 = vrot.slane %v1927_v0, %v2987_v45 }
  0xdf   :  { %v730_v35 = vadd.f32 %v2330_v11, %v722_v17  ;;  %v330_v23 = vadd.f32 %v328_v44, %v322_v25  ;;  %v2450_v8 = vrot.slane %v1933_v18, %v2987_v45  ;;  %v832_v32 = vadd.f32 %v2334_v36, %v824_v56  ;;  %v2463_v11 = vpop.permute.xlu1 %1085 }
  0xe0   :  { %v432_v12 = vadd.f32 %v430_v48, %v424_v41  ;;  %v534_v6 = vadd.f32 %v532_v13, %v526_v9  ;;  %v634_v29 = vmul.f32 %v2445_v37, %v2021_v5  ;;  %v2457_v49 = vrot.slane %v1938_v2, %v2987_v45  ;;  %2989 = vst [vmem:[#allocation77_spill] sm:$0xff] %v2463_v11  ;;  %v2995_v13 = vld [vmem:[#allocation9_spill] sm:$0xff] }
  0xe1   :  { %v2461_v0 = vrot.slane %v2003_v1, %v1699_v20  ;;  %v736_v18 = vmul.f32 %v2450_v8, %v2021_v5  ;;  %v2469_v56 = vrot.slane %v2006_v55, %v1699_v20  ;;  %v2473_v36 = vrot.slane %v2009_v4, %v1699_v20  ;;  %v2487_v55 = vpop.permute.xlu0 %195 }
  0xe2   :  { %v2477_v2 = vrot.slane %v2023_v30, %v1699_v20  ;;  %v636_v26 = vadd.f32 %v634_v29, %v628_v54  ;;  %v838_v1 = vmul.f32 %v2457_v49, %v2021_v5  ;;  %v2485_v51 = vrot.slane %v2031_v40, %v1699_v20 }
  0xe3   :  { %v234_v31 = vmul.f32 %v2461_v0, %v2081_v47  ;;  %v738_v22 = vadd.f32 %v736_v18, %v730_v35  ;;  %v336_v4 = vmul.f32 %v2469_v56, %v2081_v47  ;;  %v438_v30 = vmul.f32 %v2473_v36, %v2081_v47  ;;  %v2505_v28 = vpop.permute.xlu1 %1117 }
  0xe4   :  { %v540_v60 = vmul.f32 %v2477_v2, %v2081_v47  ;;  %v840_v24 = vadd.f32 %v838_v1, %v832_v32  ;;  %v642_v17 = vmul.f32 %v2485_v51, %v2081_v47  ;;  %v2499_v40 = vrot.slane %v2046_v57, %v1699_v20  ;;  %2990 = vst [vmem:[#allocation78_spill] sm:$0xff] %v2505_v28 }
  0xe5   :  { %v236_v21 = vadd.f32 %v234_v31, %v220_v61  ;;  %v338_v63 = vadd.f32 %v336_v4, %v330_v23  ;;  %v440_v25 = vadd.f32 %v438_v30, %v432_v12  ;;  %v2503_v41 = vrot.slane %v2083_v59, %v1699_v20  ;;  %v2513_v57 = vpop.permute.xlu0 %1101  ;;  %v2993_v59 = vld [vmem:[#allocation33_spill] sm:$0xff]  ;;  %v2997_v23 = vld [vmem:[#allocation19_spill] sm:$0xff]  ;;  %v2998_v12 = vld [vmem:[#allocation22_spill] sm:$0xff] }
  0xe6   :  { %v542_v10 = vadd.f32 %v540_v60, %v534_v6  ;;  %v644_v9 = vadd.f32 %v642_v17, %v636_v26  ;;  %v744_v44 = vmul.f32 %v2499_v40, %v2081_v47  ;;  %v2511_v48 = vrot.slane %v1948_v53, %v2987_v45  ;;  %2992 = vst [vmem:[#allocation80_spill] sm:$0xff] %v2513_v57  ;;  %v3000_v4 = vld [vmem:[#allocation36_spill] sm:$0xff]  ;;  %v3024_v57 = vld [vmem:[#allocation47_spill] sm:$0xff] }
  0xe7   :  { %1520 = vtanh.f32 %v236_v21  ;;  %v846_v54 = vmul.f32 %v2503_v41, %v2081_v47  ;;  %v2519_v61 = vrot.slane %v2993_v59, %v1699_v20  ;;  %v2523_v35 = vrot.slane %v1955_v34, %v2995_v13  ;;  %v3004_v21 = vld [vmem:[#allocation14_spill] sm:$0xff]  ;;  %v3008_v59 = vld [vmem:[#allocation15_spill] sm:$0xff]  ;;  %v3020_v13 = vld [vmem:[#allocation28_spill] sm:$0xff] }
  0xe8   :  { %2991 = vst [vmem:[#allocation79_spill] sm:$0xff] %v2511_v48  ;;  %1522 = vtanh.f32 %v338_v63  ;;  %v2527_v32 = vadd.f32 %v2998_v12, %v2997_v23  ;;  %v746_v53 = vadd.f32 %v744_v44, %v738_v22  ;;  %v940_v6 = vmul.f32 %v2511_v48, %v2021_v5  ;;  %v2545_v60 = vpop.permute.xlu1 %1133  ;;  %v3007_v44 = vld [vmem:[#allocation16_spill] sm:$0xff] }
  0xe9   :  { %2994 = vst [vmem:[#allocation33_spill] sm:$0xff] %v2519_v61  ;;  %2996 = vst [vmem:[#allocation81_spill] sm:$0xff] %v2523_v35  ;;  %v2533_v29 = vrot.slane %v1955_v34, %v2987_v45  ;;  %1524 = vtanh.f32 %v440_v25  ;;  %v848_v18 = vadd.f32 %v846_v54, %v840_v24  ;;  %v948_v26 = vmul.f32 %v2519_v61, %v2081_v47  ;;  %v3003_v34 = vld [vmem:[#allocation13_spill] sm:$0xff]  ;;  %v3006_v25 = vld [vmem:[#allocation12_spill] sm:$0xff] }
  0xea   :  { %v1034_v1 = vmul.f32 %v2523_v35, %v2215_v27  ;;  %1526 = vtanh.f32 %v542_v10  ;;  %v942_v31 = vadd.f32 %v940_v6, %v934_v58  ;;  %v2543_v30 = vrot.slane %v3000_v4, %v1699_v20  ;;  %3002 = vst [vmem:[#allocation36_spill] sm:$0xff] %v2545_v60  ;;  %v3009_v6 = vld [vmem:[#allocation43_spill] sm:$0xff]  ;;  %v3010_v4 = vld [vmem:[#allocation17_spill] sm:$0xff]  ;;  %v3028_v35 = vld [vmem:[#allocation32_spill] sm:$0xff] }
  0xeb   :  { %2999 = vst [vmem:[#allocation19_spill] sm:$0xff] %v2533_v29  ;;  %v1042_v22 = vmul.f32 %v2533_v29, %v2021_v5  ;;  %v785_v24 = vadd.f32 %v3003_v34, %v2997_v23  ;;  %v887_v17 = vadd.f32 %v3004_v21, %v2997_v23  ;;  %1528 = vtanh.f32 %v644_v9  ;;  %v3005_v5 = vld [vmem:[#allocation42_spill] sm:$0xff]  ;;  %v2562_v21 = vpop.permute.xlu0 %1149  ;;  %v3021_v60 = vld [vmem:[#allocation27_spill] sm:$0xff] }
  0xec   :  { %3001 = vst [vmem:[#allocation22_spill] sm:$0xff] %v2543_v30  ;;  %v1036_v27 = vadd.f32 %v1034_v1, %v2434_v3  ;;  %v950_v63 = vadd.f32 %v948_v26, %v942_v31  ;;  %v1050_v58 = vmul.f32 %v2543_v30, %v2081_v47  ;;  %v123_v10 = vmul.f32 %v3006_v25, %v3005_v5  ;;  %v3012_v3 = vld [vmem:[#allocation18_spill] sm:$0xff]  ;;  %v3014_v31 = vld [vmem:[#allocation23_spill] sm:$0xff] }
  0xed   :  { %v281_v54 = vmul.f32 %v3007_v44, %v3005_v5  ;;  %v989_v12 = vadd.f32 %v3008_v59, %v2997_v23  ;;  %v155_v34 = vmul.f32 %v3010_v4, %v3009_v6  ;;  %1530 = vtanh.f32 %v746_v53  ;;  %3011 = vst [vmem:[#allocation13_spill] sm:$0xff] %v2562_v21  ;;  %v3013_v47 = vld [vmem:[#allocation34_spill] sm:$0xff]  ;;  %v3015_v23 = vld [vmem:[#allocation24_spill] sm:$0xff]  ;;  %v2578_v45 = vpop.permute.xlu1 %1165  ;;  %v3019_v21 = vld [vmem:[#allocation25_spill] sm:$0xff] }
  0xee   :  { %v1044_v9 = vadd.f32 %v1042_v22, %v1036_v27  ;;  %v297_v26 = vmul.f32 %v3012_v3, %v3009_v6  ;;  %v2568_v1 = vmul.f32 %v3013_v47, %v3009_v6  ;;  %1532 = vtanh.f32 %v848_v18  ;;  %v3016_v53 = vld [vmem:[#allocation20_spill] sm:$0xff]  ;;  %v3017_v27 = vld [vmem:[#allocation21_spill] sm:$0xff]  ;;  %3018 = vst [vmem:[#allocation14_spill] sm:$0xff] %v2578_v45  ;;  %v3027_v29 = vld [vmem:[#allocation30_spill] sm:$0xff] }
  0xef   :  { %v383_v25 = vmul.f32 %v3014_v31, %v3005_v5  ;;  %v485_v59 = vmul.f32 %v3015_v23, %v3005_v5  ;;  %v791_v22 = vmul.f32 %v3016_v53, %v3005_v5  ;;  %v893_v4 = vmul.f32 %v3017_v27, %v3005_v5  ;;  %v3025_v45 = vld [vmem:[#allocation29_spill] sm:$0xff]  ;;  %v2594_v61 = vpop.permute.xlu0 %1089 }
  0xf0   :  { %v1052_v44 = vadd.f32 %v1050_v58, %v1044_v9  ;;  %v125_v47 = vadd.f32 %v123_v10, %v3019_v21  ;;  %v283_v18 = vadd.f32 %v281_v54, %v3020_v13  ;;  %v995_v31 = vmul.f32 %v3021_v60, %v3005_v5  ;;  %v3022_v58 = vld [vmem:[#allocation52_spill] sm:$0xff]  ;;  %v3026_v10 = vld [vmem:[#allocation26_spill] sm:$0xff]  ;;  %3029 = vst [vmem:[#allocation42_spill] sm:$0xff] %v2594_v61 }
  0xf1   :  { %v1521_v3 = vpop.eup %1520  ;;  %v3023_v9 = vld [vmem:[#allocation44_spill] sm:$0xff]  ;;  %1534 = vtanh.f32 %v950_v63  ;;  %v793_v28 = vadd.f32 %v791_v22, %v785_v24  ;;  %v895_v53 = vadd.f32 %v893_v4, %v887_v17  ;;  %v289_v27 = vmul.f32 %v3024_v57, %v3022_v58  ;;  %v3032_v4 = vld [vmem:[#allocation45_spill] sm:$0xff] }
  0xf2   :  { %v139_v43 = vmul.f32 %v3023_v9, %v3022_v58  ;;  %v1523_v23 = vpop.eup %1522  ;;  %v385_v7 = vadd.f32 %v383_v25, %v3025_v45  ;;  %v587_v21 = vmul.f32 %v3026_v10, %v3005_v5  ;;  %v997_v13 = vadd.f32 %v995_v31, %v989_v12  ;;  %v3030_v17 = vld [vmem:[#allocation48_spill] sm:$0xff]  ;;  %v3031_v45 = vld [vmem:[#allocation49_spill] sm:$0xff]  ;;  %v3037_v10 = vld [vmem:[#allocation51_spill] sm:$0xff] }
  0xf3   :  { %v342_v30 = vadd.f32 %v1523_v23, %v1521_v3  ;;  %v1525_v54 = vpop.eup %1524  ;;  %v487_v60 = vadd.f32 %v485_v59, %v3027_v29  ;;  %v689_v9 = vmul.f32 %v3028_v35, %v3005_v5  ;;  %v391_v63 = vmul.f32 %v3030_v17, %v3022_v58  ;;  %v3033_v3 = vld [vmem:[#allocation46_spill] sm:$0xff]  ;;  %v2604_v59 = vpop.permute.xlu1 %1181  ;;  %v3036_v31 = vld [vmem:[#allocation53_spill] sm:$0xff] }
  0xf4   :  { %v141_v24 = vadd.f32 %v139_v43, %v125_v47  ;;  %v1527_v57 = vpop.eup %1526  ;;  %v493_v25 = vmul.f32 %v3031_v45, %v3022_v58  ;;  %v799_v12 = vmul.f32 %v3032_v4, %v3022_v58  ;;  %v901_v29 = vmul.f32 %v3033_v3, %v3022_v58  ;;  %3034 = vst [vmem:[#allocation12_spill] sm:$0xff] %v2604_v59  ;;  %v3035_v43 = vld [vmem:[#allocation50_spill] sm:$0xff]  ;;  %v3038_v3 = vld [vmem:[#allocation31_spill] sm:$0xff] }
  0xf5   :  { %v444_v22 = vadd.f32 %v1525_v54, %v342_v30  ;;  %v1529_v35 = vpop.eup %1528  ;;  %1536 = vtanh.f32 %v1052_v44  ;;  %v291_v5 = vadd.f32 %v289_v27, %v283_v18  ;;  %v595_v47 = vmul.f32 %v3035_v43, %v3022_v58 }
  0xf6   :  { %v1003_v30 = vmul.f32 %v3036_v31, %v3022_v58  ;;  %v697_v54 = vmul.f32 %v3037_v10, %v3022_v58  ;;  %v801_v17 = vadd.f32 %v799_v12, %v793_v28  ;;  %v2612_v45 = vadd.f32 %v901_v29, %v895_v53  ;;  %v3039_v31 = vld [vmem:[#allocation59_spill] sm:$0xff]  ;;  %v2624_v29 = vpop.permute.xlu0 %1185 }
  0xf7   :  { %v546_v23 = vadd.f32 %v1527_v57, %v444_v22  ;;  %v1531_v4 = vpop.eup %1530  ;;  %v589_v11 = vadd.f32 %v587_v21, %v3038_v3  ;;  %v691_v59 = vadd.f32 %v689_v9, %v2527_v32  ;;  %v393_v44 = vadd.f32 %v391_v63, %v385_v7  ;;  %v3040_v57 = vld [vmem:[#allocation63_spill] sm:$0xff]  ;;  %v3043_v7 = vld [vmem:[#allocation64_spill] sm:$0xff] }
  0xf8   :  { %v2616_v18 = vadd.f32 %v1003_v30, %v997_v13  ;;  %v1533_v27 = vpop.eup %1532  ;;  %v495_v61 = vadd.f32 %v493_v25, %v487_v60  ;;  %v157_v48 = vadd.f32 %v155_v34, %v141_v24  ;;  %v171_v22 = vmul.f32 %v3040_v57, %v3039_v31  ;;  %v3041_v58 = vld [vmem:[#allocation35_spill] sm:$0xff]  ;;  %v2628_v13 = vpop.permute.xlu1 %1197  ;;  %v3044_v60 = vld [vmem:[#allocation37_spill] sm:$0xff] }
  0xf9   :  { %v648_v43 = vadd.f32 %v1529_v35, %v546_v23  ;;  %v501_v28 = vmul.f32 %v3041_v58, %v3009_v6  ;;  %v3042_v53 = vld [vmem:[#allocation39_spill] sm:$0xff]  ;;  %v299_v21 = vadd.f32 %v297_v26, %v291_v5  ;;  %v305_v32 = vmul.f32 %v3043_v7, %v3039_v31  ;;  %v3045_v30 = vld [vmem:[#allocation65_spill] sm:$0xff]  ;;  %v3046_v26 = vld [vmem:[#allocation70_spill] sm:$0xff] }
  0xfa   :  { %v807_v12 = vmul.f32 %v3042_v53, %v3009_v6  ;;  %v603_v34 = vmul.f32 %v3044_v60, %v3009_v6  ;;  %v597_v24 = vadd.f32 %v595_v47, %v589_v11  ;;  %v699_v63 = vadd.f32 %v697_v54, %v691_v59  ;;  %v3047_v53 = vld [vmem:[#allocation66_spill] sm:$0xff]  ;;  %v3048_v11 = vld [vmem:[#allocation68_spill] sm:$0xff] }
  0xfb   :  { %v750_v9 = vadd.f32 %v1531_v4, %v648_v43  ;;  %v1535_v25 = vpop.eup %1534  ;;  %v401_v35 = vadd.f32 %v2568_v1, %v393_v44  ;;  %v407_v23 = vmul.f32 %v3045_v30, %v3039_v31  ;;  %v815_v5 = vmul.f32 %v3046_v26, %v3039_v31  ;;  %v3049_v47 = vld [vmem:[#allocation38_spill] sm:$0xff]  ;;  %v3053_v26 = vld [vmem:[#allocation69_spill] sm:$0xff] }
  0xfc   :  { %v809_v10 = vadd.f32 %v807_v12, %v801_v17  ;;  %v173_v57 = vadd.f32 %v171_v22, %v157_v48  ;;  %v503_v58 = vadd.f32 %v501_v28, %v495_v61  ;;  %v509_v7 = vmul.f32 %v3047_v53, %v3039_v31  ;;  %v2651_v44 = vpop.permute.xlu1 %1079  ;;  %v3050_v43 = vld [vmem:[#allocation54_spill] sm:$0xff]  ;;  %v2655_v28 = vpop.permute.xlu0 %1060  ;;  %v3054_v53 = vld [vmem:[#allocation56_spill] sm:$0xff] }
  0xfd   :  { %v852_v3 = vadd.f32 %v1533_v27, %v750_v9  ;;  %v307_v60 = vadd.f32 %v305_v32, %v299_v21  ;;  %v187_v59 = vmul.f32 %v2354_v19, %v3048_v11  ;;  %v313_v1 = vmul.f32 %v2358_v38, %v3048_v11  ;;  %v3051_v21 = vld [vmem:[#allocation55_spill] sm:$0xff] }
  0xfe   :  { %v2639_v4 = vadd.f32 %v815_v5, %v809_v10  ;;  %v705_v54 = vmul.f32 %v3049_v47, %v3009_v6  ;;  %v415_v48 = vmul.f32 %v2362_v16, %v3048_v11  ;;  %v517_v61 = vmul.f32 %v2366_v62, %v3048_v11  ;;  %v3052_v62 = vld [vmem:[#allocation67_spill] sm:$0xff] }
  0xff   :  { %v954_v17 = vadd.f32 %v1535_v25, %v852_v3  ;;  %v1537_v27 = vpop.eup %1536  ;;  %v203_v22 = vmul.f32 %v3050_v43, %v2487_v55  ;;  %v409_v19 = vadd.f32 %v407_v23, %v401_v35  ;;  %v189_v38 = vadd.f32 %v187_v59, %v173_v57 }
 0x100   :  { %v315_v12 = vadd.f32 %v313_v1, %v307_v60  ;;  %v321_v32 = vmul.f32 %v3051_v21, %v2487_v55  ;;  %v511_v16 = vadd.f32 %v509_v7, %v503_v58  ;;  %v605_v25 = vadd.f32 %v603_v34, %v597_v24  ;;  %v3056_v7 = vld [vmem:[#allocation73_spill] sm:$0xff] }
 0x101   :  { %v2659_v9 = vadd.f32 %v1537_v27, %v954_v17  ;;  %v611_v30 = vmul.f32 %v3052_v62, %v3039_v31  ;;  %v707_v10 = vadd.f32 %v705_v54, %v699_v63  ;;  %v713_v5 = vmul.f32 %v3053_v26, %v3039_v31  ;;  %v2671_v24 = vpop.permute.xlu1 %1105  ;;  %v3055_v63 = vld [vmem:[#allocation57_spill] sm:$0xff]  ;;  %v3057_v17 = vld [vmem:[#allocation74_spill] sm:$0xff] }
 0x102   :  { %v417_v3 = vadd.f32 %v415_v48, %v409_v19  ;;  %v519_v35 = vadd.f32 %v517_v61, %v511_v16  ;;  %v205_v23 = vadd.f32 %v203_v22, %v189_v38  ;;  %v219_v57 = vmul.f32 %v2411_v33, %v2348_v14  ;;  %v1066_v48 = vpop.permute.xlu0 %1065  ;;  %v3058_v38 = vld [vmem:[#allocation75_spill] sm:$0xff]  ;;  %v3059_v16 = vld [vmem:[#allocation40_spill] sm:$0xff] }
 0x103   :  { %v423_v60 = vmul.f32 %v3054_v53, %v2487_v55  ;;  %v323_v59 = vadd.f32 %v321_v32, %v315_v12  ;;  %v329_v34 = vmul.f32 %v2418_v46, %v2348_v14  ;;  %v525_v58 = vmul.f32 %v3055_v63, %v2487_v55  ;;  %v3063_v63 = vld [vmem:[#allocation61_spill] sm:$0xff] }
 0x104   :  { %v619_v1 = vmul.f32 %v3056_v7, %v3048_v11  ;;  %v613_v47 = vadd.f32 %v611_v30, %v605_v25  ;;  %v715_v54 = vadd.f32 %v713_v5, %v707_v10  ;;  %v721_v33 = vmul.f32 %v3057_v17, %v3048_v11  ;;  %v3064_v7 = vld [vmem:[#allocation71_spill] sm:$0xff] }
 0x105   :  { %v425_v61 = vadd.f32 %v423_v60, %v417_v3  ;;  %v221_v27 = vadd.f32 %v219_v57, %v205_v23  ;;  %v331_v43 = vadd.f32 %v329_v34, %v323_v59  ;;  %v431_v46 = vmul.f32 %v2423_v50, %v2348_v14 }
 0x106   :  { %v527_v22 = vadd.f32 %v525_v58, %v519_v35  ;;  %v533_v19 = vmul.f32 %v2432_v39, %v2348_v14  ;;  %v235_v12 = vmul.f32 %v2461_v0, %v3058_v38  ;;  %v337_v21 = vmul.f32 %v2469_v56, %v3058_v38  ;;  %v2691_v10 = vpop.permute.xlu1 %1121  ;;  %v3060_v0 = vld [vmem:[#allocation58_spill] sm:$0xff]  ;;  %v3061_v56 = vld [vmem:[#allocation60_spill] sm:$0xff]  ;;  %v2701_v57 = vpop.permute.xlu0 %1216 }
 0x107   :  { %v439_v32 = vmul.f32 %v2473_v36, %v3058_v38  ;;  %v909_v25 = vmul.f32 %v3059_v16, %v3009_v6  ;;  %v621_v62 = vadd.f32 %v619_v1, %v613_v47  ;;  %v433_v30 = vadd.f32 %v431_v46, %v425_v61 }
 0x108   :  { %v723_v50 = vadd.f32 %v721_v33, %v715_v54  ;;  %v237_v26 = vadd.f32 %v235_v12, %v221_v27  ;;  %v339_v5 = vadd.f32 %v337_v21, %v331_v43  ;;  %v541_v39 = vmul.f32 %v2477_v2, %v3058_v38  ;;  %v3062_v2 = vld [vmem:[#allocation41_spill] sm:$0xff] }
 0x109   :  { %v627_v3 = vmul.f32 %v3060_v0, %v2487_v55  ;;  %v729_v35 = vmul.f32 %v3061_v56, %v2487_v55  ;;  %v823_v36 = vmul.f32 %v2380_v15, %v3048_v11  ;;  %v441_v23 = vadd.f32 %v439_v32, %v433_v30  ;;  %v3068_v0 = vld [vmem:[#allocation62_spill] sm:$0xff]  ;;  %v3069_v56 = vld [vmem:[#allocation79_spill] sm:$0xff] }
 0x10a   :  { %v535_v53 = vadd.f32 %v533_v19, %v527_v22  ;;  %v635_v60 = vmul.f32 %v2445_v37, %v2348_v14  ;;  %v737_v59 = vmul.f32 %v2450_v8, %v2348_v14  ;;  %1538 = vtanh.f32 %v237_v26  ;;  %v3065_v19 = vld [vmem:[#allocation5_spill] sm:$0xff]  ;;  %v2733_v21 = vpop.permute.xlu0 %1231 }
 0x10b   :  { %v1011_v34 = vmul.f32 %v3062_v2, %v3009_v6  ;;  %v831_v58 = vmul.f32 %v3063_v63, %v2487_v55  ;;  %v917_v15 = vmul.f32 %v3064_v7, %v3039_v31  ;;  %1540 = vtanh.f32 %v339_v5  ;;  %v2715_v17 = vpop.permute.xlu1 %1153  ;;  %v3072_v2 = vld [vmem:[#allocation33_spill] sm:$0xff] }
 0x10c   :  { %v643_v1 = vmul.f32 %v2485_v51, %v3058_v38  ;;  %v543_v47 = vadd.f32 %v541_v39, %v535_v53  ;;  %v629_v54 = vadd.f32 %v627_v3, %v621_v62  ;;  %v731_v37 = vadd.f32 %v729_v35, %v723_v50  ;;  %v3071_v53 = vld [vmem:[#allocation77_spill] sm:$0xff] }
 0x10d   :  { %1542 = vtanh.f32 %v441_v23  ;;  %v745_v8 = vmul.f32 %v2499_v40, %v3058_v38  ;;  %v825_v6 = vadd.f32 %v823_v36, %v2639_v4  ;;  %v839_v33 = vmul.f32 %v2457_v49, %v2348_v14  ;;  %v3066_v49 = vld [vmem:[#allocation72_spill] sm:$0xff]  ;;  %v3070_v23 = vld [vmem:[#allocation42_spill] sm:$0xff] }
 0x10e   :  { %v1071_v61 = vrot.slane %v2659_v9, %v1699_v20  ;;  %v925_v51 = vmul.f32 %v2391_v42, %v3048_v11  ;;  %v637_v27 = vadd.f32 %v635_v60, %v629_v54  ;;  %v739_v43 = vadd.f32 %v737_v59, %v731_v37  ;;  %v3067_v42 = vld [vmem:[#allocation7_spill] sm:$0xff] }
 0x10f   :  { %1544 = vtanh.f32 %v543_v47  ;;  %v833_v46 = vadd.f32 %v831_v58, %v825_v6  ;;  %v847_v22 = vmul.f32 %v2503_v41, %v3058_v38  ;;  %v911_v40 = vadd.f32 %v909_v25, %v2612_v45  ;;  %v2754_v58 = vpop.permute.xlu0 %1257 }
 0x110   :  { %v1095_v4 = vrot.slane %v2659_v9, %v3065_v19  ;;  %v1019_v12 = vmul.f32 %v3066_v49, %v3039_v31  ;;  %v645_v32 = vadd.f32 %v643_v1, %v637_v27  ;;  %v747_v16 = vadd.f32 %v745_v8, %v739_v43  ;;  %v2738_v41 = vpop.permute.xlu1 %1169  ;;  %v3074_v1 = vld [vmem:[#allocation19_spill] sm:$0xff]  ;;  %v3075_v8 = vld [vmem:[#allocation76_spill] sm:$0xff]  ;;  %v3077_v43 = vld [vmem:[#allocation22_spill] sm:$0xff] }
 0x111   :  { %v1111_v62 = vrot.slane %v2659_v9, %v3067_v42  ;;  %v841_v30 = vadd.f32 %v839_v33, %v833_v46  ;;  %v919_v50 = vadd.f32 %v917_v15, %v911_v40  ;;  %v1013_v26 = vadd.f32 %v1011_v34, %v2616_v18  ;;  %v3076_v33 = vld [vmem:[#allocation6_spill] sm:$0xff] }
 0x112   :  { %v1072_v45 = vmul.f32 %v1071_v61, %v2655_v28  ;;  %v1073_v25 = vmul.f32 %v1071_v61, %v1066_v48  ;;  %1546 = vtanh.f32 %v645_v32  ;;  %v1027_v31 = vmul.f32 %v2406_v52, %v3048_v11  ;;  %v3073_v11 = vld [vmem:[#allocation81_spill] sm:$0xff] }
 0x113   :  { %v849_v5 = vadd.f32 %v847_v22, %v841_v30  ;;  %v927_v39 = vadd.f32 %v925_v51, %v919_v50  ;;  %v933_v3 = vmul.f32 %v3068_v0, %v2487_v55  ;;  %v941_v35 = vmul.f32 %v3069_v56, %v2348_v14 }
 0x114   :  { %v1539_v36 = vpop.eup %1538  ;;  %v1097_v18 = vmul.f32 %v1095_v4, %v3070_v23  ;;  %v1096_v60 = vmul.f32 %v1095_v4, %v3071_v53  ;;  %1548 = vtanh.f32 %v747_v16  ;;  %v1021_v28 = vadd.f32 %v1019_v12, %v1013_v26  ;;  %v3078_v16 = vld [vmem:[#allocation80_spill] sm:$0xff] }
 0x115   :  { %v1541_v48 = vpop.eup %1540  ;;  %v935_v59 = vadd.f32 %v933_v3, %v927_v39  ;;  %v949_v52 = vmul.f32 %v3072_v2, %v3058_v38  ;;  %v1035_v34 = vmul.f32 %v3073_v11, %v2487_v55  ;;  %v1083_v63 = vadd.f32 %v2651_v44, %v1073_v25  ;;  %v1202_v54 = vpop.permute.xlu1 %1201  ;;  %v3079_v25 = vld [vmem:[#allocation8_spill] sm:$0xff]  ;;  %v3080_v39 = vld [vmem:[#allocation78_spill] sm:$0xff] }
 0x116   :  { %v343_v7 = vadd.f32 %v1541_v48, %v1539_v36  ;;  %1550 = vtanh.f32 %v849_v5  ;;  %v1029_v15 = vadd.f32 %v1027_v31, %v1021_v28  ;;  %v1043_v47 = vmul.f32 %v3074_v1, %v2348_v14  ;;  %v3082_v23 = vld [vmem:[#allocation36_spill] sm:$0xff]  ;;  %v3083_v28 = vld [vmem:[#allocation9_spill] sm:$0xff] }
 0x117   :  { %v1543_v37 = vpop.eup %1542  ;;  %v1082_v6 = vadd.f32 %v3075_v8, %v1072_v45  ;;  %v1127_v61 = vrot.slane %v2659_v9, %v3076_v33  ;;  %v943_v51 = vadd.f32 %v941_v35, %v935_v59  ;;  %v1113_v55 = vmul.f32 %v1111_v62, %v2671_v24  ;;  %v1138_v24 = vpop.permute.xlu0 %1137  ;;  %v3084_v1 = vld [vmem:[#allocation13_spill] sm:$0xff] }
 0x118   :  { %v445_v27 = vadd.f32 %v1543_v37, %v343_v7  ;;  %v1037_v44 = vadd.f32 %v1035_v34, %v1029_v15  ;;  %v1051_v46 = vmul.f32 %v3077_v43, %v3058_v38  ;;  %v1099_v49 = vadd.f32 %v1097_v18, %v1083_v63  ;;  %v3085_v37 = vld [vmem:[#allocation10_spill] sm:$0xff] }
 0x119   :  { %v1545_v22 = vpop.eup %1544  ;;  %v1098_v40 = vadd.f32 %v1096_v60, %v1082_v6  ;;  %v951_v4 = vadd.f32 %v949_v52, %v943_v51  ;;  %v1129_v14 = vmul.f32 %v1127_v61, %v2691_v10  ;;  %v1112_v30 = vmul.f32 %v1111_v62, %v3078_v16  ;;  %v3081_v10 = vld [vmem:[#allocation11_spill] sm:$0xff] }
 0x11a   :  { %v547_v12 = vadd.f32 %v1545_v22, %v445_v27  ;;  %v1045_v32 = vadd.f32 %v1043_v47, %v1037_v44  ;;  %v1115_v50 = vadd.f32 %v1113_v55, %v1099_v49  ;;  %v1222_v26 = vpop.permute.xlu1 %1221  ;;  %v1143_v31 = vrot.slane %v2659_v9, %v3079_v25  ;;  %v3086_v27 = vld [vmem:[#allocation14_spill] sm:$0xff] }
 0x11b   :  { %1552 = vtanh.f32 %v951_v4  ;;  %v1114_v38 = vadd.f32 %v1112_v30, %v1098_v40  ;;  %v1128_v0 = vmul.f32 %v1127_v61, %v3080_v39  ;;  %v1159_v36 = vrot.slane %v2659_v9, %v3081_v10 }
 0x11c   :  { %v1547_v45 = vpop.eup %1546  ;;  %v1053_v5 = vadd.f32 %v1051_v46, %v1045_v32  ;;  %v1131_v56 = vadd.f32 %v1129_v14, %v1115_v50  ;;  %v1145_v62 = vmul.f32 %v1143_v31, %v1138_v24  ;;  %v1144_v18 = vmul.f32 %v1143_v31, %v3082_v23 }
 0x11d   :  { %v649_v3 = vadd.f32 %v1547_v45, %v547_v12  ;;  %v1175_v48 = vrot.slane %v2659_v9, %v3083_v28  ;;  %v1130_v2 = vadd.f32 %v1128_v0, %v1114_v38  ;;  %v1161_v34 = vmul.f32 %v1159_v36, %v2715_v17  ;;  %v3087_v17 = vld [vmem:[#allocation12_spill] sm:$0xff] }
 0x11e   :  { %v1549_v35 = vpop.eup %1548  ;;  %1554 = vtanh.f32 %v1053_v5  ;;  %v1147_v11 = vadd.f32 %v1145_v62, %v1131_v56  ;;  %v1160_v47 = vmul.f32 %v1159_v36, %v3084_v1  ;;  %v1191_v8 = vrot.slane %v2659_v9, %v3085_v37 }
 0x11f   :  { %v751_v53 = vadd.f32 %v1549_v35, %v649_v3  ;;  %v1236_v59 = vpop.permute.xlu1 %1235  ;;  %v1146_v63 = vadd.f32 %v1144_v18, %v1130_v2  ;;  %v1177_v7 = vmul.f32 %v1175_v48, %v2738_v41  ;;  %v1176_v44 = vmul.f32 %v1175_v48, %v3086_v27  ;;  %v1294_v3 = vpop.permute.xlu0 %1293 }
 0x120   :  { %v1551_v60 = vpop.eup %1550  ;;  %v1163_v6 = vadd.f32 %v1161_v34, %v1147_v11  ;;  %v1193_v22 = vmul.f32 %v1191_v8, %v2624_v29  ;;  %v1192_v40 = vmul.f32 %v1191_v8, %v3087_v17 }
 0x121   :  { %v853_v52 = vadd.f32 %v1551_v60, %v751_v53  ;;  %v1162_v55 = vadd.f32 %v1160_v47, %v1146_v63 }
 0x122   :  { %v1179_v43 = vadd.f32 %v1177_v7, %v1163_v6 }
 0x123   :  { %v1178_v49 = vadd.f32 %v1176_v44, %v1162_v55  ;;  %v1306_v2 = vpop.permute.xlu0 %1305 }
 0x124   :  { %v1246_v61 = vpop.permute.xlu1 %1245  ;;  %v1195_v12 = vadd.f32 %v1193_v22, %v1179_v43 }
 0x125   :  { %v1553_v15 = vpop.eup %1552  ;;  %v1194_v32 = vadd.f32 %v1192_v40, %v1178_v49 }
 0x126   :  { %v955_v51 = vadd.f32 %v1553_v15, %v853_v52 }
 0x127   :  { %v1342_v8 = vpop.permute.xlu0 %1341 }
 0x128   :  { %v1555_v46 = vpop.eup %1554  ;;  %v1242_v41 = vpop.permute.xlu1 %1241 }
 0x129   :  { %v1057_v4 = vadd.f32 %v1555_v46, %v955_v51 }
 0x12b   :  { %v1207_v14 = vrot.slane %v1057_v4, %v1699_v20 }
 0x12d   :  { %v1208_v9 = vmul.f32 %v1207_v14, %v2628_v13  ;;  %v1209_v16 = vmul.f32 %v1207_v14, %v1202_v54  ;;  %v1262_v30 = vpop.permute.xlu1 %1261 }
 0x12f   :  { %v1210_v50 = vadd.f32 %v1208_v9, %v1194_v32  ;;  %v1211_v45 = vadd.f32 %v1209_v16, %v1195_v12 }
 0x131   :  { %1556 = vtanh.f32 %v1210_v50 }
 0x132   :  { %v1278_v24 = vpop.permute.xlu1 %1277  ;;  %1558 = vtanh.f32 %v1211_v45 }
 0x136   :  { %v1274_v31 = vpop.permute.xlu1 %1273 }
 0x13b   :  { %v1557_v5 = vpop.eup %1556  ;;  %v1290_v38 = vpop.permute.xlu1 %1289 }
 0x13c   :  { %v1227_v29 = vrot.slane %v1557_v5, %v1699_v20  ;;  %v1251_v39 = vrot.slane %v1557_v5, %v3065_v19  ;;  %v1267_v13 = vrot.slane %v1557_v5, %v3067_v42  ;;  %v1283_v18 = vrot.slane %v1557_v5, %v3076_v33  ;;  %v1559_v47 = vpop.eup %1558 }
 0x13d   :  { %v1299_v48 = vrot.slane %v1557_v5, %v3079_v25  ;;  %v1331_v33 = vrot.slane %v1557_v5, %v3083_v28  ;;  %v1347_v27 = vrot.slane %v1557_v5, %v3085_v37  ;;  %v1363_v44 = vrot.slane %v1559_v47, %v1699_v20 }
 0x13e   :  { %v1228_v0 = vmul.f32 %v1227_v29, %v2701_v57  ;;  %v1252_v56 = vmul.f32 %v1251_v39, %v1242_v41  ;;  %v1229_v54 = vmul.f32 %v1227_v29, %v1222_v26  ;;  %v1253_v36 = vmul.f32 %v1251_v39, %v1246_v61 }
 0x13f   :  { %v1269_v60 = vmul.f32 %v1267_v13, %v1262_v30  ;;  %v1268_v19 = vmul.f32 %v1267_v13, %v2754_v58  ;;  %v1284_v57 = vmul.f32 %v1283_v18, %v1274_v31  ;;  %v1285_v11 = vmul.f32 %v1283_v18, %v1278_v24 }
 0x140   :  { %v1238_v35 = vadd.f32 %v2733_v21, %v1228_v0  ;;  %v1310_v62 = vpop.permute.xlu1 %1309  ;;  %v1239_v53 = vadd.f32 %v1236_v59, %v1229_v54  ;;  %v1300_v34 = vmul.f32 %v1299_v48, %v1290_v38  ;;  %v1315_v26 = vrot.slane %v1557_v5, %v3081_v10  ;;  %v1354_v10 = vpop.permute.xlu0 %1353 }
 0x141   :  { %v1301_v25 = vmul.f32 %v1299_v48, %v1294_v3  ;;  %v1364_v4 = vmul.f32 %v1363_v44, %v1354_v10  ;;  %v1349_v49 = vmul.f32 %v1347_v27, %v1342_v8 }
 0x142   :  { %v1254_v23 = vadd.f32 %v1252_v56, %v1238_v35  ;;  %v1255_v52 = vadd.f32 %v1253_v36, %v1239_v53  ;;  %v1317_v58 = vmul.f32 %v1315_v26, %v1310_v62  ;;  %v1316_v6 = vmul.f32 %v1315_v26, %v1306_v2 }
 0x144   :  { %v1270_v21 = vadd.f32 %v1268_v19, %v1254_v23  ;;  %v1271_v63 = vadd.f32 %v1269_v60, %v1255_v52 }
 0x146   :  { %v1326_v42 = vpop.permute.xlu1 %1325  ;;  %v1286_v7 = vadd.f32 %v1284_v57, %v1270_v21  ;;  %v1287_v15 = vadd.f32 %v1285_v11, %v1271_v63 }
 0x147   :  { %v1333_v55 = vmul.f32 %v1331_v33, %v1326_v42 }
 0x148   :  { %v1302_v1 = vadd.f32 %v1300_v34, %v1286_v7  ;;  %v1303_v51 = vadd.f32 %v1301_v25, %v1287_v15 }
 0x14a   :  { %v1322_v59 = vpop.permute.xlu1 %1321  ;;  %v1318_v43 = vadd.f32 %v1316_v6, %v1302_v1  ;;  %v1319_v46 = vadd.f32 %v1317_v58, %v1303_v51 }
 0x14b   :  { %v1332_v61 = vmul.f32 %v1331_v33, %v1322_v59 }
 0x14c   :  { %v1335_v28 = vadd.f32 %v1333_v55, %v1319_v46 }
 0x14d   :  { %v1334_v17 = vadd.f32 %v1332_v61, %v1318_v43 }
 0x14e   :  { %v1351_v32 = vadd.f32 %v1349_v49, %v1335_v28 }
 0x151   :  { %v1338_v22 = vpop.permute.xlu1 %1337 }
 0x152   :  { %v1348_v40 = vmul.f32 %v1347_v27, %v1338_v22 }
 0x154   :  { %v1350_v41 = vadd.f32 %v1348_v40, %v1334_v17 }
 0x156   :  { %v1366_v14 = vadd.f32 %v1364_v4, %v1350_v41  ;;  %v1358_v12 = vpop.permute.xlu1 %1357 }
 0x157   :  { %v1365_v9 = vmul.f32 %v1363_v44, %v1358_v12 }
 0x159   :  { %v1367_v16 = vadd.f32 %v1365_v9, %v1351_v32 }
 0x15b   :  { %v1369_v37 = vsel %vm1368_vm0, %v1367_v16, -inf }
 0x15c   :  { %v1370_v30 = vmax.f32 %v1366_v14, %v1369_v37 }
 0x15e   :  { %v1371_v20 = vrot.slane %v1370_v30, 4 }
 0x160   :  { %v1372_v50 = vmax.f32 %v1370_v30, %v1371_v20 }
 0x162   :  { %v1373_v45 = vrot.slane %v1372_v50, 2 }
 0x164   :  { %v1374_v24 = vmax.f32 %v1372_v50, %v1373_v45 }
 0x166   :  { %v1375_v31 = vrot.slane %v1374_v24, 1 }
 0x168   :  { %v1376_v5 = vmax.f32 %v1374_v24, %v1375_v31 }
 0x16a   :  { %v1377_v29 = vsub.f32 %v1366_v14, %v1376_v5  ;;  %v1378_v38 = vsub.f32 %v1367_v16, %v1376_v5 }
 0x16c   :  { %v1379_v39 = vmul.f32 1.442695, %v1377_v29  ;;  %v1381_v0 = vmul.f32 1.442695, %v1378_v38 }
 0x16e   :  { %1560 = vpow2.f32 %v1379_v39 }
 0x16f   :  { %1562 = vpow2.f32 %v1381_v0 }
 0x178   :  { %v1561_v3 = vpop.eup %1560 }
 0x179   :  { %v1563_v56 = vpop.eup %1562 }
 0x17a   :  { %v1383_v35 = vsel %vm1368_vm0, %v1563_v56, 0.0 }
 0x17b   :  { %v1384_v13 = vadd.f32 %v1561_v3, %v1383_v35 }
 0x17d   :  { %v1385_v54 = vrot.slane %v1384_v13, 4 }
 0x17f   :  { %v1386_v36 = vadd.f32 %v1385_v54, %v1384_v13 }
 0x181   :  { %v1387_v62 = vrot.slane %v1386_v36, 2 }
 0x183   :  { %v1388_v23 = vadd.f32 %v1387_v62, %v1386_v36 }
 0x185   :  { %v1389_v18 = vrot.slane %v1388_v23, 1 }
 0x187   :  { %v1390_v53 = vadd.f32 %v1389_v18, %v1388_v23 }
 0x189   :  { %1564 = vrcp.f32 %v1390_v53 }
 0x193   :  { %v1565_v60 = vpop.eup %1564 }
 0x194   :  { %v1392_v48 = vmul.f32 %v1565_v60, %v1390_v53 }
 0x196   :  { %v1393_v19 = vsub.f32 2.0, %v1392_v48 }
 0x198   :  { %v1394_v57 = vmul.f32 %v1565_v60, %v1393_v19 }
 0x19a   :  { %v1395_v2 = vmul.f32 %v1561_v3, %v1394_v57  ;;  %v1396_v52 = vmul.f32 %v1563_v56, %v1394_v57 }
 0x19c   :  { %1397 = vst [vmem:[#allocation2] sm:$0xff] %v1395_v2  ;;  %1398 = vst [vmem:[#allocation2 + $0x8] sm:$0x1] %v1396_v52 }
 0x19d   :  { %1577 = shalt.err (!%p1574_p4)
}
 0x19e   :  { %s1578_s8 = scalar_lea.hbm %s2812_s2, 256 }
 0x19f   :  { %p1579_p5 = scmp.ne.s32.totalorder %s2812_s2, %s1578_s8  ;;  %p1582_p6 = scmp.lt.u32.totalorder %s1578_s8, %s2812_s2 }
 0x1a1   :  { %p1584_p7 = pnand %p1582_p6, %p1579_p5 }
 0x1a3   :  { %1587 = shalt.err (!%p1584_p7)
}
 0x1a4   :  { %s1601_s13 = smov 128   ;;  %s1602_s14 = smov 8  }
 0x1a5   :  { %1410 = dma.vmem_to_hbm [thread:$0]  %s1405_s4, 256, %s2812_s2, [#allocation3], %s1601_s13, %s1601_s13, %s1602_s14  }
 0x1a6   :  { %1588 = dma.done.wait [#allocation3], 256  }
 0x1a7   :  { %1589 = vsyncadd [#allocation3], 4294967040 }
 0x1a8   :  { %1414 = vsyncpa [#allocation3], 1 }

</bundles_post_ra>
